<compile_context>
chip_gen: v7x
topology: tpu7x:2x2x1
jax: 0.10.0
libtpu: 0.0.40
codegen_flags: <defaults>
</compile_context>

<pallas_src>
import functools

import jax
import jax.numpy as jnp
from jax.experimental import pallas as pl
from jax.experimental.pallas import tpu as pltpu

EPS = 1e-5          # PyTorch BatchNorm2d default
LANE = 128
SUBLANE = 8


def _round_up(x, m):
    return (x + m - 1) // m * m


@functools.lru_cache(maxsize=None)
def _vmem_budget_bytes():
    """Generation-aware scoped-VMEM budget (leave 25% headroom)."""
    try:
        cap = int(pltpu.get_tpu_info().vmem_capacity_bytes)
    except Exception:
        cap = 64 * 1024 * 1024   # safe on every generation (v7x has 64 MiB)
    return (cap * 3) // 4


# --------------------------------------------------------------------------- #
# Shared per-tile conv: im2col (K padded to 128 lanes) + one MXU matmul
# --------------------------------------------------------------------------- #
def _conv_tile(x_ref, w_ref):
    # x_ref: (1, H+2, W+2, Cin_p)   pre-padded NHWC sample
    # w_ref: (K_p, Cout_t)          im2col weights (rows >= 9*Cin_p are zero)
    hp2, wp2, cin_p = x_ref.shape[1], x_ref.shape[2], x_ref.shape[3]
    h, w = hp2 - 2, wp2 - 2
    k_p, _ = w_ref.shape

    x = x_ref[0]                                               # (H+2, W+2, Cin_p)
    cols = [x[kh:kh + h, kw:kw + w, :] for kh in range(3) for kw in range(3)]
    k_real = 9 * cin_p
    if k_p > k_real:                                           # lane-align K
        cols.append(jnp.zeros((h, w, k_p - k_real), dtype=x.dtype))
    patches = jnp.concatenate(cols, axis=-1).reshape(h * w, k_p)

    conv = jnp.dot(patches, w_ref[...], preferred_element_type=jnp.float32)
    return conv, h, w                                          # (H*W, Cout_t)


# --------------------------------------------------------------------------- #
# Pass 1: stats only -- per-channel [sum, sumsq]; conv stays in VMEM
# --------------------------------------------------------------------------- #
def _conv_stats_kernel(x_ref, w_ref, stats_ref):
    conv, _, _ = _conv_tile(x_ref, w_ref)                      # (H*W, Cout_t)
    s1 = jnp.sum(conv, axis=0, keepdims=True)                  # (1, Cout_t)
    s2 = jnp.sum(conv * conv, axis=0, keepdims=True)           # (1, Cout_t)
    stats_ref[0] = jnp.concatenate([s1, s2], axis=0)           # (2, Cout_t)


# --------------------------------------------------------------------------- #
# Pass 2: fused conv (recompute) + BN (folded constants) + ReLU
# --------------------------------------------------------------------------- #
def _conv_bn_relu_kernel(x_ref, w_ref, scale_ref, shift_ref, o_ref):
    conv, h, w = _conv_tile(x_ref, w_ref)                      # (H*W, Cout_t)
    co = o_ref.shape[-1]
    y = jnp.maximum(conv * scale_ref[...] + shift_ref[...], 0.0)
    o_ref[0] = y.reshape(h, w, co)


# --------------------------------------------------------------------------- #
# Wrapper
# --------------------------------------------------------------------------- #
@jax.jit
def m_conv_forward(x_nchw, w_oihw, bias, gamma, beta):
    """x_nchw: (N, Cin, H, W) float32. Returns (N, Cout, H, W) float32."""
    # A per-channel bias before train-mode BatchNorm cancels exactly in the output.
    del bias

    N, Cin, H, W = x_nchw.shape
    Cout = w_oihw.shape[0]

    Cin_p = _round_up(Cin, SUBLANE)
    Cout_p = _round_up(Cout, LANE)
    K_real = 9 * Cin_p
    K_p = _round_up(K_real, LANE)
    tile_co = 256 if Cout_p % 256 == 0 else LANE               # 256-wide MXU on v6e/v7x
    n_cog = Cout_p // tile_co

    vmem_budget = _vmem_budget_bytes()
    # per-step working set: double-buffered input / weights / output + patch & conv temps
    step_bytes = 4 * (2 * (H + 2) * (W + 2) * Cin_p + 2 * K_p * tile_co
                      + 2 * H * W * tile_co + H * W * K_p + H * W * tile_co)
    assert step_bytes <= vmem_budget, (
        f"per-step working set {step_bytes} B exceeds VMEM budget {vmem_budget} B; "
        "H-tiling with overlapping-window DMA not implemented")

    # ---- boundary glue: NCHW -> NHWC, spatial zero-pad, channel pad -----------
    x_nhwc = jnp.transpose(x_nchw, (0, 2, 3, 1))               # (N, H, W, Cin)
    x_pad = jnp.pad(x_nhwc, ((0, 0), (1, 1), (1, 1), (0, Cin_p - Cin)))

    # Weights: OIHW -> HWIO, pad channels, im2col layout, lane-pad K to K_p
    w_hwio = jnp.transpose(w_oihw, (2, 3, 1, 0))               # (3, 3, Cin, Cout)
    w_pad = jnp.pad(w_hwio, ((0, 0), (0, 0), (0, Cin_p - Cin), (0, Cout_p - Cout)))
    w2d = jnp.pad(w_pad.reshape(K_real, Cout_p), ((0, K_p - K_real), (0, 0)))

    matmul_flops = 2 * N * H * W * K_p * Cout_p

    # ---- pass 1: per-channel sum / sumsq (conv never leaves VMEM) -------------
    stats = pl.pallas_call(
        _conv_stats_kernel,
        out_shape=jax.ShapeDtypeStruct((N, 2, Cout_p), jnp.float32),
        grid_spec=pltpu.PrefetchScalarGridSpec(
            num_scalar_prefetch=0,
            grid=(N, n_cog),
            in_specs=[
                pl.BlockSpec((1, H + 2, W + 2, Cin_p), lambda n, co: (n, 0, 0, 0)),
                pl.BlockSpec((K_p, tile_co), lambda n, co: (0, co)),
            ],
            out_specs=pl.BlockSpec((1, 2, tile_co), lambda n, co: (n, 0, co)),
        ),
        compiler_params=pltpu.CompilerParams(
            dimension_semantics=("parallel", "parallel"),
            vmem_limit_bytes=vmem_budget),
        cost_estimate=pl.CostEstimate(
            flops=matmul_flops, transcendentals=0,
            bytes_accessed=4 * (x_pad.size + n_cog * w2d.size + N * 2 * Cout_p)),
    )(x_pad, w2d)

    # ---- tiny per-channel reduction + BN constant folding (wrapper-side) ------
    s = jnp.sum(stats, axis=0)                                 # (2, Cout_p)
    count = jnp.float32(N * H * W)
    mean = s[0] / count
    var = jnp.maximum(s[1] / count - mean * mean, 0.0)         # biased batch variance
    inv = jax.lax.rsqrt(var + EPS)
    gamma_p = jnp.pad(gamma, (0, Cout_p - Cout))
    beta_p = jnp.pad(beta, (0, Cout_p - Cout))
    scale = (gamma_p * inv).reshape(1, Cout_p)
    shift = (beta_p - mean * gamma_p * inv).reshape(1, Cout_p)

    # ---- pass 2: fused conv + BN apply + ReLU ---------------------------------
    out = pl.pallas_call(
        _conv_bn_relu_kernel,
        out_shape=jax.ShapeDtypeStruct((N, H, W, Cout_p), jnp.float32),
        grid_spec=pltpu.PrefetchScalarGridSpec(
            num_scalar_prefetch=0,
            grid=(N, n_cog),
            in_specs=[
                pl.BlockSpec((1, H + 2, W + 2, Cin_p), lambda n, co: (n, 0, 0, 0)),
                pl.BlockSpec((K_p, tile_co), lambda n, co: (0, co)),
                pl.BlockSpec((1, tile_co), lambda n, co: (0, co)),
                pl.BlockSpec((1, tile_co), lambda n, co: (0, co)),
            ],
            out_specs=pl.BlockSpec((1, H, W, tile_co), lambda n, co: (n, 0, 0, co)),
        ),
        compiler_params=pltpu.CompilerParams(
            dimension_semantics=("parallel", "parallel"),
            vmem_limit_bytes=vmem_budget),
        cost_estimate=pl.CostEstimate(
            flops=matmul_flops + 3 * N * H * W * Cout_p, transcendentals=0,
            bytes_accessed=4 * (x_pad.size + n_cog * w2d.size
                                + N * H * W * Cout_p + 4 * Cout_p)),
    )(x_pad, w2d, scale, shift)

    # ---- boundary glue back: drop channel padding, NHWC -> NCHW ---------------
    out_nhwc = out[:, :, :, :Cout]
    return jnp.transpose(out_nhwc, (0, 3, 1, 2))


# --------------------------------------------------------------------------- #
# Pure-JAX reference (same semantics, including the conv bias) for checking
# --------------------------------------------------------------------------- #
def _reference(x_nchw, w_oihw, bias, gamma, beta):
    conv = jax.lax.conv_general_dilated(
        x_nchw, w_oihw, window_strides=(1, 1), padding=((1, 1), (1, 1)),
        dimension_numbers=("NCHW", "OIHW", "NCHW"))
    conv = conv + bias[None, :, None, None]
    mean = jnp.mean(conv, axis=(0, 2, 3), keepdims=True)
    var = jnp.mean((conv - mean) ** 2, axis=(0, 2, 3), keepdims=True)
    y = (conv - mean) * jax.lax.rsqrt(var + EPS)
    y = y * gamma[None, :, None, None] + beta[None, :, None, None]
    return jnp.maximum(y, 0.0)


if __name__ == "__main__":
    N, Cin, Cout, H, W = 2, 4, 8, 16, 16

    key = jax.random.PRNGKey(0)
    kx, kw, kb, kg, kbt = jax.random.split(key, 5)

    x = jax.random.normal(kx, (N, Cin, H, W), jnp.float32)
    # parameter shapes match nn.Conv2d(Cin, Cout, 3) + nn.BatchNorm2d(Cout)
    w = jax.random.normal(kw, (Cout, Cin, 3, 3), jnp.float32) * 0.1
    b = jax.random.normal(kb, (Cout,), jnp.float32) * 0.1
    gamma = 1.0 + 0.1 * jax.random.normal(kg, (Cout,), jnp.float32)
    beta = 0.1 * jax.random.normal(kbt, (Cout,), jnp.float32)

    out = jax.block_until_ready(m_conv_forward(x, w, b, gamma, beta))

    ref = _reference(x, w, b, gamma, beta)
    assert out.shape == (N, Cout, H, W)
    assert jnp.allclose(out, ref, atol=1e-4, rtol=1e-4), \
        float(jnp.max(jnp.abs(out - ref)))

    print("KERNEL_OK")
</pallas_src>

<mosaic_0001>
module attributes {stable_mosaic.version = 11 : i64} {
  func.func @_conv_stats_kernel(%arg0: i32, %arg1: i32, %arg2: memref<1x18x18x8xf32, #tpu.memory_space<vmem>>, %arg3: memref<128x128xf32, #tpu.memory_space<vmem>>, %arg4: memref<1x2x128xf32, #tpu.memory_space<vmem>>) attributes {dimension_semantics = [#tpu.dimension_semantics<parallel>, #tpu.dimension_semantics<parallel>], iteration_bounds = array<i64: 2, 1>, scalar_prefetch = 0 : i64, scratch_operands = 0 : i64, tpu.core_type = #tpu.core_type<tc>, window_params = [{transform_indices = @transform_0, window_bounds = array<i64: 1, 18, 18, 8>}, {transform_indices = @transform_1, window_bounds = array<i64: 128, 128>}, {transform_indices = @transform_2, window_bounds = array<i64: 1, 2, 128>}]} {
    %c0 = arith.constant 0 : index
    %c0_0 = arith.constant 0 : index
    %c0_1 = arith.constant 0 : index
    %c0_2 = arith.constant 0 : index
    %0 = vector.load %arg2[%c0, %c0_0, %c0_1, %c0_2] : memref<1x18x18x8xf32, #tpu.memory_space<vmem>>, vector<1x18x18x8xf32>
    %1 = vector.shape_cast %0 : vector<1x18x18x8xf32> to vector<18x18x8xf32>
    %2 = vector.extract_strided_slice %1 {offsets = [0, 0, 0], sizes = [16, 16, 8], strides = [1, 1, 1]} : vector<18x18x8xf32> to vector<16x16x8xf32>
    %3 = vector.extract_strided_slice %1 {offsets = [0, 1, 0], sizes = [16, 16, 8], strides = [1, 1, 1]} : vector<18x18x8xf32> to vector<16x16x8xf32>
    %4 = vector.extract_strided_slice %1 {offsets = [0, 2, 0], sizes = [16, 16, 8], strides = [1, 1, 1]} : vector<18x18x8xf32> to vector<16x16x8xf32>
    %5 = vector.extract_strided_slice %1 {offsets = [1, 0, 0], sizes = [16, 16, 8], strides = [1, 1, 1]} : vector<18x18x8xf32> to vector<16x16x8xf32>
    %6 = vector.extract_strided_slice %1 {offsets = [1, 1, 0], sizes = [16, 16, 8], strides = [1, 1, 1]} : vector<18x18x8xf32> to vector<16x16x8xf32>
    %7 = vector.extract_strided_slice %1 {offsets = [1, 2, 0], sizes = [16, 16, 8], strides = [1, 1, 1]} : vector<18x18x8xf32> to vector<16x16x8xf32>
    %8 = vector.extract_strided_slice %1 {offsets = [2, 0, 0], sizes = [16, 16, 8], strides = [1, 1, 1]} : vector<18x18x8xf32> to vector<16x16x8xf32>
    %9 = vector.extract_strided_slice %1 {offsets = [2, 1, 0], sizes = [16, 16, 8], strides = [1, 1, 1]} : vector<18x18x8xf32> to vector<16x16x8xf32>
    %10 = vector.extract_strided_slice %1 {offsets = [2, 2, 0], sizes = [16, 16, 8], strides = [1, 1, 1]} : vector<18x18x8xf32> to vector<16x16x8xf32>
    %cst = arith.constant 0.000000e+00 : f32
    %11 = vector.broadcast %cst : f32 to vector<16x16x56xf32>
    %12 = tpu.concatenate %2, %3, %4, %5, %6, %7, %8, %9, %10, %11 in 2 : vector<16x16x8xf32>, vector<16x16x8xf32>, vector<16x16x8xf32>, vector<16x16x8xf32>, vector<16x16x8xf32>, vector<16x16x8xf32>, vector<16x16x8xf32>, vector<16x16x8xf32>, vector<16x16x8xf32>, vector<16x16x56xf32> -> vector<16x16x128xf32>
    %13 = vector.shape_cast %12 : vector<16x16x128xf32> to vector<256x128xf32>
    %c0_3 = arith.constant 0 : index
    %c0_4 = arith.constant 0 : index
    %14 = vector.load %arg3[%c0_3, %c0_4] : memref<128x128xf32, #tpu.memory_space<vmem>>, vector<128x128xf32>
    %cst_5 = arith.constant dense<0.000000e+00> : vector<256x128xf32>
    %15 = tpu.matmul %13, %14, %cst_5 {dimension_numbers = #tpu.dot_dimension_numbers<[1], [0], [0], [1], [0, 0, 1, 1], [], []>} : vector<256x128xf32>, vector<128x128xf32>, vector<256x128xf32> -> vector<256x128xf32>
    %cst_6 = arith.constant dense<0.000000e+00> : vector<128xf32>
    %16 = vector.multi_reduction <add>, %15, %cst_6 [0] : vector<256x128xf32> to vector<128xf32>
    %17 = vector.shape_cast %16 : vector<128xf32> to vector<1x128xf32>
    %18 = arith.mulf %15, %15 : vector<256x128xf32>
    %cst_7 = arith.constant dense<0.000000e+00> : vector<128xf32>
    %19 = vector.multi_reduction <add>, %18, %cst_7 [0] : vector<256x128xf32> to vector<128xf32>
    %20 = vector.shape_cast %19 : vector<128xf32> to vector<1x128xf32>
    %21 = tpu.concatenate %17, %20 in 0 : vector<1x128xf32>, vector<1x128xf32> -> vector<2x128xf32>
    %c0_8 = arith.constant 0 : index
    %c0_9 = arith.constant 0 : index
    %c0_10 = arith.constant 0 : index
    %22 = vector.load %arg4[%c0_8, %c0_9, %c0_10] : memref<1x2x128xf32, #tpu.memory_space<vmem>>, vector<1x2x128xf32>
    %23 = vector.shape_cast %22 : vector<1x2x128xf32> to vector<2x128xf32>
    %24 = vector.shape_cast %21 : vector<2x128xf32> to vector<1x2x128xf32>
    tpu.vector_store %arg4[%c0_8, %c0_9, %c0_10], %24 {strides = array<i32>} : memref<1x2x128xf32, #tpu.memory_space<vmem>>, vector<1x2x128xf32>,
    return
  }
  func.func @transform_0(%arg0: i32, %arg1: i32) -> (i32, i32, i32, i32) {
    %c0_i32 = arith.constant 0 : i32
    %c0_i32_0 = arith.constant 0 : i32
    %c0_i32_1 = arith.constant 0 : i32
    %c0_i32_2 = arith.constant 0 : i32
    return %arg0, %c0_i32, %c0_i32_0, %c0_i32_1 : i32, i32, i32, i32
  }
  func.func @transform_1(%arg0: i32, %arg1: i32) -> (i32, i32) {
    %c0_i32 = arith.constant 0 : i32
    %c0_i32_0 = arith.constant 0 : i32
    return %c0_i32, %arg1 : i32, i32
  }
  func.func @transform_2(%arg0: i32, %arg1: i32) -> (i32, i32, i32) {
    %c0_i32 = arith.constant 0 : i32
    %c0_i32_0 = arith.constant 0 : i32
    return %arg0, %c0_i32, %arg1 : i32, i32, i32
  }
}

module attributes {stable_mosaic.version = 11 : i64} {
  func.func @_conv_bn_relu_kernel(%arg0: i32, %arg1: i32, %arg2: memref<1x18x18x8xf32, #tpu.memory_space<vmem>>, %arg3: memref<128x128xf32, #tpu.memory_space<vmem>>, %arg4: memref<1x128xf32, #tpu.memory_space<vmem>>, %arg5: memref<1x128xf32, #tpu.memory_space<vmem>>, %arg6: memref<1x16x16x128xf32, #tpu.memory_space<vmem>>) attributes {dimension_semantics = [#tpu.dimension_semantics<parallel>, #tpu.dimension_semantics<parallel>], iteration_bounds = array<i64: 2, 1>, scalar_prefetch = 0 : i64, scratch_operands = 0 : i64, tpu.core_type = #tpu.core_type<tc>, window_params = [{transform_indices = @transform_0, window_bounds = array<i64: 1, 18, 18, 8>}, {transform_indices = @transform_1, window_bounds = array<i64: 128, 128>}, {transform_indices = @transform_2, window_bounds = array<i64: 1, 128>}, {transform_indices = @transform_3, window_bounds = array<i64: 1, 128>}, {transform_indices = @transform_4, window_bounds = array<i64: 1, 16, 16, 128>}]} {
    %c0 = arith.constant 0 : index
    %c0_0 = arith.constant 0 : index
    %c0_1 = arith.constant 0 : index
    %c0_2 = arith.constant 0 : index
    %0 = vector.load %arg2[%c0, %c0_0, %c0_1, %c0_2] : memref<1x18x18x8xf32, #tpu.memory_space<vmem>>, vector<1x18x18x8xf32>
    %1 = vector.shape_cast %0 : vector<1x18x18x8xf32> to vector<18x18x8xf32>
    %2 = vector.extract_strided_slice %1 {offsets = [0, 0, 0], sizes = [16, 16, 8], strides = [1, 1, 1]} : vector<18x18x8xf32> to vector<16x16x8xf32>
    %3 = vector.extract_strided_slice %1 {offsets = [0, 1, 0], sizes = [16, 16, 8], strides = [1, 1, 1]} : vector<18x18x8xf32> to vector<16x16x8xf32>
    %4 = vector.extract_strided_slice %1 {offsets = [0, 2, 0], sizes = [16, 16, 8], strides = [1, 1, 1]} : vector<18x18x8xf32> to vector<16x16x8xf32>
    %5 = vector.extract_strided_slice %1 {offsets = [1, 0, 0], sizes = [16, 16, 8], strides = [1, 1, 1]} : vector<18x18x8xf32> to vector<16x16x8xf32>
    %6 = vector.extract_strided_slice %1 {offsets = [1, 1, 0], sizes = [16, 16, 8], strides = [1, 1, 1]} : vector<18x18x8xf32> to vector<16x16x8xf32>
    %7 = vector.extract_strided_slice %1 {offsets = [1, 2, 0], sizes = [16, 16, 8], strides = [1, 1, 1]} : vector<18x18x8xf32> to vector<16x16x8xf32>
    %8 = vector.extract_strided_slice %1 {offsets = [2, 0, 0], sizes = [16, 16, 8], strides = [1, 1, 1]} : vector<18x18x8xf32> to vector<16x16x8xf32>
    %9 = vector.extract_strided_slice %1 {offsets = [2, 1, 0], sizes = [16, 16, 8], strides = [1, 1, 1]} : vector<18x18x8xf32> to vector<16x16x8xf32>
    %10 = vector.extract_strided_slice %1 {offsets = [2, 2, 0], sizes = [16, 16, 8], strides = [1, 1, 1]} : vector<18x18x8xf32> to vector<16x16x8xf32>
    %cst = arith.constant 0.000000e+00 : f32
    %11 = vector.broadcast %cst : f32 to vector<16x16x56xf32>
    %12 = tpu.concatenate %2, %3, %4, %5, %6, %7, %8, %9, %10, %11 in 2 : vector<16x16x8xf32>, vector<16x16x8xf32>, vector<16x16x8xf32>, vector<16x16x8xf32>, vector<16x16x8xf32>, vector<16x16x8xf32>, vector<16x16x8xf32>, vector<16x16x8xf32>, vector<16x16x8xf32>, vector<16x16x56xf32> -> vector<16x16x128xf32>
    %13 = vector.shape_cast %12 : vector<16x16x128xf32> to vector<256x128xf32>
    %c0_3 = arith.constant 0 : index
    %c0_4 = arith.constant 0 : index
    %14 = vector.load %arg3[%c0_3, %c0_4] : memref<128x128xf32, #tpu.memory_space<vmem>>, vector<128x128xf32>
    %cst_5 = arith.constant dense<0.000000e+00> : vector<256x128xf32>
    %15 = tpu.matmul %13, %14, %cst_5 {dimension_numbers = #tpu.dot_dimension_numbers<[1], [0], [0], [1], [0, 0, 1, 1], [], []>} : vector<256x128xf32>, vector<128x128xf32>, vector<256x128xf32> -> vector<256x128xf32>
    %c0_6 = arith.constant 0 : index
    %c0_7 = arith.constant 0 : index
    %16 = vector.load %arg4[%c0_6, %c0_7] : memref<1x128xf32, #tpu.memory_space<vmem>>, vector<1x128xf32>
    %17 = vector.broadcast %16 : vector<1x128xf32> to vector<256x128xf32>
    %18 = arith.mulf %15, %17 : vector<256x128xf32>
    %c0_8 = arith.constant 0 : index
    %c0_9 = arith.constant 0 : index
    %19 = vector.load %arg5[%c0_8, %c0_9] : memref<1x128xf32, #tpu.memory_space<vmem>>, vector<1x128xf32>
    %20 = vector.broadcast %19 : vector<1x128xf32> to vector<256x128xf32>
    %21 = arith.addf %18, %20 : vector<256x128xf32>
    %cst_10 = arith.constant 0.000000e+00 : f32
    %22 = vector.broadcast %cst_10 : f32 to vector<256x128xf32>
    %23 = arith.maximumf %21, %22 : vector<256x128xf32>
    %24 = vector.shape_cast %23 : vector<256x128xf32> to vector<16x16x128xf32>
    %c0_11 = arith.constant 0 : index
    %c0_12 = arith.constant 0 : index
    %c0_13 = arith.constant 0 : index
    %c0_14 = arith.constant 0 : index
    %25 = vector.load %arg6[%c0_11, %c0_12, %c0_13, %c0_14] : memref<1x16x16x128xf32, #tpu.memory_space<vmem>>, vector<1x16x16x128xf32>
    %26 = vector.shape_cast %25 : vector<1x16x16x128xf32> to vector<16x16x128xf32>
    %27 = vector.shape_cast %24 : vector<16x16x128xf32> to vector<1x16x16x128xf32>
    tpu.vector_store %arg6[%c0_11, %c0_12, %c0_13, %c0_14], %27 {strides = array<i32>} : memref<1x16x16x128xf32, #tpu.memory_space<vmem>>, vector<1x16x16x128xf32>,
    return
  }
  func.func @transform_0(%arg0: i32, %arg1: i32) -> (i32, i32, i32, i32) {
    %c0_i32 = arith.constant 0 : i32
    %c0_i32_0 = arith.constant 0 : i32
    %c0_i32_1 = arith.constant 0 : i32
    %c0_i32_2 = arith.constant 0 : i32
    return %arg0, %c0_i32, %c0_i32_0, %c0_i32_1 : i32, i32, i32, i32
  }
  func.func @transform_1(%arg0: i32, %arg1: i32) -> (i32, i32) {
    %c0_i32 = arith.constant 0 : i32
    %c0_i32_0 = arith.constant 0 : i32
    return %c0_i32, %arg1 : i32, i32
  }
  func.func @transform_2(%arg0: i32, %arg1: i32) -> (i32, i32) {
    %c0_i32 = arith.constant 0 : i32
    %c0_i32_0 = arith.constant 0 : i32
    return %c0_i32, %arg1 : i32, i32
  }
  func.func @transform_3(%arg0: i32, %arg1: i32) -> (i32, i32) {
    %c0_i32 = arith.constant 0 : i32
    %c0_i32_0 = arith.constant 0 : i32
    return %c0_i32, %arg1 : i32, i32
  }
  func.func @transform_4(%arg0: i32, %arg1: i32) -> (i32, i32, i32, i32) {
    %c0_i32 = arith.constant 0 : i32
    %c0_i32_0 = arith.constant 0 : i32
    %c0_i32_1 = arith.constant 0 : i32
    return %arg0, %c0_i32, %c0_i32_0, %arg1 : i32, i32, i32, i32
  }
}

</mosaic_0001>

<bundles_post_ra>
// kernel: m_conv_forward.2
= control target key start
LH: loop header
LB: loop body
LE: loop exit
PB: predicated region body
PF: predicated region fallthrough
CT: control target
= control target key end

     0   :  { %s2290_s9 = smov 0   ;;  %s2292_s10 = smov 0   ;;  %s3851_s0 = inlined_call_operand.vmem [shape: f32[2,18,18,8], index: 0, kind: input, shape index: {}]   ;;  %s3852_s1 = inlined_call_operand.vmem [shape: f32[128,128], index: 1, kind: input, shape index: {}]   ;;  %s3853_s2 = inlined_call_operand.vmem [shape: f32[2,2,128], index: 2, kind: output, shape index: {}]  }
   0x1   :  { %s2294_s11 = smov 0  }
   0x2 LB: > { %s24_s12 = sadd.s32 1, %s2261_s10  ;;  %p1976_p0 = scmp.ge.s32.totalorder %s2265_s11, 1  ;;  %s2265_s11 = sphi %s2294_s11, %s12_s11   ;;  %s2261_s10 = sphi %s2292_s10, %s4063_s10   ;;  %s2257_s9 = sphi %s2290_s9, %s4062_s9  }
   0x3   : > { %p26_p1 = scmp.ge.s32.totalorder %s24_s12, 2  ;;  %p135_p2 = scmp.lt.s32.totalorder %s2265_s11, 3 }
   0x5   : > { %s4065_s12 = smov (%p26_p1, %s24_s12), 0  ;;  %p136_p3 = pnand %p1976_p0, %p135_p2 }
   0x7   : > { %139 = sbr.rel (%p136_p3) target bundleno = 883 (0x373), region = 28 }
   0xe   : > { %p163_p4 = scmp.lt.s32.totalorder %s2257_s9, 1  ;;  %vm281_vm0 = vcmask 1046528   ;;  %s2267_s17 = smov 8   ;;  %vm458_vm1 = vcmask 1045504   ;;  %vm1237_vm2 = vcmask 64512   ;;  %vm1270_vm3 = vcmask 130048  }
   0xf   : > { %s2268_s18 = smov 16   ;;  %s2269_s19 = smov 24   ;;  %vm1303_vm4 = vcmask 195584   ;;  %vm1336_vm5 = vcmask 261120   ;;  %vm1369_vm6 = vcmask 326656   ;;  %vm1402_vm7 = vcmask 392192  }
  0x10   : > { %s4067_s9 = smov (!%p163_p4, %s2257_s9), 1  ;;  %s2270_s22 = smov 32   ;;  %vm1435_vm8 = vcmask 457728   ;;  %vm1468_vm9 = vcmask 523264   ;;  %vm1501_vm10 = vcmask 588800   ;;  %vm1881_vm11 = vcmask 1040384  }
  0x11   : > { %s2189_s13 = smul.u32 432, %s4067_s9  ;;  %s2271_s27 = smov 40  }
  0x12   : > { %s2272_s4 = smov 48   ;;  %s2273_s5 = smov 56  }
  0x13   : > { %s2314_s16 = scalar_lea.vmem %s3851_s0, %s2189_s13  ;;  %s2274_s6 = smov 64  }
  0x14   : > { %v2317_v0 = vld [vmem:[%s2314_s16 + $0x18] sm:$0xff]  ;;  %v2320_v1 = vld [vmem:[%s2314_s16 + $0x20] sm:$0xff]  ;;  %v2328_v5 = vld [vmem:[%s2314_s16 + $0x8] sm:$0xff] }
  0x15   : > { %v2323_v2 = vld [vmem:[%s2314_s16] sm:$0xff]  ;;  %v287_v3 = vrot.slane %v2317_v0, 1  ;;  %v288_v4 = vrot.slane %v2320_v1, 1  ;;  %v2332_v7 = vld [vmem:[%s2314_s16 + $0x28] sm:$0x3]  ;;  %v283_v8 = vrot.slane %v2328_v5, 1 }
  0x16   : > { %v282_v6 = vrot.slane %v2323_v2, 1  ;;  %v290_v9 = vrot.slane %v2332_v7, 1  ;;  %v2337_v10 = vld [vmem:[%s2314_s16 + $0x10] sm:$0x3]  ;;  %v2340_v11 = vld [vmem:[%s2314_s16 + $0x38] sm:$0xff]  ;;  %v2370_v24 = vld [vmem:[%s2314_s16 + $0x48] sm:$0xff] }
  0x17   : > { %v2343_v12 = vsel %vm281_vm0, %v287_v3, %v288_v4  ;;  %v285_v13 = vrot.slane %v2337_v10, 1  ;;  %v2347_v14 = vld [vmem:[%s2314_s16 + $0x40] sm:$0x3]  ;;  %v2350_v15 = vld [vmem:[%s2314_s16 + $0x30] sm:$0xff]  ;;  %v293_v18 = vrot.slane %v2340_v11, 1  ;;  %v297_v29 = vrot.slane %v2370_v24, 1 }
  0x18   : > { %366 = vrot.lane.b32.xlu1 %v2343_v12, %s2267_s17  ;;  %v284_v16 = vsel %vm281_vm0, %v282_v6, %v283_v8  ;;  %v2357_v17 = vsel %vm281_vm0, %v288_v4, %v290_v9  ;;  %v295_v19 = vrot.slane %v2347_v14, 1  ;;  %v292_v21 = vrot.slane %v2350_v15, 1  ;;  %v2364_v22 = vld [vmem:[%s2314_s16 + $0x50] sm:$0xff]  ;;  %v2367_v23 = vld [vmem:[%s2314_s16 + $0x58] sm:$0x3]  ;;  %v2385_v30 = vld [vmem:[%s2314_s16 + $0x68] sm:$0xff] }
  0x19   : > { %362 = vrot.lane.b32.xlu0 %v284_v16, %s2267_s17  ;;  %v286_v20 = vsel %vm281_vm0, %v283_v8, %v285_v13  ;;  %v298_v26 = vrot.slane %v2364_v22, 1  ;;  %v300_v27 = vrot.slane %v2367_v23, 1  ;;  %v2388_v31 = vld [vmem:[%s2314_s16 + $0x70] sm:$0x3]  ;;  %v2391_v32 = vld [vmem:[%s2314_s16 + $0x60] sm:$0xff]  ;;  %v303_v34 = vrot.slane %v2385_v30, 1 }
  0x1a   : > { %v2376_v25 = vsel %vm281_vm0, %v293_v18, %v295_v19  ;;  %v2381_v28 = vsel %vm281_vm0, %v292_v21, %v293_v18  ;;  %v305_v35 = vrot.slane %v2388_v31, 1  ;;  %v302_v37 = vrot.slane %v2391_v32, 1  ;;  %v2407_v38 = vld [vmem:[%s2314_s16 + $0x80] sm:$0xff]  ;;  %v2410_v39 = vld [vmem:[%s2314_s16 + $0x88] sm:$0x3]  ;;  %v2413_v40 = vld [vmem:[%s2314_s16 + $0x78] sm:$0xff] }
  0x1b   : > { %v2398_v33 = vsel %vm281_vm0, %v298_v26, %v300_v27  ;;  %v2403_v36 = vsel %vm281_vm0, %v297_v29, %v298_v26  ;;  %v308_v42 = vrot.slane %v2407_v38, 1  ;;  %v310_v43 = vrot.slane %v2410_v39, 1  ;;  %v2429_v46 = vld [vmem:[%s2314_s16 + $0x98] sm:$0xff]  ;;  %v2432_v47 = vld [vmem:[%s2314_s16 + $0xa0] sm:$0x3]  ;;  %v2435_v48 = vld [vmem:[%s2314_s16 + $0x90] sm:$0xff] }
  0x1c   : > { %368 = vrot.lane.b32.xlu1 %v2357_v17, %s2267_s17  ;;  %3946 = vst [vmem:[#allocation2_spill] sm:$0xff] %v2398_v33  ;;  %v2420_v41 = vsel %vm281_vm0, %v303_v34, %v305_v35  ;;  %v2425_v44 = vsel %vm281_vm0, %v302_v37, %v303_v34  ;;  %v307_v45 = vrot.slane %v2413_v40, 1  ;;  %v313_v50 = vrot.slane %v2429_v46, 1  ;;  %v2451_v54 = vld [vmem:[%s2314_s16 + $0xb0] sm:$0xff]  ;;  %v2454_v55 = vld [vmem:[%s2314_s16 + $0xb8] sm:$0x3] }
  0x1d   : > { %364 = vrot.lane.b32.xlu0 %v286_v20, %s2267_s17  ;;  %3947 = vst [vmem:[#allocation3_spill] sm:$0xff] %v2420_v41  ;;  %3948 = vst [vmem:[#allocation4_spill] sm:$0xff] %v2425_v44  ;;  %v2442_v49 = vsel %vm281_vm0, %v308_v42, %v310_v43  ;;  %v315_v51 = vrot.slane %v2432_v47, 1  ;;  %v312_v53 = vrot.slane %v2435_v48, 1  ;;  %v2457_v56 = vld [vmem:[%s2314_s16 + $0xa8] sm:$0xff]  ;;  %v318_v58 = vrot.slane %v2451_v54, 1 }
  0x1e   : > { %3949 = vst [vmem:[#allocation5_spill] sm:$0xff] %v2442_v49  ;;  %v2447_v52 = vsel %vm281_vm0, %v307_v45, %v308_v42  ;;  %v320_v59 = vrot.slane %v2454_v55, 1  ;;  %v317_v61 = vrot.slane %v2457_v56, 1  ;;  %v2473_v62 = vld [vmem:[%s2314_s16 + $0xc8] sm:$0xff]  ;;  %v2476_v63 = vld [vmem:[%s2314_s16 + $0xd0] sm:$0x3] }
  0x1f   : > { %3950 = vst [vmem:[#allocation6_spill] sm:$0xff] %v2447_v52  ;;  %v2464_v57 = vsel %vm281_vm0, %v313_v50, %v315_v51  ;;  %v2469_v60 = vsel %vm281_vm0, %v312_v53, %v313_v50  ;;  %v2479_v3 = vld [vmem:[%s2314_s16 + $0xc0] sm:$0xff]  ;;  %v323_v6 = vrot.slane %v2473_v62, 1  ;;  %v325_v8 = vrot.slane %v2476_v63, 1  ;;  %v2498_v18 = vld [vmem:[%s2314_s16 + $0xe8] sm:$0x3] }
  0x20   : > { %372 = vrot.lane.b32.xlu1 %v2376_v25, %s2267_s17  ;;  %3951 = vst [vmem:[#allocation7_spill] sm:$0xff] %v2464_v57  ;;  %3952 = vst [vmem:[#allocation8_spill] sm:$0xff] %v2469_v60  ;;  %v2486_v4 = vsel %vm281_vm0, %v318_v58, %v320_v59  ;;  %v2491_v9 = vsel %vm281_vm0, %v317_v61, %v318_v58  ;;  %v322_v13 = vrot.slane %v2479_v3, 1  ;;  %v2495_v16 = vld [vmem:[%s2314_s16 + $0xe0] sm:$0xff]  ;;  %v2501_v19 = vld [vmem:[%s2314_s16 + $0xd8] sm:$0xff]  ;;  %v330_v26 = vrot.slane %v2498_v18, 1 }
  0x21   : > { %370 = vrot.lane.b32.xlu0 %v2381_v28, %s2267_s17  ;;  %3953 = vst [vmem:[#allocation9_spill] sm:$0xff] %v2486_v4  ;;  %3954 = vst [vmem:[#allocation10_spill] sm:$0xff] %v2491_v9  ;;  %v2508_v20 = vsel %vm281_vm0, %v323_v6, %v325_v8  ;;  %v328_v21 = vrot.slane %v2495_v16, 1  ;;  %v327_v29 = vrot.slane %v2501_v19, 1  ;;  %v2517_v34 = vld [vmem:[%s2314_s16 + $0xf8] sm:$0xff]  ;;  %v2523_v37 = vld [vmem:[%s2314_s16 + $0xf0] sm:$0xff] }
  0x22   : > { %3955 = vst [vmem:[#allocation11_spill] sm:$0xff] %v2508_v20  ;;  %v2513_v27 = vsel %vm281_vm0, %v322_v13, %v323_v6  ;;  %v2520_v35 = vld [vmem:[%s2314_s16 + $0x100] sm:$0x3]  ;;  %v333_v43 = vrot.slane %v2517_v34, 1  ;;  %v332_v51 = vrot.slane %v2523_v37, 1  ;;  %v2539_v53 = vld [vmem:[%s2314_s16 + $0x110] sm:$0xff] }
  0x23   : > { %3956 = vst [vmem:[#allocation12_spill] sm:$0xff] %v2513_v27  ;;  %v2530_v42 = vsel %vm281_vm0, %v328_v21, %v330_v26  ;;  %v335_v45 = vrot.slane %v2520_v35, 1  ;;  %v2535_v50 = vsel %vm281_vm0, %v327_v29, %v328_v21  ;;  %v2542_v58 = vld [vmem:[%s2314_s16 + $0x118] sm:$0x3]  ;;  %v2545_v59 = vld [vmem:[%s2314_s16 + $0x108] sm:$0xff]  ;;  %v338_v6 = vrot.slane %v2539_v53, 1 }
  0x24   : > { %376 = vrot.lane.b32.xlu1 %v2398_v33, %s2267_s17  ;;  %3957 = vst [vmem:[#allocation13_spill] sm:$0xff] %v2530_v42  ;;  %3958 = vst [vmem:[#allocation14_spill] sm:$0xff] %v2535_v50  ;;  %v340_v8 = vrot.slane %v2542_v58, 1  ;;  %v2557_v13 = vsel %vm281_vm0, %v332_v51, %v333_v43  ;;  %v337_v21 = vrot.slane %v2545_v59, 1  ;;  %v2561_v26 = vld [vmem:[%s2314_s16 + $0x128] sm:$0xff] }
  0x25   : > { %374 = vrot.lane.b32.xlu0 %v2403_v36, %s2267_s17  ;;  %v2552_v61 = vsel %vm281_vm0, %v333_v43, %v335_v45  ;;  %3960 = vst [vmem:[#allocation16_spill] sm:$0xff] %v2557_v13  ;;  %v2564_v29 = vld [vmem:[%s2314_s16 + $0x130] sm:$0x3]  ;;  %v343_v43 = vrot.slane %v2561_v26, 1 }
  0x26   : > { %3959 = vst [vmem:[#allocation15_spill] sm:$0xff] %v2552_v61  ;;  %v2574_v45 = vsel %vm281_vm0, %v338_v6, %v340_v8  ;;  %v345_v51 = vrot.slane %v2564_v29, 1 }
  0x27   : > { %3961 = vst [vmem:[#allocation17_spill] sm:$0xff] %v2574_v45 }
  0x28   : > { %380 = vrot.lane.b32.xlu1 %v2420_v41, %s2267_s17  ;;  %v2596_v8 = vsel %vm281_vm0, %v343_v43, %v345_v51  ;;  %v2630_v41 = vld [vmem:[%s2314_s16 + $0x178] sm:$0x3] }
  0x29   : > { %378 = vrot.lane.b32.xlu0 %v2425_v44, %s2267_s17  ;;  %3963 = vst [vmem:[#allocation19_spill] sm:$0xff] %v2596_v8 }
  0x2c   : > { %384 = vrot.lane.b32.xlu1 %v2442_v49, %s2267_s17 }
  0x2d   : > { %382 = vrot.lane.b32.xlu0 %v2447_v52, %s2267_s17  ;;  %v2627_v52 = vld [vmem:[%s2314_s16 + $0x170] sm:$0xff] }
  0x30   : > { %388 = vrot.lane.b32.xlu1 %v2464_v57, %s2267_s17  ;;  %v2605_v57 = vld [vmem:[%s2314_s16 + $0x158] sm:$0xff] }
  0x31   : > { %386 = vrot.lane.b32.xlu0 %v2469_v60, %s2267_s17 }
  0x34   : > { %392 = vrot.lane.b32.xlu1 %v2486_v4, %s2267_s17 }
  0x35   : > { %390 = vrot.lane.b32.xlu0 %v2491_v9, %s2267_s17 }
  0x38   : > { %396 = vrot.lane.b32.xlu1 %v2508_v20, %s2267_s17 }
  0x39   : > { %394 = vrot.lane.b32.xlu0 %v2513_v27, %s2267_s17  ;;  %v2583_v27 = vld [vmem:[%s2314_s16 + $0x140] sm:$0xff] }
  0x3c   : > { %400 = vrot.lane.b32.xlu1 %v2530_v42, %s2267_s17  ;;  %v2567_v42 = vld [vmem:[%s2314_s16 + $0x120] sm:$0xff] }
  0x3d   : > { %398 = vrot.lane.b32.xlu0 %v2535_v50, %s2267_s17  ;;  %v2579_v50 = vsel %vm281_vm0, %v337_v21, %v338_v6  ;;  %v342_v20 = vrot.slane %v2567_v42, 1  ;;  %v348_v6 = vrot.slane %v2583_v27, 1 }
  0x3e   : > { %3962 = vst [vmem:[#allocation18_spill] sm:$0xff] %v2579_v50 }
  0x3f   : > { %v2601_v4 = vsel %vm281_vm0, %v342_v20, %v343_v43  ;;  %v353_v20 = vrot.slane %v2605_v57, 1 }
  0x40   : > { %404 = vrot.lane.b32.xlu1 %v2552_v61, %s2267_s17  ;;  %v2586_v61 = vld [vmem:[%s2314_s16 + $0x148] sm:$0x3]  ;;  %3964 = vst [vmem:[#allocation20_spill] sm:$0xff] %v2601_v4 }
  0x41   : > { %402 = vrot.lane.b32.xlu0 %v2557_v13, %s2267_s17  ;;  %v2589_v13 = vld [vmem:[%s2314_s16 + $0x138] sm:$0xff]  ;;  %v350_v21 = vrot.slane %v2586_v61, 1 }
  0x42   : > { %v347_v9 = vrot.slane %v2589_v13, 1 }
  0x43   : > { %v2618_v51 = vsel %vm281_vm0, %v348_v6, %v350_v21 }
  0x44   : > { %408 = vrot.lane.b32.xlu1 %v2574_v45, %s2267_s17  ;;  %v2608_v45 = vld [vmem:[%s2314_s16 + $0x160] sm:$0x3]  ;;  %3965 = vst [vmem:[#allocation21_spill] sm:$0xff] %v2618_v51  ;;  %v2623_v60 = vsel %vm281_vm0, %v347_v9, %v348_v6  ;;  %v358_v9 = vrot.slane %v2627_v52, 1  ;;  %v360_v6 = vrot.slane %v2630_v41, 1 }
  0x45   : > { %406 = vrot.lane.b32.xlu0 %v2579_v50, %s2267_s17  ;;  %v2611_v50 = vld [vmem:[%s2314_s16 + $0x150] sm:$0xff]  ;;  %v355_v43 = vrot.slane %v2608_v45, 1  ;;  %3966 = vst [vmem:[#allocation22_spill] sm:$0xff] %v2623_v60 }
  0x46   : > { %v352_v49 = vrot.slane %v2611_v50, 1 }
  0x47   : > { %v2640_v21 = vsel %vm281_vm0, %v353_v20, %v355_v43  ;;  %v460_v43 = vrot.slane %v2328_v5, 2  ;;  %v467_v5 = vrot.slane %v2332_v7, 2  ;;  %v469_v7 = vrot.slane %v2350_v15, 2 }
  0x48   : > { %412 = vrot.lane.b32.xlu1 %v2596_v8, %s2267_s17  ;;  %v2633_v8 = vld [vmem:[%s2314_s16 + $0x168] sm:$0xff]  ;;  %3967 = vst [vmem:[#allocation23_spill] sm:$0xff] %v2640_v21 }
  0x49   : > { %410 = vrot.lane.b32.xlu0 %v2601_v4, %s2267_s17  ;;  %v2645_v4 = vsel %vm281_vm0, %v352_v49, %v353_v20  ;;  %v357_v44 = vrot.slane %v2633_v8, 1  ;;  %v459_v49 = vrot.slane %v2323_v2, 2 }
  0x4a   : > { %3968 = vst [vmem:[#allocation24_spill] sm:$0xff] %v2645_v4 }
  0x4b   : > { %v2658_v33 = vsel %vm281_vm0, %v357_v44, %v358_v9  ;;  %v464_v44 = vrot.slane %v2317_v0, 2 }
  0x4c   : > { %416 = vrot.lane.b32.xlu1 %v2618_v51, %s2267_s17  ;;  %v2653_v51 = vsel %vm281_vm0, %v358_v9, %v360_v6  ;;  %3970 = vst [vmem:[#allocation26_spill] sm:$0xff] %v2658_v33  ;;  %v465_v6 = vrot.slane %v2320_v1, 2  ;;  %v470_v9 = vrot.slane %v2340_v11, 2 }
  0x4d   : > { %414 = vrot.lane.b32.xlu0 %v2623_v60, %s2267_s17  ;;  %3969 = vst [vmem:[#allocation25_spill] sm:$0xff] %v2653_v51  ;;  %v462_v60 = vrot.slane %v2337_v10, 2  ;;  %v461_v10 = vsel %vm458_vm1, %v459_v49, %v460_v43  ;;  %v475_v49 = vrot.slane %v2364_v22, 2 }
  0x4e   : > { %v2673_v2 = vsel %vm458_vm1, %v465_v6, %v467_v5 }
  0x4f   : > { %v463_v20 = vsel %vm458_vm1, %v460_v43, %v462_v60  ;;  %v472_v60 = vrot.slane %v2347_v14, 2  ;;  %v2691_v14 = vsel %vm458_vm1, %v469_v7, %v470_v9  ;;  %v485_v7 = vrot.slane %v2407_v38, 2 }
  0x50   : > { %420 = vrot.lane.b32.xlu1 %v2640_v21, %s2267_s17  ;;  %v497_v21 = vrot.slane %v2454_v55, 2 }
  0x51   : > { %418 = vrot.lane.b32.xlu0 %v2645_v4, %s2267_s17  ;;  %v2686_v43 = vsel %vm458_vm1, %v470_v9, %v472_v60  ;;  %v479_v9 = vrot.slane %v2391_v32, 2  ;;  %v502_v4 = vrot.slane %v2476_v63, 2 }
  0x54   : > { %424 = vrot.lane.b32.xlu1 %v2653_v51, %s2267_s17  ;;  %v2678_v51 = vsel %vm458_vm1, %v464_v44, %v465_v6  ;;  %v474_v6 = vrot.slane %v2370_v24, 2  ;;  %v482_v44 = vrot.slane %v2388_v31, 2 }
  0x55   : > { %422 = vrot.lane.b32.xlu0 %v2658_v33, %s2267_s17  ;;  %v492_v33 = vrot.slane %v2432_v47, 2 }
  0x58   : > { %541 = vrot.lane.b32.xlu1 %v463_v20, %s2268_s18  ;;  %v477_v20 = vrot.slane %v2367_v23, 2  ;;  %v2704_v23 = vsel %vm458_vm1, %v474_v6, %v475_v49 }
  0x59   : > { %539 = vrot.lane.b32.xlu0 %v461_v10, %s2268_s18  ;;  %v480_v10 = vrot.slane %v2385_v30, 2 }
  0x5a   : > { %v2699_v5 = vsel %vm458_vm1, %v475_v49, %v477_v20  ;;  %v487_v20 = vrot.slane %v2410_v39, 2  ;;  %v484_v49 = vrot.slane %v2413_v40, 2 }
  0x5b   : > { %v2712_v60 = vsel %vm458_vm1, %v480_v10, %v482_v44  ;;  %v2717_v31 = vsel %vm458_vm1, %v479_v9, %v480_v10  ;;  %v490_v44 = vrot.slane %v2429_v46, 2  ;;  %v489_v10 = vrot.slane %v2435_v48, 2 }
  0x5c   : > { %545 = vrot.lane.b32.xlu1 %v2673_v2, %s2268_s18  ;;  %v2725_v6 = vsel %vm458_vm1, %v485_v7, %v487_v20  ;;  %v2730_v39 = vsel %vm458_vm1, %v484_v49, %v485_v7  ;;  %v495_v20 = vrot.slane %v2451_v54, 2  ;;  %v494_v7 = vrot.slane %v2457_v56, 2 }
  0x5d   : > { %543 = vrot.lane.b32.xlu0 %v2678_v51, %s2268_s18  ;;  %3971 = vst [vmem:[#allocation27_spill] sm:$0xff] %v2725_v6  ;;  %v2738_v9 = vsel %vm458_vm1, %v490_v44, %v492_v33  ;;  %v2743_v47 = vsel %vm458_vm1, %v489_v10, %v490_v44  ;;  %v500_v33 = vrot.slane %v2473_v62, 2  ;;  %v499_v44 = vrot.slane %v2479_v3, 2 }
  0x5e   : > { %3972 = vst [vmem:[#allocation28_spill] sm:$0xff] %v2738_v9  ;;  %3973 = vst [vmem:[#allocation29_spill] sm:$0xff] %v2743_v47  ;;  %v2751_v49 = vsel %vm458_vm1, %v495_v20, %v497_v21  ;;  %v2756_v55 = vsel %vm458_vm1, %v494_v7, %v495_v20  ;;  %v505_v21 = vrot.slane %v2495_v16, 2  ;;  %v504_v20 = vrot.slane %v2501_v19, 2 }
  0x5f   : > { %3974 = vst [vmem:[#allocation30_spill] sm:$0xff] %v2751_v49  ;;  %3975 = vst [vmem:[#allocation31_spill] sm:$0xff] %v2756_v55  ;;  %v2764_v10 = vsel %vm458_vm1, %v500_v33, %v502_v4  ;;  %v2769_v63 = vsel %vm458_vm1, %v499_v44, %v500_v33  ;;  %v510_v4 = vrot.slane %v2517_v34, 2  ;;  %v509_v33 = vrot.slane %v2523_v37, 2 }
  0x60   : > { %549 = vrot.lane.b32.xlu1 %v2686_v43, %s2268_s18  ;;  %3976 = vst [vmem:[#allocation32_spill] sm:$0xff] %v2764_v10  ;;  %3977 = vst [vmem:[#allocation33_spill] sm:$0xff] %v2769_v63 }
  0x61   : > { %547 = vrot.lane.b32.xlu0 %v2691_v14, %s2268_s18 }
  0x64   : > { %553 = vrot.lane.b32.xlu1 %v2699_v5, %s2268_s18 }
  0x65   : > { %551 = vrot.lane.b32.xlu0 %v2704_v23, %s2268_s18 }
  0x68   : > { %557 = vrot.lane.b32.xlu1 %v2712_v60, %s2268_s18 }
  0x69   : > { %555 = vrot.lane.b32.xlu0 %v2717_v31, %s2268_s18 }
  0x6c   : > { %561 = vrot.lane.b32.xlu1 %v2725_v6, %s2268_s18 }
  0x6d   : > { %559 = vrot.lane.b32.xlu0 %v2730_v39, %s2268_s18 }
  0x70   : > { %565 = vrot.lane.b32.xlu1 %v2738_v9, %s2268_s18  ;;  %v507_v9 = vrot.slane %v2498_v18, 2  ;;  %v2782_v18 = vsel %vm458_vm1, %v504_v20, %v505_v21 }
  0x71   : > { %563 = vrot.lane.b32.xlu0 %v2743_v47, %s2268_s18  ;;  %3979 = vst [vmem:[#allocation35_spill] sm:$0xff] %v2782_v18  ;;  %v1546_v47 = vld [vmem:[%s3852_s1 + $0x60] sm:$0xff] }
  0x72   : > { %v2777_v7 = vsel %vm458_vm1, %v505_v21, %v507_v9  ;;  %v515_v9 = vrot.slane %v2539_v53, 2  ;;  %v514_v21 = vrot.slane %v2545_v59, 2 }
  0x73   : > { %3978 = vst [vmem:[#allocation34_spill] sm:$0xff] %v2777_v7 }
  0x74   : > { %569 = vrot.lane.b32.xlu1 %v2751_v49, %s2268_s18  ;;  %v512_v49 = vrot.slane %v2520_v35, 2  ;;  %v2795_v35 = vsel %vm458_vm1, %v509_v33, %v510_v4 }
  0x75   : > { %567 = vrot.lane.b32.xlu0 %v2756_v55, %s2268_s18  ;;  %3981 = vst [vmem:[#allocation37_spill] sm:$0xff] %v2795_v35  ;;  %v1545_v55 = vld [vmem:[%s3852_s1 + $0x58] sm:$0xff] }
  0x76   : > { %v2790_v44 = vsel %vm458_vm1, %v510_v4, %v512_v49  ;;  %v520_v49 = vrot.slane %v2561_v26, 2  ;;  %v519_v4 = vrot.slane %v2567_v42, 2 }
  0x77   : > { %3980 = vst [vmem:[#allocation36_spill] sm:$0xff] %v2790_v44 }
  0x78   : > { %573 = vrot.lane.b32.xlu1 %v2764_v10, %s2268_s18  ;;  %v517_v10 = vrot.slane %v2542_v58, 2  ;;  %v2808_v58 = vsel %vm458_vm1, %v514_v21, %v515_v9 }
  0x79   : > { %571 = vrot.lane.b32.xlu0 %v2769_v63, %s2268_s18  ;;  %3983 = vst [vmem:[#allocation39_spill] sm:$0xff] %v2808_v58  ;;  %v1542_v63 = vld [vmem:[%s3852_s1 + $0x40] sm:$0xff] }
  0x7a   : > { %v2803_v20 = vsel %vm458_vm1, %v515_v9, %v517_v10  ;;  %v525_v10 = vrot.slane %v2583_v27, 2  ;;  %v524_v9 = vrot.slane %v2589_v13, 2 }
  0x7b   : > { %3982 = vst [vmem:[#allocation38_spill] sm:$0xff] %v2803_v20 }
  0x7c   : > { %577 = vrot.lane.b32.xlu1 %v2777_v7, %s2268_s18  ;;  %v522_v7 = vrot.slane %v2564_v29, 2  ;;  %v2821_v29 = vsel %vm458_vm1, %v519_v4, %v520_v49 }
  0x7d   : > { %575 = vrot.lane.b32.xlu0 %v2782_v18, %s2268_s18  ;;  %3985 = vst [vmem:[#allocation41_spill] sm:$0xff] %v2821_v29  ;;  %v1538_v18 = vld [vmem:[%s3852_s1 + $0x20] sm:$0xff] }
  0x7e   : > { %v2816_v33 = vsel %vm458_vm1, %v520_v49, %v522_v7  ;;  %v530_v7 = vrot.slane %v2605_v57, 2  ;;  %v529_v49 = vrot.slane %v2611_v50, 2 }
  0x7f   : > { %3984 = vst [vmem:[#allocation40_spill] sm:$0xff] %v2816_v33 }
  0x80   : > { %581 = vrot.lane.b32.xlu1 %v2790_v44, %s2268_s18  ;;  %v527_v44 = vrot.slane %v2586_v61, 2  ;;  %v2836_v61 = vsel %vm458_vm1, %v524_v9, %v525_v10  ;;  %v534_v9 = vrot.slane %v2633_v8, 2 }
  0x81   : > { %579 = vrot.lane.b32.xlu0 %v2795_v35, %s2268_s18  ;;  %3988 = vst [vmem:[#allocation44_spill] sm:$0xff] %v2836_v61 }
  0x82   : > { %v2829_v21 = vsel %vm458_vm1, %v525_v10, %v527_v44  ;;  %v2853_v10 = vsel %vm458_vm1, %v529_v49, %v530_v7 }
  0x83   : > { %3986 = vst [vmem:[#allocation42_spill] sm:$0xff] %v2829_v21  ;;  %3992 = vst [vmem:[#allocation48_spill] sm:$0xff] %v2853_v10 }
  0x84   : > { %585 = vrot.lane.b32.xlu1 %v2803_v20, %s2268_s18  ;;  %v532_v20 = vrot.slane %v2608_v45, 2  ;;  %v535_v45 = vrot.slane %v2627_v52, 2 }
  0x85   : > { %583 = vrot.lane.b32.xlu0 %v2808_v58, %s2268_s18 }
  0x86   : > { %v2846_v44 = vsel %vm458_vm1, %v530_v7, %v532_v20 }
  0x87   : > { %3990 = vst [vmem:[#allocation46_spill] sm:$0xff] %v2846_v44 }
  0x88   : > { %589 = vrot.lane.b32.xlu1 %v2816_v33, %s2268_s18  ;;  %v537_v33 = vrot.slane %v2630_v41, 2  ;;  %v2868_v41 = vsel %vm458_vm1, %v534_v9, %v535_v45 }
  0x89   : > { %587 = vrot.lane.b32.xlu0 %v2821_v29, %s2268_s18  ;;  %3996 = vst [vmem:[#allocation52_spill] sm:$0xff] %v2868_v41 }
  0x8a   : > { %v2833_v58 = vpop.permute.xlu1 %366  ;;  %v2863_v20 = vsel %vm458_vm1, %v535_v45, %v537_v33 }
  0x8b   : > { %3987 = vst [vmem:[#allocation43_spill] sm:$0xff] %v2833_v58  ;;  %v2839_v4 = vpop.permute.xlu0 %362  ;;  %3994 = vst [vmem:[#allocation50_spill] sm:$0xff] %v2863_v20  ;;  %v1541_v58 = vld [vmem:[%s3852_s1 + $0x38] sm:$0xff] }
  0x8c   : > { %3989 = vst [vmem:[#allocation45_spill] sm:$0xff] %v2839_v4  ;;  %593 = vrot.lane.b32.xlu1 %v2829_v21, %s2268_s18  ;;  %v1544_v4 = vld [vmem:[%s3852_s1 + $0x50] sm:$0xff] }
  0x8d   : > { %591 = vrot.lane.b32.xlu0 %v2836_v61, %s2268_s18  ;;  %v1536_v61 = vld [vmem:[%s3852_s1 + $0x10] sm:$0xff] }
  0x8e   : > { %v2850_v29 = vpop.permute.xlu1 %368 }
  0x8f   : > { %3991 = vst [vmem:[#allocation47_spill] sm:$0xff] %v2850_v29  ;;  %v2856_v35 = vpop.permute.xlu0 %364  ;;  %v1540_v29 = vld [vmem:[%s3852_s1 + $0x30] sm:$0xff] }
  0x90   : > { %3993 = vst [vmem:[#allocation49_spill] sm:$0xff] %v2856_v35  ;;  %597 = vrot.lane.b32.xlu1 %v2846_v44, %s2268_s18  ;;  %v1543_v35 = vld [vmem:[%s3852_s1 + $0x48] sm:$0xff] }
  0x91   : > { %595 = vrot.lane.b32.xlu0 %v2853_v10, %s2268_s18 }
  0x92   : > { %v2865_v21 = vpop.permute.xlu1 %372 }
  0x93   : > { %3995 = vst [vmem:[#allocation51_spill] sm:$0xff] %v2865_v21  ;;  %v2870_v7 = vpop.permute.xlu0 %370 }
  0x94   : > { %3997 = vst [vmem:[#allocation53_spill] sm:$0xff] %v2870_v7  ;;  %601 = vrot.lane.b32.xlu1 %v2863_v20, %s2268_s18  ;;  %v1534_v20 = vld [vmem:[%s3852_s1] sm:$0xff]  ;;  %v1539_v7 = vld [vmem:[%s3852_s1 + $0x28] sm:$0xff] }
  0x95   : > { %599 = vrot.lane.b32.xlu0 %v2868_v41, %s2268_s18 }
  0x96   : > { %v2876_v49 = vpop.permute.xlu1 %376 }
  0x97   : > { %v2878_v44 = vpop.permute.xlu0 %374 }
  0x98   : > { %3998 = vst [vmem:[#allocation54_spill] sm:$0xff] %v2878_v44  ;;  %639 = vrot.lane.b32.xlu1 %v2320_v1, %s2269_s19  ;;  %v1537_v44 = vld [vmem:[%s3852_s1 + $0x18] sm:$0xff] }
  0x99   : > { %637 = vrot.lane.b32.xlu0 %v2317_v0, %s2269_s19  ;;  %v1535_v0 = vld [vmem:[%s3852_s1 + $0x8] sm:$0xff] }
  0x9a   : > { %v2884_v33 = vpop.permute.xlu1 %380  ;;  %v2141_v41 = vpack.c.bf16 %v1535_v0, %v1534_v20  ;;  %v2145_v0 = vpack.c.bf16 %v1537_v44, %v1536_v61  ;;  %v2149_v44 = vpack.c.bf16 %v1539_v7, %v1538_v18  ;;  %v2153_v7 = vpack.c.bf16 %v1541_v58, %v1540_v29 }
  0x9b   : > { %v2886_v45 = vpop.permute.xlu0 %378  ;;  %v2157_v29 = vpack.c.bf16 %v1543_v35, %v1542_v63  ;;  %v2161_v35 = vpack.c.bf16 %v1545_v55, %v1544_v4  ;;  %v1547_v55 = vld [vmem:[%s3852_s1 + $0x68] sm:$0xff] }
  0x9c   : > { %643 = vrot.lane.b32.xlu1 %v2340_v11, %s2269_s19  ;;  %2142 = vmatprep.subr.bf16.mxu0 %v2141_v41 }
  0x9d   : > { %641 = vrot.lane.b32.xlu0 %v2350_v15, %s2269_s19  ;;  %2144 = vmatpush3.bf16.msra.mxu0 %v2141_v41 }
  0x9e   : > { %v2892_v9 = vpop.permute.xlu1 %384  ;;  %2173 = vmatprep.subr.bf16.mxu1 %v2141_v41  ;;  %2146 = vmatprep.subr.bf16.mxu0 %v2145_v0 }
  0x9f   : > { %v2900_v1 = vpop.permute.xlu0 %382  ;;  %2181 = vmatpush3.bf16.msra.mxu1 %v2141_v41 }
  0xa0   : > { %647 = vrot.lane.b32.xlu1 %v2364_v22, %s2269_s19  ;;  %2174 = vmatprep.subr.bf16.mxu1 %v2145_v0 }
  0xa1   : > { %645 = vrot.lane.b32.xlu0 %v2370_v24, %s2269_s19  ;;  %2148 = vmatpush3.bf16.msra.mxu0 %v2145_v0 }
  0xa2   : > { %v2906_v10 = vpop.permute.xlu1 %388  ;;  %2150 = vmatprep.subr.bf16.mxu0 %v2149_v44 }
  0xa3   : > { %v2914_v20 = vpop.permute.xlu0 %386  ;;  %2182 = vmatpush3.bf16.msra.mxu1 %v2145_v0 }
  0xa4   : > { %651 = vrot.lane.b32.xlu1 %v2385_v30, %s2269_s19  ;;  %2175 = vmatprep.subr.bf16.mxu1 %v2149_v44 }
  0xa5   : > { %649 = vrot.lane.b32.xlu0 %v2391_v32, %s2269_s19  ;;  %2152 = vmatpush3.bf16.msra.mxu0 %v2149_v44 }
  0xa6   : > { %v2920_v21 = vpop.permute.xlu1 %392  ;;  %2154 = vmatprep.subr.bf16.mxu0 %v2153_v7 }
  0xa7   : > { %v2928_v61 = vpop.permute.xlu0 %390  ;;  %2183 = vmatpush3.bf16.msra.mxu1 %v2149_v44 }
  0xa8   : > { %655 = vrot.lane.b32.xlu1 %v2407_v38, %s2269_s19  ;;  %2176 = vmatprep.subr.bf16.mxu1 %v2153_v7 }
  0xa9   : > { %653 = vrot.lane.b32.xlu0 %v2413_v40, %s2269_s19  ;;  %2156 = vmatpush3.bf16.msra.mxu0 %v2153_v7 }
  0xaa   : > { %v2934_v41 = vpop.permute.xlu1 %396  ;;  %2158 = vmatprep.subr.bf16.mxu0 %v2157_v29 }
  0xab   : > { %v2942_v18 = vpop.permute.xlu0 %394  ;;  %2184 = vmatpush3.bf16.msra.mxu1 %v2153_v7 }
  0xac   : > { %659 = vrot.lane.b32.xlu1 %v2429_v46, %s2269_s19  ;;  %2177 = vmatprep.subr.bf16.mxu1 %v2157_v29 }
  0xad   : > { %657 = vrot.lane.b32.xlu0 %v2435_v48, %s2269_s19  ;;  %2160 = vmatpush3.bf16.msra.mxu0 %v2157_v29 }
  0xae   : > { %v2948_v0 = vpop.permute.xlu1 %400  ;;  %2162 = vmatprep.subr.bf16.mxu0 %v2161_v35 }
  0xaf   : > { %v2956_v58 = vpop.permute.xlu0 %398  ;;  %2185 = vmatpush3.bf16.msra.mxu1 %v2157_v29  ;;  %v2165_v29 = vpack.c.bf16 %v1547_v55, %v1546_v47  ;;  %v1549_v47 = vld [vmem:[%s3852_s1 + $0x78] sm:$0xff] }
  0xb0   : > { %663 = vrot.lane.b32.xlu1 %v2451_v54, %s2269_s19  ;;  %2178 = vmatprep.subr.bf16.mxu1 %v2161_v35 }
  0xb1   : > { %661 = vrot.lane.b32.xlu0 %v2457_v56, %s2269_s19  ;;  %2164 = vmatpush3.bf16.msra.mxu0 %v2161_v35 }
  0xb2   : > { %v2962_v44 = vpop.permute.xlu1 %404  ;;  %2166 = vmatprep.subr.bf16.mxu0 %v2165_v29 }
  0xb3   : > { %v2970_v63 = vpop.permute.xlu0 %402  ;;  %2186 = vmatpush3.bf16.msra.mxu1 %v2161_v35 }
  0xb4   : > { %741 = vrot.lane.b32.xlu1 %v2357_v17, %s2270_s22  ;;  %v1548_v17 = vld [vmem:[%s3852_s1 + $0x70] sm:$0xff]  ;;  %2179 = vmatprep.subr.bf16.mxu1 %v2165_v29 }
  0xb5   : > { %739 = vrot.lane.b32.xlu0 %v2343_v12, %s2270_s22  ;;  %2168 = vmatpush3.bf16.msra.mxu0 %v2165_v29  ;;  %v2169_v55 = vpack.c.bf16 %v1549_v47, %v1548_v17 }
  0xb6   : > { %v2976_v7 = vpop.permute.xlu1 %408 }
  0xb7   : > { %v2984_v4 = vpop.permute.xlu0 %406  ;;  %2187 = vmatpush3.bf16.msra.mxu1 %v2165_v29  ;;  %2170 = vmatprep.subr.bf16.mxu0 %v2169_v55 }
  0xb8   : > { %842 = vrot.lane.b32.xlu1 %v2673_v2, %s2271_s27  ;;  %2180 = vmatprep.subr.bf16.mxu1 %v2169_v55 }
  0xb9   : > { %840 = vrot.lane.b32.xlu0 %v2678_v51, %s2271_s27  ;;  %2172 = vmatpush3.bf16.msra.mxu0 %v2169_v55 }
  0xba   : > { %v2990_v12 = vpop.permute.xlu1 %412 }
  0xbb   : > { %v2998_v35 = vpop.permute.xlu0 %410  ;;  %2188 = vmatpush3.bf16.msra.mxu1 %v2169_v55 }
  0xbc   : > { %940 = vrot.lane.b32.xlu1 %v2340_v11, %s2272_s4 }
  0xbd   : > { %938 = vrot.lane.b32.xlu0 %v2350_v15, %s2272_s4 }
  0xbe   : > { %v3004_v51 = vpop.permute.xlu1 %416 }
  0xbf   : > { %v3006_v2 = vpop.permute.xlu0 %414 }
  0xc0   : > { %743 = vrot.lane.b32.xlu1 %v2381_v28, %s2270_s22 }
  0xc1   : > { %1040 = vrot.lane.b32.xlu0 %v2381_v28, %s2273_s5 }
  0xc2   : > { %v3012_v29 = vpop.permute.xlu1 %420 }
  0xc3   : > { %v3014_v11 = vpop.permute.xlu0 %418 }
  0xc4   : > { %1141 = vrot.lane.b32.xlu1 %v2691_v14, %s2274_s6 }
  0xc5   : > { %1042 = vrot.lane.b32.xlu0 %v2376_v25, %s2273_s5 }
  0xc6   : > { %v3020_v15 = vpop.permute.xlu1 %424 }
  0xc7   : > { %v3022_v17 = vpop.permute.xlu0 %422 }
  0xc8   : > { %844 = vrot.lane.b32.xlu1 %v2691_v14, %s2271_s27 }
  0xc9   : > { %745 = vrot.lane.b32.xlu0 %v2376_v25, %s2270_s22 }
  0xca   : > { %v3028_v28 = vpop.permute.xlu1 %541 }
  0xcb   : > { %v3030_v47 = vpop.permute.xlu0 %539 }
  0xcc   : > { %846 = vrot.lane.b32.xlu1 %v2686_v43, %s2271_s27 }
  0xcd   : > { %1143 = vrot.lane.b32.xlu0 %v2686_v43, %s2274_s6  ;;  %v1245_v43 = vsel %vm1237_vm2, %v2364_v22, %v2876_v49 }
  0xce   : > { %v3036_v55 = vpop.permute.xlu1 %545 }
  0xcf   : > { %3999 = vst [vmem:[#allocation55_spill] sm:$0xff] %v3036_v55  ;;  %v3038_v6 = vpop.permute.xlu0 %543 }
  0xd0   : > { %4000 = vst [vmem:[#allocation56_spill] sm:$0xff] %v3038_v6  ;;  %944 = vrot.lane.b32.xlu1 %v2364_v22, %s2272_s4  ;;  %v1246_v22 = vsel %vm1237_vm2, %v2391_v32, %v2886_v45  ;;  %v1248_v45 = vsel %vm1237_vm2, %v2413_v40, %v2900_v1 }
  0xd1   : > { %942 = vrot.lane.b32.xlu0 %v2370_v24, %s2272_s4 }
  0xd2   : > { %v3044_v25 = vpop.permute.xlu1 %549 }
  0xd3   : > { %4001 = vst [vmem:[#allocation57_spill] sm:$0xff] %v3044_v25  ;;  %v3046_v14 = vpop.permute.xlu0 %547  ;;  %v4004_v25 = vld [vmem:[#allocation2_spill] sm:$0xff] }
  0xd4   : > { %4002 = vst [vmem:[#allocation58_spill] sm:$0xff] %v3046_v14  ;;  %747 = vrot.lane.b32.xlu1 %v2403_v36, %s2270_s22 }
  0xd5   : > { %1044 = vrot.lane.b32.xlu0 %v2403_v36, %s2273_s5  ;;  %v1247_v36 = vsel %vm1237_vm2, %v2385_v30, %v2884_v33  ;;  %v1249_v33 = vsel %vm1237_vm2, %v2407_v38, %v2892_v9 }
  0xd6   : > { %v554_v55 = vpop.permute.xlu1 %553 }
  0xd7   : > { %v3056_v6 = vsel %vm1270_vm3, %v1245_v43, %v554_v55  ;;  %v3058_v24 = vpop.permute.xlu0 %551 }
  0xd8   : > { %4003 = vst [vmem:[#allocation59_spill] sm:$0xff] %v3056_v6  ;;  %1145 = vrot.lane.b32.xlu1 %v2704_v23, %s2274_s6 }
  0xd9   : > { %1046 = vrot.lane.b32.xlu0 %v4004_v25, %s2273_s5 }
  0xda   : > { %v558_v14 = vpop.permute.xlu1 %557 }
  0xdb   : > { %v3071_v49 = vsel %vm1270_vm3, %v1247_v36, %v558_v14  ;;  %v556_v55 = vpop.permute.xlu0 %555 }
  0xdc   : > { %v3074_v43 = vsel %vm1270_vm3, %v1246_v22, %v556_v55  ;;  %848 = vrot.lane.b32.xlu1 %v2704_v23, %s2271_s27  ;;  %v1251_v23 = vsel %vm1237_vm2, %v2429_v46, %v2906_v10 }
  0xdd   : > { %749 = vrot.lane.b32.xlu0 %v4004_v25, %s2270_s22 }
  0xde   : > { %v562_v6 = vpop.permute.xlu1 %561 }
  0xdf   : > { %v3087_v14 = vsel %vm1270_vm3, %v1249_v33, %v562_v6  ;;  %v560_v36 = vpop.permute.xlu0 %559  ;;  %v1250_v6 = vsel %vm1237_vm2, %v2435_v48, %v2914_v20  ;;  %v1252_v20 = vsel %vm1237_vm2, %v2457_v56, %v2928_v61  ;;  %v1254_v61 = vsel %vm1237_vm2, %v2479_v3, %v2942_v18 }
  0xe0   : > { %v3090_v22 = vsel %vm1270_vm3, %v1248_v45, %v560_v36  ;;  %850 = vrot.lane.b32.xlu1 %v2699_v5, %s2271_s27  ;;  %v1256_v18 = vsel %vm1237_vm2, %v2501_v19, %v2956_v58  ;;  %v1258_v19 = vsel %vm1237_vm2, %v2523_v37, %v2970_v63  ;;  %v1260_v37 = vsel %vm1237_vm2, %v2545_v59, %v2984_v4 }
  0xe1   : > { %1147 = vrot.lane.b32.xlu0 %v2699_v5, %s2274_s6  ;;  %v1253_v5 = vsel %vm1237_vm2, %v2451_v54, %v2920_v21  ;;  %v1262_v59 = vsel %vm1237_vm2, %v2567_v42, %v2998_v35  ;;  %v1264_v42 = vsel %vm1237_vm2, %v2589_v13, %v3006_v2  ;;  %v1266_v13 = vsel %vm1237_vm2, %v2611_v50, %v3014_v11 }
  0xe2   : > { %v566_v9 = vpop.permute.xlu1 %565  ;;  %v1268_v50 = vsel %vm1237_vm2, %v2633_v8, %v3022_v17  ;;  %v4010_v17 = vld [vmem:[#allocation8_spill] sm:$0xff] }
  0xe3   : > { %v3103_v1 = vsel %vm1270_vm3, %v1251_v23, %v566_v9  ;;  %v564_v25 = vpop.permute.xlu0 %563 }
  0xe4   : > { %v3106_v55 = vsel %vm1270_vm3, %v1250_v6, %v564_v25  ;;  %948 = vrot.lane.b32.xlu1 %v2385_v30, %s2272_s4  ;;  %v4005_v30 = vld [vmem:[#allocation4_spill] sm:$0xff]  ;;  %v4006_v25 = vld [vmem:[#allocation3_spill] sm:$0xff] }
  0xe5   : > { %946 = vrot.lane.b32.xlu0 %v2391_v32, %s2272_s4  ;;  %v1255_v32 = vsel %vm1237_vm2, %v2473_v62, %v2934_v41  ;;  %v1257_v41 = vsel %vm1237_vm2, %v2495_v16, %v2948_v0  ;;  %v1259_v16 = vsel %vm1237_vm2, %v2517_v34, %v2962_v44  ;;  %v1261_v34 = vsel %vm1237_vm2, %v2539_v53, %v2976_v7 }
  0xe6   : > { %v570_v10 = vpop.permute.xlu1 %569  ;;  %v1263_v53 = vsel %vm1237_vm2, %v2561_v26, %v2990_v12 }
  0xe7   : > { %v3119_v33 = vsel %vm1270_vm3, %v1253_v5, %v570_v10  ;;  %v568_v45 = vpop.permute.xlu0 %567 }
  0xe8   : > { %v3122_v36 = vsel %vm1270_vm3, %v1252_v20, %v568_v45  ;;  %751 = vrot.lane.b32.xlu1 %v4005_v30, %s2270_s22 }
  0xe9   : > { %1048 = vrot.lane.b32.xlu0 %v4005_v30, %s2273_s5 }
  0xea   : > { %v574_v21 = vpop.permute.xlu1 %573 }
  0xeb   : > { %v3135_v23 = vsel %vm1270_vm3, %v1255_v32, %v574_v21  ;;  %v572_v9 = vpop.permute.xlu0 %571 }
  0xec   : > { %v3138_v6 = vsel %vm1270_vm3, %v1254_v61, %v572_v9  ;;  %1149 = vrot.lane.b32.xlu1 %v2717_v31, %s2274_s6 }
  0xed   : > { %1050 = vrot.lane.b32.xlu0 %v4006_v25, %s2273_s5 }
  0xee   : > { %v578_v5 = vpop.permute.xlu1 %577 }
  0xef   : > { %v3151_v10 = vsel %vm1270_vm3, %v1257_v41, %v578_v5  ;;  %v576_v20 = vpop.permute.xlu0 %575 }
  0xf0   : > { %v3154_v45 = vsel %vm1270_vm3, %v1256_v18, %v576_v20  ;;  %852 = vrot.lane.b32.xlu1 %v2717_v31, %s2271_s27 }
  0xf1   : > { %753 = vrot.lane.b32.xlu0 %v4006_v25, %s2270_s22  ;;  %v4008_v25 = vld [vmem:[#allocation5_spill] sm:$0xff] }
  0xf2   : > { %v582_v0 = vpop.permute.xlu1 %581 }
  0xf3   : > { %v3167_v58 = vsel %vm1270_vm3, %v1259_v16, %v582_v0  ;;  %v580_v30 = vpop.permute.xlu0 %579 }
  0xf4   : > { %v3170_v32 = vsel %vm1270_vm3, %v1258_v19, %v580_v30  ;;  %854 = vrot.lane.b32.xlu1 %v2712_v60, %s2271_s27  ;;  %v4011_v30 = vld [vmem:[#allocation29_spill] sm:$0xff] }
  0xf5   : > { %1151 = vrot.lane.b32.xlu0 %v2712_v60, %s2274_s6 }
  0xf6   : > { %v586_v31 = vpop.permute.xlu1 %585 }
  0xf7   : > { %v3183_v44 = vsel %vm1270_vm3, %v1261_v34, %v586_v31  ;;  %v584_v63 = vpop.permute.xlu0 %583 }
  0xf8   : > { %v3186_v21 = vsel %vm1270_vm3, %v1260_v37, %v584_v63  ;;  %952 = vrot.lane.b32.xlu1 %v2407_v38, %s2272_s4  ;;  %v4007_v38 = vld [vmem:[#allocation6_spill] sm:$0xff]  ;;  %v4013_v63 = vld [vmem:[#allocation28_spill] sm:$0xff] }
  0xf9   : > { %950 = vrot.lane.b32.xlu0 %v2413_v40, %s2272_s4  ;;  %v1265_v40 = vsel %vm1237_vm2, %v2583_v27, %v3004_v51  ;;  %v1267_v27 = vsel %vm1237_vm2, %v2605_v57, %v3012_v29  ;;  %v1269_v57 = vsel %vm1237_vm2, %v2627_v52, %v3020_v15 }
  0xfa   : > { %v590_v60 = vpop.permute.xlu1 %589 }
  0xfb   : > { %v3199_v7 = vsel %vm1270_vm3, %v1263_v53, %v590_v60  ;;  %v588_v4 = vpop.permute.xlu0 %587 }
  0xfc   : > { %v3202_v61 = vsel %vm1270_vm3, %v1262_v59, %v588_v4  ;;  %755 = vrot.lane.b32.xlu1 %v4007_v38, %s2270_s22 }
  0xfd   : > { %1052 = vrot.lane.b32.xlu0 %v4007_v38, %s2273_s5  ;;  %v4014_v38 = vld [vmem:[#allocation10_spill] sm:$0xff] }
  0xfe   : > { %v594_v26 = vpop.permute.xlu1 %593 }
  0xff   : > { %v3215_v12 = vsel %vm1270_vm3, %v1265_v40, %v594_v26  ;;  %v592_v35 = vpop.permute.xlu0 %591 }
 0x100   : > { %v3218_v9 = vsel %vm1270_vm3, %v1264_v42, %v592_v35  ;;  %1153 = vrot.lane.b32.xlu1 %v2730_v39, %s2274_s6  ;;  %v4015_v42 = vld [vmem:[#allocation31_spill] sm:$0xff] }
 0x101   : > { %1054 = vrot.lane.b32.xlu0 %v4008_v25, %s2273_s5 }
 0x102   : > { %v598_v51 = vpop.permute.xlu1 %597 }
 0x103   : > { %v3231_v2 = vsel %vm1270_vm3, %v1267_v27, %v598_v51  ;;  %v596_v41 = vpop.permute.xlu0 %595  ;;  %v2222_v51 = vld [vmem:[%s2314_s16] sm:$0xff] }
 0x104   : > { %v3234_v5 = vsel %vm1270_vm3, %v1266_v13, %v596_v41  ;;  %856 = vrot.lane.b32.xlu1 %v2730_v39, %s2271_s27  ;;  %v4009_v39 = vld [vmem:[#allocation27_spill] sm:$0xff]  ;;  %v4017_v13 = vld [vmem:[#allocation45_spill] sm:$0xff] }
 0x105   : > { %757 = vrot.lane.b32.xlu0 %v4008_v25, %s2270_s22  ;;  %v1238_v41 = vsel %vm1237_vm2, %v2222_v51, %v4017_v13 }
 0x106   : > { %v602_v29 = vpop.permute.xlu1 %601 }
 0x107   : > { %v3247_v11 = vsel %vm1270_vm3, %v1269_v57, %v602_v29  ;;  %v600_v18 = vpop.permute.xlu0 %599  ;;  %v4018_v57 = vld [vmem:[#allocation30_spill] sm:$0xff]  ;;  %v1271_v29 = vsel %vm1270_vm3, %v1238_v41, %v3030_v47 }
 0x108   : > { %v3250_v20 = vsel %vm1270_vm3, %v1268_v50, %v600_v18  ;;  %858 = vrot.lane.b32.xlu1 %v4009_v39, %s2271_s27 }
 0x109   : > { %1155 = vrot.lane.b32.xlu0 %v4009_v39, %s2274_s6 }
 0x10a   : > { %v3256_v16 = vpop.permute.xlu1 %639 }
 0x10b   : > { %v638_v52 = vpop.permute.xlu0 %637 }
 0x10c   : > { %956 = vrot.lane.b32.xlu1 %v2429_v46, %s2272_s4  ;;  %v4012_v46 = vld [vmem:[#allocation7_spill] sm:$0xff]  ;;  %v1304_v50 = vsel %vm1303_vm4, %v1271_v29, %v638_v52 }
 0x10d   : > { %954 = vrot.lane.b32.xlu0 %v2435_v48, %s2272_s4 }
 0x10e   : > { %v3262_v8 = vpop.permute.xlu1 %643 }
 0x10f   : > { %v3264_v15 = vpop.permute.xlu0 %641 }
 0x110   : > { %759 = vrot.lane.b32.xlu1 %v4010_v17, %s2270_s22 }
 0x111   : > { %1056 = vrot.lane.b32.xlu0 %v4010_v17, %s2273_s5 }
 0x112   : > { %v3270_v0 = vpop.permute.xlu1 %647 }
 0x113   : > { %v3272_v19 = vpop.permute.xlu0 %645 }
 0x114   : > { %1157 = vrot.lane.b32.xlu1 %v4011_v30, %s2274_s6 }
 0x115   : > { %1058 = vrot.lane.b32.xlu0 %v4012_v46, %s2273_s5 }
 0x116   : > { %v3278_v48 = vpop.permute.xlu1 %651 }
 0x117   : > { %v3280_v34 = vpop.permute.xlu0 %649 }
 0x118   : > { %860 = vrot.lane.b32.xlu1 %v4011_v30, %s2271_s27 }
 0x119   : > { %761 = vrot.lane.b32.xlu0 %v4012_v46, %s2270_s22 }
 0x11a   : > { %v3286_v31 = vpop.permute.xlu1 %655 }
 0x11b   : > { %v3288_v37 = vpop.permute.xlu0 %653 }
 0x11c   : > { %862 = vrot.lane.b32.xlu1 %v4013_v63, %s2271_s27 }
 0x11d   : > { %1159 = vrot.lane.b32.xlu0 %v4013_v63, %s2274_s6 }
 0x11e   : > { %v3294_v53 = vpop.permute.xlu1 %659 }
 0x11f   : > { %v3296_v60 = vpop.permute.xlu0 %657 }
 0x120   : > { %960 = vrot.lane.b32.xlu1 %v2451_v54, %s2272_s4  ;;  %v4016_v54 = vld [vmem:[#allocation9_spill] sm:$0xff] }
 0x121   : > { %958 = vrot.lane.b32.xlu0 %v2457_v56, %s2272_s4 }
 0x122   : > { %v3302_v59 = vpop.permute.xlu1 %663 }
 0x123   : > { %v3304_v4 = vpop.permute.xlu0 %661 }
 0x124   : > { %763 = vrot.lane.b32.xlu1 %v4014_v38, %s2270_s22 }
 0x125   : > { %1060 = vrot.lane.b32.xlu0 %v4014_v38, %s2273_s5 }
 0x126   : > { %v742_v40 = vpop.permute.xlu1 %741 }
 0x127   : > { %v740_v26 = vpop.permute.xlu0 %739 }
 0x128   : > { %1161 = vrot.lane.b32.xlu1 %v4015_v42, %s2274_s6  ;;  %v1337_v39 = vsel %vm1336_vm5, %v1304_v50, %v740_v26  ;;  %v4019_v26 = vld [vmem:[#allocation12_spill] sm:$0xff] }
 0x129   : > { %1062 = vrot.lane.b32.xlu0 %v4016_v54, %s2273_s5 }
 0x12a   : > { %v843_v56 = vpop.permute.xlu1 %842 }
 0x12b   : > { %v841_v35 = vpop.permute.xlu0 %840 }
 0x12c   : > { %864 = vrot.lane.b32.xlu1 %v4015_v42, %s2271_s27  ;;  %v1370_v30 = vsel %vm1369_vm6, %v1337_v39, %v841_v35  ;;  %v2223_v42 = vld [vmem:[%s2314_s16 + $0x8] sm:$0xff] }
 0x12d   : > { %765 = vrot.lane.b32.xlu0 %v4016_v54, %s2270_s22  ;;  %v4020_v54 = vld [vmem:[#allocation49_spill] sm:$0xff] }
 0x12e   : > { %v941_v25 = vpop.permute.xlu1 %940  ;;  %v1239_v35 = vsel %vm1237_vm2, %v2223_v42, %v4020_v54 }
 0x12f   : > { %v939_v27 = vpop.permute.xlu0 %938 }
 0x130   : > { %866 = vrot.lane.b32.xlu1 %v4018_v57, %s2271_s27  ;;  %v1403_v47 = vsel %vm1402_vm7, %v1370_v30, %v939_v27 }
 0x131   : > { %1163 = vrot.lane.b32.xlu0 %v4018_v57, %s2274_s6 }
 0x132   : > { %v744_v18 = vpop.permute.xlu1 %743 }
 0x133   : > { %v1041_v17 = vpop.permute.xlu0 %1040 }
 0x134   : > { %665 = vrot.lane.b32.xlu1 %v2479_v3, %s2269_s19  ;;  %v1436_v52 = vsel %vm1435_vm8, %v1403_v47, %v1041_v17  ;;  %v4021_v17 = vld [vmem:[#allocation33_spill] sm:$0xff] }
 0x135   : > { %962 = vrot.lane.b32.xlu0 %v2479_v3, %s2272_s4  ;;  %v1272_v3 = vsel %vm1270_vm3, %v1239_v35, %v3028_v28  ;;  %v2224_v47 = vld [vmem:[%s2314_s16 + $0x18] sm:$0xff]  ;;  %v4025_v35 = vld [vmem:[#allocation32_spill] sm:$0xff] }
 0x136   : > { %v1142_v46 = vpop.permute.xlu1 %1141  ;;  %v1305_v51 = vsel %vm1303_vm4, %v1272_v3, %v3256_v16 }
 0x137   : > { %v1043_v63 = vpop.permute.xlu0 %1042  ;;  %v1469_v38 = vsel %vm1468_vm9, %v1436_v52, %v1142_v46  ;;  %v1338_v41 = vsel %vm1336_vm5, %v1305_v51, %v742_v40  ;;  %v4022_v40 = vld [vmem:[#allocation11_spill] sm:$0xff]  ;;  %v4024_v52 = vld [vmem:[#allocation56_spill] sm:$0xff] }
 0x138   : > { %1064 = vrot.lane.b32.xlu1 %v4019_v26, %s2273_s5  ;;  %2093 = vmatprep.mubr.msk.f32.mxu0 %vm1501_vm10, %v1469_v38  ;;  %v1371_v57 = vsel %vm1369_vm6, %v1338_v41, %v843_v56 }
 0x139   : > { %964 = vrot.lane.b32.xlu0 %v2473_v62, %s2272_s4  ;;  %v1404_v29 = vsel %vm1402_vm7, %v1371_v57, %v941_v25 }
 0x13a   : > { %v845_v27 = vpop.permute.xlu1 %844  ;;  %v1437_v28 = vsel %vm1435_vm8, %v1404_v29, %v1043_v63  ;;  %v2225_v29 = vld [vmem:[%s2314_s16 + $0xd8] sm:$0xff] }
 0x13b   : > { %v746_v13 = vpop.permute.xlu0 %745 }
 0x13c   : > { %767 = vrot.lane.b32.xlu1 %v4019_v26, %s2270_s22 }
 0x13d   : > { %667 = vrot.lane.b32.xlu0 %v2473_v62, %s2269_s19  ;;  %v4023_v62 = vld [vmem:[#allocation43_spill] sm:$0xff] }
 0x13e   : > { %v847_v50 = vpop.permute.xlu1 %846  ;;  %v1240_v25 = vsel %vm1237_vm2, %v2224_v47, %v4023_v62  ;;  %v4028_v62 = vld [vmem:[#allocation14_spill] sm:$0xff] }
 0x13f   : > { %v1144_v39 = vpop.permute.xlu0 %1143  ;;  %v1273_v46 = vsel %vm1270_vm3, %v1240_v25, %v4024_v52  ;;  %v2227_v52 = vld [vmem:[%s2314_s16 + $0xe0] sm:$0xff] }
 0x140   : > { %v1470_v16 = vsel %vm1468_vm9, %v1437_v28, %v1144_v39  ;;  %1165 = vrot.lane.b32.xlu1 %v4021_v17, %s2274_s6  ;;  %v1306_v63 = vsel %vm1303_vm4, %v1273_v46, %v3264_v15  ;;  %v4027_v39 = vld [vmem:[#allocation55_spill] sm:$0xff] }
 0x141   : > { %1066 = vrot.lane.b32.xlu0 %v4022_v40, %s2273_s5  ;;  %2094 = vmatmul.mubr.msk.f32.vlgmr.msra.gmra.mrb[0].mxu0 %vm1501_vm10, %v1470_v16  ;;  %v1339_v26 = vsel %vm1336_vm5, %v1306_v63, %v744_v18  ;;  %v2226_v18 = vld [vmem:[%s2314_s16 + $0x20] sm:$0xff] }
 0x142   : > { %v945_v56 = vpop.permute.xlu1 %944  ;;  %v1372_v54 = vsel %vm1369_vm6, %v1339_v26, %v845_v27  ;;  %v4026_v27 = vld [vmem:[#allocation47_spill] sm:$0xff] }
 0x143   : > { %v943_v30 = vpop.permute.xlu0 %942  ;;  %v1241_v28 = vsel %vm1237_vm2, %v2226_v18, %v4026_v27 }
 0x144   : > { %868 = vrot.lane.b32.xlu1 %v4021_v17, %s2271_s27  ;;  %v1405_v3 = vsel %vm1402_vm7, %v1372_v54, %v943_v30  ;;  %v1274_v16 = vsel %vm1270_vm3, %v1241_v28, %v4027_v39  ;;  %v2228_v54 = vld [vmem:[%s2314_s16 + $0x30] sm:$0xff] }
 0x145   : > { %769 = vrot.lane.b32.xlu0 %v4022_v40, %s2270_s22  ;;  %v1307_v40 = vsel %vm1303_vm4, %v1274_v16, %v3262_v8 }
 0x146   : > { %v748_v38 = vpop.permute.xlu1 %747  ;;  %v1340_v47 = vsel %vm1336_vm5, %v1307_v40, %v746_v13 }
 0x147   : > { %v1045_v42 = vpop.permute.xlu0 %1044  ;;  %v1373_v25 = vsel %vm1369_vm6, %v1340_v47, %v847_v50 }
 0x148   : > { %870 = vrot.lane.b32.xlu1 %v4025_v35, %s2271_s27  ;;  %v1438_v51 = vsel %vm1435_vm8, %v1405_v3, %v1045_v42  ;;  %v1406_v46 = vsel %vm1402_vm7, %v1373_v25, %v945_v56  ;;  %v4030_v56 = vld [vmem:[#allocation35_spill] sm:$0xff] }
 0x149   : > { %1167 = vrot.lane.b32.xlu0 %v4025_v35, %s2274_s6  ;;  %v4029_v35 = vld [vmem:[#allocation53_spill] sm:$0xff] }
 0x14a   : > { %v1146_v41 = vpop.permute.xlu1 %1145  ;;  %v1242_v3 = vsel %vm1237_vm2, %v2228_v54, %v4029_v35  ;;  %v2230_v54 = vld [vmem:[%s2314_s16 + $0xf0] sm:$0xff] }
 0x14b   : > { %v1471_v15 = vsel %vm1468_vm9, %v1438_v51, %v1146_v41  ;;  %v1047_v57 = vpop.permute.xlu0 %1046  ;;  %v4031_v51 = vld [vmem:[#allocation58_spill] sm:$0xff] }
 0x14c   : > { %669 = vrot.lane.b32.xlu1 %v2225_v29, %s2269_s19  ;;  %2096 = vmatprep.mubr.msk.f32.mxu0 %vm1501_vm10, %v1471_v15  ;;  %v1439_v26 = vsel %vm1435_vm8, %v1406_v46, %v1047_v57  ;;  %v1275_v41 = vsel %vm1270_vm3, %v1242_v3, %v4031_v51  ;;  %v4032_v15 = vld [vmem:[#allocation13_spill] sm:$0xff] }
 0x14d   : > { %966 = vrot.lane.b32.xlu0 %v2225_v29, %s2272_s4  ;;  %v1308_v57 = vsel %vm1303_vm4, %v1275_v41, %v3272_v19 }
 0x14e   : > { %v849_v17 = vpop.permute.xlu1 %848  ;;  %v1341_v18 = vsel %vm1336_vm5, %v1308_v57, %v748_v38  ;;  %v4033_v38 = vld [vmem:[#allocation34_spill] sm:$0xff] }
 0x14f   : > { %v750_v30 = vpop.permute.xlu0 %749  ;;  %v1374_v28 = vsel %vm1369_vm6, %v1341_v18, %v849_v17  ;;  %v2229_v17 = vld [vmem:[%s2314_s16 + $0x38] sm:$0xff]  ;;  %v2232_v18 = vld [vmem:[%s2314_s16 + $0x48] sm:$0xff] }
 0x150   : > { %1068 = vrot.lane.b32.xlu1 %v4028_v62, %s2273_s5 }
 0x151   : > { %968 = vrot.lane.b32.xlu0 %v2227_v52, %s2272_s4 }
 0x152   : > { %v851_v63 = vpop.permute.xlu1 %850 }
 0x153   : > { %v1148_v42 = vpop.permute.xlu0 %1147 }
 0x154   : > { %v1472_v8 = vsel %vm1468_vm9, %v1439_v26, %v1148_v42  ;;  %771 = vrot.lane.b32.xlu1 %v4028_v62, %s2270_s22  ;;  %v4034_v62 = vld [vmem:[#allocation51_spill] sm:$0xff] }
 0x155   : > { %671 = vrot.lane.b32.xlu0 %v2227_v52, %s2269_s19  ;;  %2097 = vmatmul.mubr.msk.f32.gmra.mrb[2].mxu0 %vm1501_vm10, %v1472_v8  ;;  %v1243_v25 = vsel %vm1237_vm2, %v2229_v17, %v4034_v62  ;;  %v4035_v52 = vld [vmem:[#allocation57_spill] sm:$0xff]  ;;  %v4039_v62 = vld [vmem:[#allocation15_spill] sm:$0xff] }
 0x156   : > { %v949_v13 = vpop.permute.xlu1 %948  ;;  %v1276_v46 = vsel %vm1270_vm3, %v1243_v25, %v4035_v52 }
 0x157   : > { %v947_v50 = vpop.permute.xlu0 %946  ;;  %v1309_v42 = vsel %vm1303_vm4, %v1276_v46, %v3270_v0  ;;  %v4036_v0 = vld [vmem:[#allocation16_spill] sm:$0xff]  ;;  %v4040_v46 = vld [vmem:[#allocation59_spill] sm:$0xff] }
 0x158   : > { %1169 = vrot.lane.b32.xlu1 %v4030_v56, %s2274_s6  ;;  %v1407_v39 = vsel %vm1402_vm7, %v1374_v28, %v947_v50  ;;  %v1342_v50 = vsel %vm1336_vm5, %v1309_v42, %v750_v30  ;;  %v2231_v30 = vld [vmem:[%s2314_s16 + $0xf8] sm:$0xff] }
 0x159   : > { %1070 = vrot.lane.b32.xlu0 %v4032_v15, %s2273_s5  ;;  %v1375_v35 = vsel %vm1369_vm6, %v1342_v50, %v851_v63 }
 0x15a   : > { %v752_v29 = vpop.permute.xlu1 %751  ;;  %v1408_v3 = vsel %vm1402_vm7, %v1375_v35, %v949_v13 }
 0x15b   : > { %v1049_v27 = vpop.permute.xlu0 %1048 }
 0x15c   : > { %872 = vrot.lane.b32.xlu1 %v4030_v56, %s2271_s27  ;;  %v1440_v16 = vsel %vm1435_vm8, %v1407_v39, %v1049_v27  ;;  %v4037_v27 = vld [vmem:[#allocation54_spill] sm:$0xff] }
 0x15d   : > { %773 = vrot.lane.b32.xlu0 %v4032_v15, %s2270_s22  ;;  %v1244_v13 = vsel %vm1237_vm2, %v2232_v18, %v4037_v27 }
 0x15e   : > { %v1150_v40 = vpop.permute.xlu1 %1149  ;;  %v1277_v28 = vsel %vm1270_vm3, %v1244_v13, %v3058_v24 }
 0x15f   : > { %v1473_v19 = vsel %vm1468_vm9, %v1440_v16, %v1150_v40  ;;  %v1051_v47 = vpop.permute.xlu0 %1050  ;;  %v1310_v39 = vsel %vm1303_vm4, %v1277_v28, %v3280_v34 }
 0x160   : > { %874 = vrot.lane.b32.xlu1 %v4033_v38, %s2271_s27  ;;  %2099 = vmatprep.mubr.msk.f32.mxu0 %vm1501_vm10, %v1473_v19  ;;  %v1441_v51 = vsel %vm1435_vm8, %v1408_v3, %v1051_v47  ;;  %v1343_v40 = vsel %vm1336_vm5, %v1310_v39, %v752_v29 }
 0x161   : > { %1171 = vrot.lane.b32.xlu0 %v4033_v38, %s2274_s6  ;;  %v4038_v38 = vld [vmem:[#allocation37_spill] sm:$0xff] }
 0x162   : > { %v853_v26 = vpop.permute.xlu1 %852 }
 0x163   : > { %v754_v8 = vpop.permute.xlu0 %753  ;;  %v1376_v47 = vsel %vm1369_vm6, %v1343_v40, %v853_v26  ;;  %v1311_v26 = vsel %vm1303_vm4, %v4040_v46, %v3278_v48 }
 0x164   : > { %673 = vrot.lane.b32.xlu1 %v2230_v54, %s2269_s19  ;;  %v1344_v50 = vsel %vm1336_vm5, %v1311_v26, %v754_v8 }
 0x165   : > { %970 = vrot.lane.b32.xlu0 %v2230_v54, %s2272_s4  ;;  %v4041_v54 = vld [vmem:[#allocation36_spill] sm:$0xff] }
 0x166   : > { %v855_v56 = vpop.permute.xlu1 %854 }
 0x167   : > { %v1152_v41 = vpop.permute.xlu0 %1151  ;;  %v1377_v35 = vsel %vm1369_vm6, %v1344_v50, %v855_v56  ;;  %v2235_v50 = vld [vmem:[%s2314_s16 + $0x120] sm:$0xff] }
 0x168   : > { %v1474_v15 = vsel %vm1468_vm9, %v1441_v51, %v1152_v41  ;;  %1072 = vrot.lane.b32.xlu1 %v4036_v0, %s2273_s5 }
 0x169   : > { %972 = vrot.lane.b32.xlu0 %v2231_v30, %s2272_s4  ;;  %2100 = vmatmul.mubr.msk.f32.gmra.mrb[4].mxu0 %vm1501_vm10, %v1474_v15 }
 0x16a   : > { %v953_v57 = vpop.permute.xlu1 %952 }
 0x16b   : > { %v951_v63 = vpop.permute.xlu0 %950  ;;  %v1410_v3 = vsel %vm1402_vm7, %v1377_v35, %v953_v57  ;;  %v1312_v57 = vsel %vm1303_vm4, %v3074_v43, %v3288_v37  ;;  %v4043_v43 = vld [vmem:[#allocation39_spill] sm:$0xff]  ;;  %v4044_v37 = vld [vmem:[#allocation17_spill] sm:$0xff] }
 0x16c   : > { %775 = vrot.lane.b32.xlu1 %v4036_v0, %s2270_s22  ;;  %v1409_v17 = vsel %vm1402_vm7, %v1376_v47, %v951_v63  ;;  %v2233_v0 = vld [vmem:[%s2314_s16 + $0x108] sm:$0xff]  ;;  %v2234_v63 = vld [vmem:[%s2314_s16 + $0x110] sm:$0xff] }
 0x16d   : > { %675 = vrot.lane.b32.xlu0 %v2231_v30, %s2269_s19  ;;  %v4042_v30 = vld [vmem:[#allocation18_spill] sm:$0xff] }
 0x16e   : > { %v756_v16 = vpop.permute.xlu1 %755 }
 0x16f   : > { %v1053_v19 = vpop.permute.xlu0 %1052  ;;  %v1345_v27 = vsel %vm1336_vm5, %v1312_v57, %v756_v16 }
 0x170   : > { %1173 = vrot.lane.b32.xlu1 %v4038_v38, %s2274_s6  ;;  %v1442_v24 = vsel %vm1435_vm8, %v1409_v17, %v1053_v19  ;;  %v1313_v17 = vsel %vm1303_vm4, %v3071_v49, %v3286_v31  ;;  %v4045_v31 = vld [vmem:[#allocation38_spill] sm:$0xff] }
 0x171   : > { %1074 = vrot.lane.b32.xlu0 %v4039_v62, %s2273_s5 }
 0x172   : > { %v1154_v25 = vpop.permute.xlu1 %1153 }
 0x173   : > { %v1475_v52 = vsel %vm1468_vm9, %v1442_v24, %v1154_v25  ;;  %v1055_v34 = vpop.permute.xlu0 %1054 }
 0x174   : > { %876 = vrot.lane.b32.xlu1 %v4038_v38, %s2271_s27  ;;  %2102 = vmatprep.mubr.msk.f32.mxu0 %vm1501_vm10, %v1475_v52  ;;  %v1443_v41 = vsel %vm1435_vm8, %v1410_v3, %v1055_v34 }
 0x175   : > { %777 = vrot.lane.b32.xlu0 %v4039_v62, %s2270_s22 }
 0x176   : > { %v857_v29 = vpop.permute.xlu1 %856 }
 0x177   : > { %v758_v42 = vpop.permute.xlu0 %757  ;;  %v1378_v28 = vsel %vm1369_vm6, %v1345_v27, %v857_v29  ;;  %v4047_v27 = vld [vmem:[#allocation41_spill] sm:$0xff] }
 0x178   : > { %878 = vrot.lane.b32.xlu1 %v4041_v54, %s2271_s27  ;;  %v1346_v24 = vsel %vm1336_vm5, %v1313_v17, %v758_v42  ;;  %v2237_v17 = vld [vmem:[%s2314_s16 + $0x138] sm:$0xff] }
 0x179   : > { %1175 = vrot.lane.b32.xlu0 %v4041_v54, %s2274_s6  ;;  %v1314_v54 = vsel %vm1303_vm4, %v3090_v22, %v3296_v60 }
 0x17a   : > { %v859_v51 = vpop.permute.xlu1 %858 }
 0x17b   : > { %v1156_v15 = vpop.permute.xlu0 %1155  ;;  %v1379_v25 = vsel %vm1369_vm6, %v1346_v24, %v859_v51 }
 0x17c   : > { %v1476_v48 = vsel %vm1468_vm9, %v1443_v41, %v1156_v15  ;;  %677 = vrot.lane.b32.xlu1 %v2233_v0, %s2269_s19  ;;  %v4046_v15 = vld [vmem:[#allocation20_spill] sm:$0xff] }
 0x17d   : > { %974 = vrot.lane.b32.xlu0 %v2233_v0, %s2272_s4  ;;  %2103 = vmatmul.mubr.msk.f32.gmra.mrb[6].mxu0 %vm1501_vm10, %v1476_v48  ;;  %v2236_v0 = vld [vmem:[%s2314_s16 + $0x128] sm:$0xff] }
 0x17e   : > { %v957_v8 = vpop.permute.xlu1 %956 }
 0x17f   : > { %v955_v56 = vpop.permute.xlu0 %954  ;;  %v1412_v52 = vsel %vm1402_vm7, %v1379_v25, %v957_v8 }
 0x180   : > { %1076 = vrot.lane.b32.xlu1 %v4042_v30, %s2273_s5  ;;  %v1411_v39 = vsel %vm1402_vm7, %v1378_v28, %v955_v56  ;;  %v4048_v28 = vld [vmem:[#allocation19_spill] sm:$0xff] }
 0x181   : > { %976 = vrot.lane.b32.xlu0 %v2234_v63, %s2272_s4 }
 0x182   : > { %v760_v18 = vpop.permute.xlu1 %759 }
 0x183   : > { %v1057_v13 = vpop.permute.xlu0 %1056  ;;  %v1347_v3 = vsel %vm1336_vm5, %v1314_v54, %v760_v18 }
 0x184   : > { %779 = vrot.lane.b32.xlu1 %v4042_v30, %s2270_s22  ;;  %v1444_v40 = vsel %vm1435_vm8, %v1411_v39, %v1057_v13 }
 0x185   : > { %679 = vrot.lane.b32.xlu0 %v2234_v63, %s2269_s19  ;;  %v1315_v63 = vsel %vm1303_vm4, %v3087_v14, %v3294_v53 }
 0x186   : > { %v1158_v19 = vpop.permute.xlu1 %1157 }
 0x187   : > { %v1477_v47 = vsel %vm1468_vm9, %v1444_v40, %v1158_v19  ;;  %v1059_v38 = vpop.permute.xlu0 %1058 }
 0x188   : > { %1177 = vrot.lane.b32.xlu1 %v4043_v43, %s2274_s6  ;;  %2105 = vmatprep.mubr.msk.f32.mxu0 %vm1501_vm10, %v1477_v47  ;;  %v1445_v29 = vsel %vm1435_vm8, %v1412_v52, %v1059_v38 }
 0x189   : > { %1078 = vrot.lane.b32.xlu0 %v4044_v37, %s2273_s5 }
 0x18a   : > { %v861_v16 = vpop.permute.xlu1 %860 }
 0x18b   : > { %v762_v62 = vpop.permute.xlu0 %761  ;;  %v1380_v41 = vsel %vm1369_vm6, %v1347_v3, %v861_v16  ;;  %v4051_v3 = vld [vmem:[#allocation44_spill] sm:$0xff] }
 0x18c   : > { %880 = vrot.lane.b32.xlu1 %v4043_v43, %s2271_s27  ;;  %v1348_v18 = vsel %vm1336_vm5, %v1315_v63, %v762_v62  ;;  %v4049_v43 = vld [vmem:[#allocation40_spill] sm:$0xff]  ;;  %v1316_v62 = vsel %vm1303_vm4, %v3106_v55, %v3304_v4 }
 0x18d   : > { %781 = vrot.lane.b32.xlu0 %v4044_v37, %s2270_s22  ;;  %v2239_v63 = vld [vmem:[%s2314_s16 + $0x150] sm:$0xff] }
 0x18e   : > { %v863_v34 = vpop.permute.xlu1 %862 }
 0x18f   : > { %v1160_v46 = vpop.permute.xlu0 %1159  ;;  %v1381_v13 = vsel %vm1369_vm6, %v1348_v18, %v863_v34 }
 0x190   : > { %v1478_v49 = vsel %vm1468_vm9, %v1445_v29, %v1160_v46  ;;  %882 = vrot.lane.b32.xlu1 %v4045_v31, %s2271_s27  ;;  %v4050_v29 = vld [vmem:[#allocation22_spill] sm:$0xff] }
 0x191   : > { %1179 = vrot.lane.b32.xlu0 %v4045_v31, %s2274_s6  ;;  %2106 = vmatmul.mubr.msk.f32.gmra.mrb[8].mxu0 %vm1501_vm10, %v1478_v49  ;;  %v2238_v49 = vld [vmem:[%s2314_s16 + $0x140] sm:$0xff] }
 0x192   : > { %v961_v26 = vpop.permute.xlu1 %960 }
 0x193   : > { %v959_v42 = vpop.permute.xlu0 %958  ;;  %v1414_v39 = vsel %vm1402_vm7, %v1381_v13, %v961_v26 }
 0x194   : > { %681 = vrot.lane.b32.xlu1 %v2235_v50, %s2269_s19  ;;  %v1413_v48 = vsel %vm1402_vm7, %v1380_v41, %v959_v42  ;;  %v4052_v41 = vld [vmem:[#allocation21_spill] sm:$0xff] }
 0x195   : > { %978 = vrot.lane.b32.xlu0 %v2235_v50, %s2272_s4  ;;  %v1317_v50 = vsel %vm1303_vm4, %v3103_v1, %v3302_v59 }
 0x196   : > { %v764_v35 = vpop.permute.xlu1 %763 }
 0x197   : > { %v1061_v51 = vpop.permute.xlu0 %1060  ;;  %v1349_v25 = vsel %vm1336_vm5, %v1316_v62, %v764_v35 }
 0x198   : > { %1080 = vrot.lane.b32.xlu1 %v4046_v15, %s2273_s5  ;;  %v1446_v8 = vsel %vm1435_vm8, %v1413_v48, %v1061_v51 }
 0x199   : > { %980 = vrot.lane.b32.xlu0 %v2236_v0, %s2272_s4 }
 0x19a   : > { %v1162_v56 = vpop.permute.xlu1 %1161 }
 0x19b   : > { %v1479_v30 = vsel %vm1468_vm9, %v1446_v8, %v1162_v56  ;;  %v1063_v22 = vpop.permute.xlu0 %1062 }
 0x19c   : > { %783 = vrot.lane.b32.xlu1 %v4046_v15, %s2270_s22  ;;  %2108 = vmatprep.mubr.msk.f32.mxu0 %vm1501_vm10, %v1479_v30  ;;  %v1447_v19 = vsel %vm1435_vm8, %v1414_v39, %v1063_v22  ;;  %v4053_v30 = vld [vmem:[#allocation42_spill] sm:$0xff]  ;;  %v4054_v39 = vld [vmem:[#allocation24_spill] sm:$0xff] }
 0x19d   : > { %683 = vrot.lane.b32.xlu0 %v2236_v0, %s2269_s19 }
 0x19e   : > { %v865_v60 = vpop.permute.xlu1 %864 }
 0x19f   : > { %v766_v57 = vpop.permute.xlu0 %765  ;;  %v1382_v34 = vsel %vm1369_vm6, %v1349_v25, %v865_v60 }
 0x1a0   : > { %1181 = vrot.lane.b32.xlu1 %v4047_v27, %s2274_s6  ;;  %v1350_v35 = vsel %vm1336_vm5, %v1317_v50, %v766_v57 }
 0x1a1   : > { %1082 = vrot.lane.b32.xlu0 %v4048_v28, %s2273_s5 }
 0x1a2   : > { %v867_v40 = vpop.permute.xlu1 %866 }
 0x1a3   : > { %v1164_v47 = vpop.permute.xlu0 %1163  ;;  %v1383_v51 = vsel %vm1369_vm6, %v1350_v35, %v867_v40 }
 0x1a4   : > { %v1480_v14 = vsel %vm1468_vm9, %v1447_v19, %v1164_v47  ;;  %884 = vrot.lane.b32.xlu1 %v4047_v27, %s2271_s27  ;;  %v2240_v19 = vld [vmem:[%s2314_s16 + $0x158] sm:$0xff] }
 0x1a5   : > { %785 = vrot.lane.b32.xlu0 %v4048_v28, %s2270_s22  ;;  %2109 = vmatmul.mubr.msk.f32.gmra.mrb[10].mxu0 %vm1501_vm10, %v1480_v14 }
 0x1a6   : > { %v666_v53 = vpop.permute.xlu1 %665 }
 0x1a7   : > { %v963_v38 = vpop.permute.xlu0 %962  ;;  %v1318_v57 = vsel %vm1303_vm4, %v3122_v36, %v666_v53 }
 0x1a8   : > { %886 = vrot.lane.b32.xlu1 %v4049_v43, %s2271_s27  ;;  %v1415_v46 = vsel %vm1402_vm7, %v1382_v34, %v963_v38 }
 0x1a9   : > { %1183 = vrot.lane.b32.xlu0 %v4049_v43, %s2274_s6 }
 0x1aa   : > { %v1065_v37 = vpop.permute.xlu1 %1064 }
 0x1ab   : > { %v965_v16 = vpop.permute.xlu0 %964  ;;  %v1448_v31 = vsel %vm1435_vm8, %v1415_v46, %v1065_v37 }
 0x1ac   : > { %685 = vrot.lane.b32.xlu1 %v2237_v17, %s2269_s19  ;;  %v1416_v15 = vsel %vm1402_vm7, %v1383_v51, %v965_v16  ;;  %v4058_v51 = vld [vmem:[#allocation26_spill] sm:$0xff] }
 0x1ad   : > { %982 = vrot.lane.b32.xlu0 %v2237_v17, %s2272_s4  ;;  %v4055_v17 = vld [vmem:[#allocation48_spill] sm:$0xff] }
 0x1ae   : > { %v768_v24 = vpop.permute.xlu1 %767 }
 0x1af   : > { %v668_v52 = vpop.permute.xlu0 %667  ;;  %v1351_v27 = vsel %vm1336_vm5, %v1318_v57, %v768_v24  ;;  %v4056_v24 = vld [vmem:[#allocation23_spill] sm:$0xff] }
 0x1b0   : > { %1084 = vrot.lane.b32.xlu1 %v4050_v29, %s2273_s5  ;;  %v1319_v43 = vsel %vm1303_vm4, %v3119_v33, %v668_v52 }
 0x1b1   : > { %984 = vrot.lane.b32.xlu0 %v2238_v49, %s2272_s4 }
 0x1b2   : > { %v1166_v26 = vpop.permute.xlu1 %1165 }
 0x1b3   : > { %v1481_v42 = vsel %vm1468_vm9, %v1448_v31, %v1166_v26  ;;  %v1067_v55 = vpop.permute.xlu0 %1066  ;;  %v4057_v31 = vld [vmem:[#allocation46_spill] sm:$0xff] }
 0x1b4   : > { %787 = vrot.lane.b32.xlu1 %v4050_v29, %s2270_s22  ;;  %2111 = vmatprep.mubr.msk.f32.mxu0 %vm1501_vm10, %v1481_v42  ;;  %v1449_v0 = vsel %vm1435_vm8, %v1416_v15, %v1067_v55  ;;  %v2241_v55 = vld [vmem:[%s2314_s16 + $0x168] sm:$0xff]  ;;  %v2242_v15 = vld [vmem:[%s2314_s16 + $0x170] sm:$0xff] }
 0x1b5   : > { %687 = vrot.lane.b32.xlu0 %v2238_v49, %s2269_s19 }
 0x1b6   : > { %v869_v4 = vpop.permute.xlu1 %868 }
 0x1b7   : > { %v770_v54 = vpop.permute.xlu0 %769  ;;  %v1384_v28 = vsel %vm1369_vm6, %v1351_v27, %v869_v4 }
 0x1b8   : > { %1185 = vrot.lane.b32.xlu1 %v4051_v3, %s2274_s6  ;;  %v1352_v16 = vsel %vm1336_vm5, %v1319_v43, %v770_v54 }
 0x1b9   : > { %1086 = vrot.lane.b32.xlu0 %v4052_v41, %s2273_s5 }
 0x1ba   : > { %v871_v48 = vpop.permute.xlu1 %870 }
 0x1bb   : > { %v1168_v8 = vpop.permute.xlu0 %1167  ;;  %v1385_v62 = vsel %vm1369_vm6, %v1352_v16, %v871_v48 }
 0x1bc   : > { %v1482_v1 = vsel %vm1468_vm9, %v1449_v0, %v1168_v8  ;;  %888 = vrot.lane.b32.xlu1 %v4051_v3, %s2271_s27 }
 0x1bd   : > { %789 = vrot.lane.b32.xlu0 %v4052_v41, %s2270_s22  ;;  %2112 = vmatmul.mubr.msk.f32.gmra.mrb[12].mxu0 %vm1501_vm10, %v1482_v1 }
 0x1be   : > { %v670_v59 = vpop.permute.xlu1 %669 }
 0x1bf   : > { %v967_v56 = vpop.permute.xlu0 %966  ;;  %v1320_v4 = vsel %vm1303_vm4, %v3138_v6, %v670_v59 }
 0x1c0   : > { %890 = vrot.lane.b32.xlu1 %v4053_v30, %s2271_s27  ;;  %v1417_v40 = vsel %vm1402_vm7, %v1384_v28, %v967_v56 }
 0x1c1   : > { %1187 = vrot.lane.b32.xlu0 %v4053_v30, %s2274_s6 }
 0x1c2   : > { %v1069_v22 = vpop.permute.xlu1 %1068 }
 0x1c3   : > { %v969_v60 = vpop.permute.xlu0 %968  ;;  %v1450_v47 = vsel %vm1435_vm8, %v1417_v40, %v1069_v22  ;;  %v4059_v22 = vld [vmem:[#allocation52_spill] sm:$0xff]  ;;  %v228_v40 = vld [vmem:[%s2314_s16 + $0x188] sm:$0xff] }
 0x1c4   : > { %689 = vrot.lane.b32.xlu1 %v2239_v63, %s2269_s19  ;;  %v1418_v25 = vsel %vm1402_vm7, %v1385_v62, %v969_v60 }
 0x1c5   : > { %986 = vrot.lane.b32.xlu0 %v2239_v63, %s2272_s4  ;;  %v4060_v63 = vld [vmem:[#allocation25_spill] sm:$0xff] }
 0x1c6   : > { %v772_v18 = vpop.permute.xlu1 %771 }
 0x1c7   : > { %v672_v13 = vpop.permute.xlu0 %671  ;;  %v1353_v54 = vsel %vm1336_vm5, %v1320_v4, %v772_v18 }
 0x1c8   : > { %1088 = vrot.lane.b32.xlu1 %v4054_v39, %s2273_s5  ;;  %v1321_v59 = vsel %vm1303_vm4, %v3135_v23, %v672_v13 }
 0x1c9   : > { %988 = vrot.lane.b32.xlu0 %v2240_v19, %s2272_s4 }
 0x1ca   : > { %v1170_v14 = vpop.permute.xlu1 %1169 }
 0x1cb   : > { %v1483_v38 = vsel %vm1468_vm9, %v1450_v47, %v1170_v14  ;;  %v1071_v36 = vpop.permute.xlu0 %1070  ;;  %v4061_v47 = vld [vmem:[#allocation50_spill] sm:$0xff] }
 0x1cc   : > { %791 = vrot.lane.b32.xlu1 %v4054_v39, %s2270_s22  ;;  %2114 = vmatprep.mubr.msk.f32.mxu0 %vm1501_vm10, %v1483_v38  ;;  %v1451_v29 = vsel %vm1435_vm8, %v1418_v25, %v1071_v36  ;;  %v227_v39 = vld [vmem:[%s2314_s16 + $0x180] sm:$0xff]  ;;  %v735_v38 = vrot.slane %v228_v40, 1 }
 0x1cd   : > { %691 = vrot.lane.b32.xlu0 %v2240_v19, %s2269_s19  ;;  %v734_v14 = vrot.slane %v227_v39, 1 }
 0x1ce   : > { %v873_v53 = vpop.permute.xlu1 %872 }
 0x1cf   : > { %v774_v37 = vpop.permute.xlu0 %773  ;;  %v1386_v3 = vsel %vm1369_vm6, %v1353_v54, %v873_v53  ;;  %v736_v43 = vsel %vm281_vm0, %v734_v14, %v735_v38 }
 0x1d0   : > { %1189 = vrot.lane.b32.xlu1 %v4055_v17, %s2274_s6  ;;  %v1354_v30 = vsel %vm1336_vm5, %v1321_v59, %v774_v37 }
 0x1d1   : > { %1090 = vrot.lane.b32.xlu0 %v4056_v24, %s2273_s5 }
 0x1d2   : > { %v875_v34 = vpop.permute.xlu1 %874 }
 0x1d3   : > { %v1172_v46 = vpop.permute.xlu0 %1171  ;;  %v1387_v60 = vsel %vm1369_vm6, %v1354_v30, %v875_v34 }
 0x1d4   : > { %v1484_v33 = vsel %vm1468_vm9, %v1451_v29, %v1172_v46  ;;  %892 = vrot.lane.b32.xlu1 %v4055_v17, %s2271_s27  ;;  %v835_v29 = vrot.slane %v227_v39, 2  ;;  %v836_v46 = vrot.slane %v228_v40, 2 }
 0x1d5   : > { %793 = vrot.lane.b32.xlu0 %v4056_v24, %s2270_s22  ;;  %2115 = vmatmul.mubr.msk.f32.gmra.mrb[14].mxu0 %vm1501_vm10, %v1484_v33  ;;  %v229_v24 = vld [vmem:[%s2314_s16 + $0x190] sm:$0x3] }
 0x1d6   : > { %v674_v52 = vpop.permute.xlu1 %673 }
 0x1d7   : > { %v971_v49 = vpop.permute.xlu0 %970  ;;  %v1322_v37 = vsel %vm1303_vm4, %v3154_v45, %v674_v52  ;;  %v737_v45 = vrot.slane %v229_v24, 1 }
 0x1d8   : > { %894 = vrot.lane.b32.xlu1 %v4057_v31, %s2271_s27  ;;  %v1419_v41 = vsel %vm1402_vm7, %v1386_v3, %v971_v49 }
 0x1d9   : > { %1191 = vrot.lane.b32.xlu0 %v4057_v31, %s2274_s6 }
 0x1da   : > { %v1073_v26 = vpop.permute.xlu1 %1072 }
 0x1db   : > { %v973_v42 = vpop.permute.xlu0 %972  ;;  %v1452_v48 = vsel %vm1435_vm8, %v1419_v41, %v1073_v26  ;;  %v837_v26 = vsel %vm458_vm1, %v835_v29, %v836_v46 }
 0x1dc   : > { %693 = vrot.lane.b32.xlu1 %v2241_v55, %s2269_s19  ;;  %v1420_v57 = vsel %vm1402_vm7, %v1387_v60, %v973_v42 }
 0x1dd   : > { %990 = vrot.lane.b32.xlu0 %v2241_v55, %s2272_s4  ;;  %v738_v55 = vsel %vm281_vm0, %v735_v38, %v737_v45 }
 0x1de   : > { %v776_v50 = vpop.permute.xlu1 %775 }
 0x1df   : > { %v3653_v35 = vpop.permute.xlu0 %675  ;;  %v1355_v17 = vsel %vm1336_vm5, %v1322_v37, %v776_v50 }
 0x1e0   : > { %1092 = vrot.lane.b32.xlu1 %v4058_v51, %s2273_s5  ;;  %v1323_v4 = vsel %vm1303_vm4, %v3151_v10, %v3653_v35 }
 0x1e1   : > { %992 = vrot.lane.b32.xlu0 %v2242_v15, %s2272_s4 }
 0x1e2   : > { %v1174_v0 = vpop.permute.xlu1 %1173 }
 0x1e3   : > { %v1075_v8 = vpop.permute.xlu0 %1074  ;;  %v1485_v6 = vsel %vm1468_vm9, %v1452_v48, %v1174_v0 }
 0x1e4   : > { %795 = vrot.lane.b32.xlu1 %v4058_v51, %s2270_s22  ;;  %2117 = vmatprep.mubr.msk.f32.mxu1 %vm1501_vm10, %v1485_v6  ;;  %v1453_v27 = vsel %vm1435_vm8, %v1420_v57, %v1075_v8  ;;  %v838_v51 = vrot.slane %v229_v24, 2  ;;  %v231_v6 = vld [vmem:[%s2314_s16 + $0x1a0] sm:$0xff] }
 0x1e5   : > { %695 = vrot.lane.b32.xlu0 %v2242_v15, %s2269_s19  ;;  %v1036_v30 = vrot.slane %v231_v6, 1 }
 0x1e6   : > { %v877_v1 = vpop.permute.xlu1 %876  ;;  %v839_v35 = vsel %vm458_vm1, %v836_v46, %v838_v51 }
 0x1e7   : > { %v778_v56 = vpop.permute.xlu0 %777  ;;  %v1388_v25 = vsel %vm1369_vm6, %v1355_v17, %v877_v1  ;;  %v232_v1 = vld [vmem:[%s2314_s16 + $0x1a8] sm:$0x3] }
 0x1e8   : > { %1193 = vrot.lane.b32.xlu1 %v4059_v22, %s2274_s6  ;;  %v1356_v54 = vsel %vm1336_vm5, %v1323_v4, %v778_v56  ;;  %v230_v56 = vld [vmem:[%s2314_s16 + $0x198] sm:$0xff]  ;;  %s1978_s16 = sshll.u32 %s4067_s9, 1 }
 0x1e9   : > { %1094 = vrot.lane.b32.xlu0 %v4060_v63, %s2273_s5  ;;  %s178_s8 = scalar_lea.vmem %s3853_s2, %s1978_s16 }
 0x1ea   : > { %v879_v18 = vpop.permute.xlu1 %878 }
 0x1eb   : > { %v1176_v28 = vpop.permute.xlu0 %1175  ;;  %v1389_v3 = vsel %vm1369_vm6, %v1356_v54, %v879_v18  ;;  %v1137_v18 = vrot.slane %v231_v6, 2 }
 0x1ec   : > { %v1486_v23 = vsel %vm1468_vm9, %v1453_v27, %v1176_v28  ;;  %896 = vrot.lane.b32.xlu1 %v4059_v22, %s2271_s27  ;;  %v1038_v22 = vrot.slane %v232_v1, 1  ;;  %v1139_v28 = vrot.slane %v232_v1, 2 }
 0x1ed   : > { %797 = vrot.lane.b32.xlu0 %v4060_v63, %s2270_s22  ;;  %2118 = vmatmul.mubr.msk.f32.vlgmr.msra.gmra.mrb[0].mxu1 %vm1501_vm10, %v1486_v23  ;;  %v1035_v63 = vrot.slane %v230_v56, 1 }
 0x1ee   : > { %v3683_v13 = vpop.permute.xlu1 %677  ;;  %v1039_v27 = vsel %vm281_vm0, %v1036_v30, %v1038_v22 }
 0x1ef   : > { %v975_v19 = vpop.permute.xlu0 %974  ;;  %v1324_v23 = vsel %vm1303_vm4, %v3170_v32, %v3683_v13 }
 0x1f0   : > { %898 = vrot.lane.b32.xlu1 %v4061_v47, %s2271_s27  ;;  %v1421_v34 = vsel %vm1402_vm7, %v1388_v25, %v975_v19  ;;  %v1037_v19 = vsel %vm281_vm0, %v1035_v63, %v1036_v30 }
 0x1f1   : > { %1195 = vrot.lane.b32.xlu0 %v4061_v47, %s2274_s6 }
 0x1f2   : > { %v1077_v36 = vpop.permute.xlu1 %1076 }
 0x1f3   : > { %v977_v53 = vpop.permute.xlu0 %976  ;;  %v1454_v33 = vsel %vm1435_vm8, %v1421_v34, %v1077_v36 }
 0x1f4   : > { %697 = vrot.lane.b32.xlu1 %v227_v39, %s2269_s19  ;;  %v1422_v41 = vsel %vm1402_vm7, %v1389_v3, %v977_v53  ;;  %v1140_v53 = vsel %vm458_vm1, %v1137_v18, %v1139_v28 }
 0x1f5   : > { %994 = vrot.lane.b32.xlu0 %v227_v39, %s2272_s4  ;;  %v1136_v39 = vrot.slane %v230_v56, 2 }
 0x1f6   : > { %v780_v16 = vpop.permute.xlu1 %779 }
 0x1f7   : > { %v3697_v62 = vpop.permute.xlu0 %679  ;;  %v1357_v47 = vsel %vm1336_vm5, %v1324_v23, %v780_v16  ;;  %v1138_v13 = vsel %vm458_vm1, %v1136_v39, %v1137_v18 }
 0x1f8   : > { %1096 = vrot.lane.b32.xlu1 %v736_v43, %s2273_s5 }
 0x1f9   : > { %996 = vrot.lane.b32.xlu0 %v228_v40, %s2272_s4 }
 0x1fa   : > { %v1178_v49 = vpop.permute.xlu1 %1177 }
 0x1fb   : > { %v1487_v52 = vsel %vm1468_vm9, %v1454_v33, %v1178_v49  ;;  %v1079_v31 = vpop.permute.xlu0 %1078  ;;  %v1325_v33 = vsel %vm1303_vm4, %v3167_v58, %v3697_v62 }
 0x1fc   : > { %799 = vrot.lane.b32.xlu1 %v736_v43, %s2270_s22  ;;  %2120 = vmatprep.mubr.msk.f32.mxu1 %vm1501_vm10, %v1487_v52  ;;  %v1455_v48 = vsel %vm1435_vm8, %v1422_v41, %v1079_v31 }
 0x1fd   : > { %699 = vrot.lane.b32.xlu0 %v228_v40, %s2269_s19 }
 0x1fe   : > { %v881_v42 = vpop.permute.xlu1 %880 }
 0x1ff   : > { %v782_v50 = vpop.permute.xlu0 %781  ;;  %v1390_v38 = vsel %vm1369_vm6, %v1357_v47, %v881_v42 }
 0x200   : > { %1197 = vrot.lane.b32.xlu1 %v837_v26, %s2274_s6  ;;  %v1358_v45 = vsel %vm1336_vm5, %v1325_v33, %v782_v50 }
 0x201   : > { %1098 = vrot.lane.b32.xlu0 %v738_v55, %s2273_s5 }
 0x202   : > { %v883_v15 = vpop.permute.xlu1 %882 }
 0x203   : > { %v1180_v0 = vpop.permute.xlu0 %1179  ;;  %v1391_v31 = vsel %vm1369_vm6, %v1358_v45, %v883_v15 }
 0x204   : > { %v1488_v10 = vsel %vm1468_vm9, %v1455_v48, %v1180_v0  ;;  %900 = vrot.lane.b32.xlu1 %v837_v26, %s2271_s27 }
 0x205   : > { %801 = vrot.lane.b32.xlu0 %v738_v55, %s2270_s22  ;;  %2121 = vmatmul.mubr.msk.f32.gmra.mrb[2].mxu1 %vm1501_vm10, %v1488_v10 }
 0x206   : > { %v682_v8 = vpop.permute.xlu1 %681 }
 0x207   : > { %v979_v59 = vpop.permute.xlu0 %978  ;;  %v1326_v62 = vsel %vm1303_vm4, %v3186_v21, %v682_v8 }
 0x208   : > { %902 = vrot.lane.b32.xlu1 %v839_v35, %s2271_s27  ;;  %v1423_v36 = vsel %vm1402_vm7, %v1390_v38, %v979_v59 }
 0x209   : > { %1199 = vrot.lane.b32.xlu0 %v839_v35, %s2274_s6 }
 0x20a   : > { %v1081_v60 = vpop.permute.xlu1 %1080 }
 0x20b   : > { %v981_v57 = vpop.permute.xlu0 %980  ;;  %v1456_v43 = vsel %vm1435_vm8, %v1423_v36, %v1081_v60 }
 0x20c   : > { %1000 = vrot.lane.b32.xlu1 %v231_v6, %s2272_s4  ;;  %v1424_v26 = vsel %vm1402_vm7, %v1391_v31, %v981_v57 }
 0x20d   : > { %998 = vrot.lane.b32.xlu0 %v230_v56, %s2272_s4 }
 0x20e   : > { %v784_v40 = vpop.permute.xlu1 %783 }
 0x20f   : > { %v684_v14 = vpop.permute.xlu0 %683  ;;  %v1359_v15 = vsel %vm1336_vm5, %v1326_v62, %v784_v40 }
 0x210   : > { %1102 = vrot.lane.b32.xlu1 %v1039_v27, %s2273_s5  ;;  %v1327_v27 = vsel %vm1303_vm4, %v3183_v44, %v684_v14 }
 0x211   : > { %1100 = vrot.lane.b32.xlu0 %v1037_v19, %s2273_s5 }
 0x212   : > { %v1182_v32 = vpop.permute.xlu1 %1181 }
 0x213   : > { %v1489_v37 = vsel %vm1468_vm9, %v1456_v43, %v1182_v32  ;;  %v1083_v17 = vpop.permute.xlu0 %1082 }
 0x214   : > { %v2095_v16 = vpop.f32.mrb[0].mxu0  ;;  %1203 = vrot.lane.b32.xlu1 %v1140_v53, %s2274_s6  ;;  %2123 = vmatprep.mubr.msk.f32.mxu1 %vm1501_vm10, %v1489_v37  ;;  %v1457_v55 = vsel %vm1435_vm8, %v1424_v26, %v1083_v17 }
 0x215   : > { %v1813_v24 = vmul.f32 %v2095_v16, %v2095_v16  ;;  %v1616_v25 = vpop.f32.mrb[1].mxu0  ;;  %1201 = vrot.lane.b32.xlu0 %v1138_v13, %s2274_s6 }
 0x216   : > { %v1775_v34 = vadd.f32 %v2095_v16, %v1616_v25  ;;  %v1812_v29 = vmul.f32 %v1616_v25, %v1616_v25  ;;  %v885_v46 = vpop.permute.xlu1 %884 }
 0x217   : > { %v786_v49 = vpop.permute.xlu0 %785  ;;  %v1392_v0 = vsel %vm1369_vm6, %v1359_v15, %v885_v46 }
 0x218   : > { %v1844_v52 = vadd.f32 %v1813_v24, %v1812_v29  ;;  %v1360_v23 = vsel %vm1336_vm5, %v1327_v27, %v786_v49 }
 0x21a   : > { %v887_v42 = vpop.permute.xlu1 %886 }
 0x21b   : > { %v1184_v4 = vpop.permute.xlu0 %1183  ;;  %v1393_v39 = vsel %vm1369_vm6, %v1360_v23, %v887_v42 }
 0x21c   : > { %v1490_v54 = vsel %vm1468_vm9, %v1457_v55, %v1184_v4 }
 0x21d   : > { %2124 = vmatmul.mubr.msk.f32.gmra.mrb[4].mxu1 %vm1501_vm10, %v1490_v54 }
 0x21e   : > { %v686_v3 = vpop.permute.xlu1 %685 }
 0x21f   : > { %v983_v51 = vpop.permute.xlu0 %982  ;;  %v1328_v37 = vsel %vm1303_vm4, %v3202_v61, %v686_v3 }
 0x220   : > { %v1425_v35 = vsel %vm1402_vm7, %v1392_v0, %v983_v51 }
 0x222   : > { %v1085_v41 = vpop.permute.xlu1 %1084 }
 0x223   : > { %v985_v58 = vpop.permute.xlu0 %984  ;;  %v1458_v1 = vsel %vm1435_vm8, %v1425_v35, %v1085_v41 }
 0x224   : > { %v1426_v40 = vsel %vm1402_vm7, %v1393_v39, %v985_v58 }
 0x226   : > { %v788_v50 = vpop.permute.xlu1 %787 }
 0x227   : > { %v688_v48 = vpop.permute.xlu0 %687  ;;  %v1361_v25 = vsel %vm1336_vm5, %v1328_v37, %v788_v50 }
 0x228   : > { %v2098_v10 = vpop.f32.mrb[2].mxu0  ;;  %v1329_v4 = vsel %vm1303_vm4, %v3199_v7, %v688_v48 }
 0x229   : > { %v1626_v6 = vpop.f32.mrb[3].mxu0  ;;  %v1815_v63 = vmul.f32 %v2098_v10, %v2098_v10 }
 0x22a   : > { %v1776_v59 = vadd.f32 %v1775_v34, %v1626_v6  ;;  %v1814_v56 = vmul.f32 %v1626_v6, %v1626_v6  ;;  %v1186_v30 = vpop.permute.xlu1 %1185 }
 0x22b   : > { %v1491_v22 = vsel %vm1468_vm9, %v1458_v1, %v1186_v30  ;;  %v1087_v60 = vpop.permute.xlu0 %1086 }
 0x22c   : > { %v1845_v21 = vadd.f32 %v1844_v52, %v1814_v56  ;;  %2126 = vmatprep.mubr.msk.f32.mxu1 %vm1501_vm10, %v1491_v22  ;;  %v1777_v8 = vadd.f32 %v2098_v10, %v1776_v59  ;;  %v1459_v47 = vsel %vm1435_vm8, %v1426_v40, %v1087_v60 }
 0x22e   : > { %v889_v57 = vpop.permute.xlu1 %888  ;;  %v1846_v18 = vadd.f32 %v1845_v21, %v1815_v63 }
 0x22f   : > { %v790_v28 = vpop.permute.xlu0 %789  ;;  %v1394_v29 = vsel %vm1369_vm6, %v1361_v25, %v889_v57 }
 0x230   : > { %v1362_v3 = vsel %vm1336_vm5, %v1329_v4, %v790_v28 }
 0x232   : > { %v891_v19 = vpop.permute.xlu1 %890 }
 0x233   : > { %v1188_v38 = vpop.permute.xlu0 %1187  ;;  %v1395_v51 = vsel %vm1369_vm6, %v1362_v3, %v891_v19 }
 0x234   : > { %v1492_v36 = vsel %vm1468_vm9, %v1459_v47, %v1188_v38 }
 0x235   : > { %2127 = vmatmul.mubr.msk.f32.gmra.mrb[6].mxu1 %vm1501_vm10, %v1492_v36 }
 0x236   : > { %v690_v53 = vpop.permute.xlu1 %689 }
 0x237   : > { %v987_v43 = vpop.permute.xlu0 %986  ;;  %v1330_v60 = vsel %vm1303_vm4, %v3218_v9, %v690_v53 }
 0x238   : > { %v1427_v45 = vsel %vm1402_vm7, %v1394_v29, %v987_v43 }
 0x23a   : > { %v1089_v32 = vpop.permute.xlu1 %1088 }
 0x23b   : > { %v989_v13 = vpop.permute.xlu0 %988  ;;  %v1460_v52 = vsel %vm1435_vm8, %v1427_v45, %v1089_v32 }
 0x23c   : > { %v2101_v44 = vpop.f32.mrb[4].mxu0  ;;  %v1428_v41 = vsel %vm1402_vm7, %v1395_v51, %v989_v13 }
 0x23d   : > { %v1636_v14 = vpop.f32.mrb[5].mxu0  ;;  %v1817_v46 = vmul.f32 %v2101_v44, %v2101_v44 }
 0x23e   : > { %v1778_v17 = vadd.f32 %v1777_v8, %v1636_v14  ;;  %v1816_v16 = vmul.f32 %v1636_v14, %v1636_v14  ;;  %v792_v24 = vpop.permute.xlu1 %791 }
 0x23f   : > { %v692_v34 = vpop.permute.xlu0 %691  ;;  %v1363_v8 = vsel %vm1336_vm5, %v1330_v60, %v792_v24 }
 0x240   : > { %v1847_v33 = vadd.f32 %v1846_v18, %v1816_v16  ;;  %v1779_v49 = vadd.f32 %v2101_v44, %v1778_v17  ;;  %v1331_v9 = vsel %vm1303_vm4, %v3215_v12, %v692_v34 }
 0x242   : > { %v1190_v31 = vpop.permute.xlu1 %1189  ;;  %v1848_v26 = vadd.f32 %v1847_v33, %v1817_v46 }
 0x243   : > { %v1493_v42 = vsel %vm1468_vm9, %v1460_v52, %v1190_v31  ;;  %v1091_v61 = vpop.permute.xlu0 %1090 }
 0x244   : > { %2129 = vmatprep.mubr.msk.f32.mxu1 %vm1501_vm10, %v1493_v42  ;;  %v1461_v62 = vsel %vm1435_vm8, %v1428_v41, %v1091_v61 }
 0x246   : > { %v893_v55 = vpop.permute.xlu1 %892 }
 0x247   : > { %v794_v54 = vpop.permute.xlu0 %793  ;;  %v1396_v18 = vsel %vm1369_vm6, %v1363_v8, %v893_v55 }
 0x248   : > { %v1364_v38 = vsel %vm1336_vm5, %v1331_v9, %v794_v54 }
 0x24a   : > { %v895_v58 = vpop.permute.xlu1 %894 }
 0x24b   : > { %v1192_v50 = vpop.permute.xlu0 %1191  ;;  %v1397_v36 = vsel %vm1369_vm6, %v1364_v38, %v895_v58 }
 0x24c   : > { %v1494_v15 = vsel %vm1468_vm9, %v1461_v62, %v1192_v50 }
 0x24d   : > { %2130 = vmatmul.mubr.msk.f32.gmra.mrb[8].mxu1 %vm1501_vm10, %v1494_v15 }
 0x24e   : > { %v694_v0 = vpop.permute.xlu1 %693 }
 0x24f   : > { %v991_v10 = vpop.permute.xlu0 %990  ;;  %v1332_v45 = vsel %vm1303_vm4, %v3234_v5, %v694_v0 }
 0x250   : > { %v2104_v35 = vpop.f32.mrb[6].mxu0  ;;  %v1429_v27 = vsel %vm1402_vm7, %v1396_v18, %v991_v10 }
 0x251   : > { %v1646_v6 = vpop.f32.mrb[7].mxu0  ;;  %v1819_v56 = vmul.f32 %v2104_v35, %v2104_v35 }
 0x252   : > { %v1780_v7 = vadd.f32 %v1779_v49, %v1646_v6  ;;  %v1818_v48 = vmul.f32 %v1646_v6, %v1646_v6  ;;  %v1093_v1 = vpop.permute.xlu1 %1092 }
 0x253   : > { %v993_v59 = vpop.permute.xlu0 %992  ;;  %v1462_v28 = vsel %vm1435_vm8, %v1429_v27, %v1093_v1 }
 0x254   : > { %v1849_v30 = vadd.f32 %v1848_v26, %v1818_v48  ;;  %v1781_v22 = vadd.f32 %v2104_v35, %v1780_v7  ;;  %v1430_v53 = vsel %vm1402_vm7, %v1397_v36, %v993_v59 }
 0x256   : > { %v796_v63 = vpop.permute.xlu1 %795  ;;  %v1850_v21 = vadd.f32 %v1849_v30, %v1819_v56 }
 0x257   : > { %v696_v57 = vpop.permute.xlu0 %695  ;;  %v1365_v31 = vsel %vm1336_vm5, %v1332_v45, %v796_v63 }
 0x258   : > { %v1333_v5 = vsel %vm1303_vm4, %v3231_v2, %v696_v57 }
 0x25a   : > { %v1194_v23 = vpop.permute.xlu1 %1193 }
 0x25b   : > { %v1495_v39 = vsel %vm1468_vm9, %v1462_v28, %v1194_v23  ;;  %v1095_v40 = vpop.permute.xlu0 %1094 }
 0x25c   : > { %2132 = vmatprep.mubr.msk.f32.mxu1 %vm1501_vm10, %v1495_v39  ;;  %v1463_v32 = vsel %vm1435_vm8, %v1430_v53, %v1095_v40 }
 0x25e   : > { %v897_v19 = vpop.permute.xlu1 %896 }
 0x25f   : > { %v798_v47 = vpop.permute.xlu0 %797  ;;  %v1398_v42 = vsel %vm1369_vm6, %v1365_v31, %v897_v19 }
 0x260   : > { %v1366_v58 = vsel %vm1336_vm5, %v1333_v5, %v798_v47 }
 0x262   : > { %v899_v43 = vpop.permute.xlu1 %898 }
 0x263   : > { %v1196_v13 = vpop.permute.xlu0 %1195  ;;  %v1399_v50 = vsel %vm1369_vm6, %v1366_v58, %v899_v43 }
 0x264   : > { %v1496_v44 = vsel %vm1468_vm9, %v1463_v32, %v1196_v13  ;;  %v2107_v14 = vpop.f32.mrb[8].mxu0 }
 0x265   : > { %v1656_v37 = vpop.f32.mrb[9].mxu0  ;;  %2133 = vmatmul.mubr.msk.f32.gmra.mrb[10].mxu1 %vm1501_vm10, %v1496_v44  ;;  %v1821_v25 = vmul.f32 %v2107_v14, %v2107_v14 }
 0x266   : > { %v1782_v17 = vadd.f32 %v1781_v22, %v1656_v37  ;;  %v1820_v16 = vmul.f32 %v1656_v37, %v1656_v37  ;;  %v698_v12 = vpop.permute.xlu1 %697 }
 0x267   : > { %v995_v24 = vpop.permute.xlu0 %994  ;;  %v1334_v8 = vsel %vm1303_vm4, %v3250_v20, %v698_v12 }
 0x268   : > { %v1851_v34 = vadd.f32 %v1850_v21, %v1820_v16  ;;  %v1783_v29 = vadd.f32 %v2107_v14, %v1782_v17  ;;  %v1431_v61 = vsel %vm1402_vm7, %v1398_v42, %v995_v24 }
 0x26a   : > { %v1097_v46 = vpop.permute.xlu1 %1096  ;;  %v1852_v33 = vadd.f32 %v1851_v34, %v1821_v25 }
 0x26b   : > { %v997_v49 = vpop.permute.xlu0 %996  ;;  %v1464_v55 = vsel %vm1435_vm8, %v1431_v61, %v1097_v46 }
 0x26c   : > { %v1432_v0 = vsel %vm1402_vm7, %v1399_v50, %v997_v49 }
 0x26e   : > { %v800_v52 = vpop.permute.xlu1 %799 }
 0x26f   : > { %v700_v26 = vpop.permute.xlu0 %699  ;;  %v1367_v27 = vsel %vm1336_vm5, %v1334_v8, %v800_v52 }
 0x270   : > { %v1335_v63 = vsel %vm1303_vm4, %v3247_v11, %v700_v26 }
 0x272   : > { %v1198_v4 = vpop.permute.xlu1 %1197 }
 0x273   : > { %v1497_v54 = vsel %vm1468_vm9, %v1464_v55, %v1198_v4  ;;  %v1099_v3 = vpop.permute.xlu0 %1098 }
 0x274   : > { %2135 = vmatprep.mubr.msk.f32.mxu1 %vm1501_vm10, %v1497_v54  ;;  %v1465_v7 = vsel %vm1435_vm8, %v1432_v0, %v1099_v3 }
 0x276   : > { %v901_v51 = vpop.permute.xlu1 %900 }
 0x277   : > { %v802_v41 = vpop.permute.xlu0 %801  ;;  %v1400_v23 = vsel %vm1369_vm6, %v1367_v27, %v901_v51 }
 0x278   : > { %v2110_v62 = vpop.f32.mrb[10].mxu0  ;;  %v1368_v57 = vsel %vm1336_vm5, %v1335_v63, %v802_v41 }
 0x279   : > { %v1666_v15 = vpop.f32.mrb[11].mxu0  ;;  %v1823_v1 = vmul.f32 %v2110_v62, %v2110_v62 }
 0x27a   : > { %v1784_v10 = vadd.f32 %v1783_v29, %v1666_v15  ;;  %v1822_v35 = vmul.f32 %v1666_v15, %v1666_v15  ;;  %v903_v6 = vpop.permute.xlu1 %902 }
 0x27b   : > { %v1200_v48 = vpop.permute.xlu0 %1199  ;;  %v1401_v28 = vsel %vm1369_vm6, %v1368_v57, %v903_v6 }
 0x27c   : > { %v1853_v59 = vadd.f32 %v1852_v33, %v1822_v35  ;;  %v1498_v56 = vsel %vm1468_vm9, %v1465_v7, %v1200_v48  ;;  %v1785_v2 = vadd.f32 %v2110_v62, %v1784_v10 }
 0x27d   : > { %2136 = vmatmul.mubr.msk.f32.gmra.mrb[12].mxu1 %vm1501_vm10, %v1498_v56 }
 0x27e   : > { %v1001_v30 = vpop.permute.xlu1 %1000  ;;  %v1854_v22 = vadd.f32 %v1853_v59, %v1823_v1 }
 0x27f   : > { %v999_v60 = vpop.permute.xlu0 %998  ;;  %v1434_v39 = vsel %vm1402_vm7, %v1401_v28, %v1001_v30 }
 0x280   : > { %v1433_v40 = vsel %vm1402_vm7, %v1400_v23, %v999_v60 }
 0x282   : > { %v1103_v21 = vpop.permute.xlu1 %1102 }
 0x283   : > { %v1101_v18 = vpop.permute.xlu0 %1100  ;;  %v1467_v19 = vsel %vm1435_vm8, %v1434_v39, %v1103_v21 }
 0x284   : > { %v1466_v9 = vsel %vm1435_vm8, %v1433_v40, %v1101_v18 }
 0x286   : > { %v1204_v11 = vpop.permute.xlu1 %1203 }
 0x287   : > { %v1500_v20 = vsel %vm1468_vm9, %v1467_v19, %v1204_v11  ;;  %v1202_v47 = vpop.permute.xlu0 %1201 }
 0x288   : > { %v1499_v38 = vsel %vm1468_vm9, %v1466_v9, %v1202_v47 }
 0x289   : > { %2138 = vmatprep.mubr.msk.f32.mxu1 %vm1501_vm10, %v1499_v38 }
 0x28a   : > { %2139 = vmatmul.mubr.msk.f32.gmra.mrb[14].mxu1 %vm1501_vm10, %v1500_v20 }
 0x290   : > { %v2113_v36 = vpop.f32.mrb[12].mxu0 }
 0x291   : > { %v1676_v53 = vpop.f32.mrb[13].mxu0  ;;  %v1825_v13 = vmul.f32 %v2113_v36, %v2113_v36 }
 0x292   : > { %v1786_v43 = vadd.f32 %v1785_v2, %v1676_v53  ;;  %v1824_v32 = vmul.f32 %v1676_v53, %v1676_v53 }
 0x294   : > { %v1855_v44 = vadd.f32 %v1854_v22, %v1824_v32  ;;  %v1787_v14 = vadd.f32 %v2113_v36, %v1786_v43 }
 0x296   : > { %v1856_v37 = vadd.f32 %v1855_v44, %v1825_v13 }
 0x2a8   : > { %v2116_v17 = vpop.f32.mrb[14].mxu0 }
 0x2a9   : > { %v1686_v16 = vpop.f32.mrb[15].mxu0  ;;  %v1827_v25 = vmul.f32 %v2116_v17, %v2116_v17 }
 0x2aa   : > { %v1788_v12 = vadd.f32 %v1787_v14, %v1686_v16  ;;  %v1826_v24 = vmul.f32 %v1686_v16, %v1686_v16 }
 0x2ac   : > { %v1789_v34 = vadd.f32 %v2116_v17, %v1788_v12  ;;  %v1857_v29 = vadd.f32 %v1856_v37, %v1826_v24 }
 0x2ae   : > { %v1858_v46 = vadd.f32 %v1857_v29, %v1827_v25 }
 0x2c0   : > { %v2119_v33 = vpop.f32.mrb[0].mxu1 }
 0x2c1   : > { %v1696_v49 = vpop.f32.mrb[1].mxu1  ;;  %v1829_v31 = vmul.f32 %v2119_v33, %v2119_v33 }
 0x2c2   : > { %v1790_v45 = vadd.f32 %v1789_v34, %v1696_v49  ;;  %v1828_v52 = vmul.f32 %v1696_v49, %v1696_v49 }
 0x2c4   : > { %v1859_v26 = vadd.f32 %v1858_v46, %v1828_v52  ;;  %v1791_v42 = vadd.f32 %v2119_v33, %v1790_v45 }
 0x2c6   : > { %v1860_v61 = vadd.f32 %v1859_v26, %v1829_v31 }
 0x2d8   : > { %v2122_v55 = vpop.f32.mrb[2].mxu1 }
 0x2d9   : > { %v1706_v4 = vpop.f32.mrb[3].mxu1  ;;  %v1831_v51 = vmul.f32 %v2122_v55, %v2122_v55 }
 0x2da   : > { %v1792_v54 = vadd.f32 %v1791_v42, %v1706_v4  ;;  %v1830_v3 = vmul.f32 %v1706_v4, %v1706_v4 }
 0x2dc   : > { %v1861_v5 = vadd.f32 %v1860_v61, %v1830_v3  ;;  %v1793_v41 = vadd.f32 %v2122_v55, %v1792_v54 }
 0x2de   : > { %v1862_v58 = vadd.f32 %v1861_v5, %v1831_v51 }
 0x2f0   : > { %v2125_v62 = vpop.f32.mrb[4].mxu1 }
 0x2f1   : > { %v1716_v50 = vpop.f32.mrb[5].mxu1  ;;  %v1833_v10 = vmul.f32 %v2125_v62, %v2125_v62 }
 0x2f2   : > { %v1794_v15 = vadd.f32 %v1793_v41, %v1716_v50  ;;  %v1832_v0 = vmul.f32 %v1716_v50, %v1716_v50 }
 0x2f4   : > { %v1863_v35 = vadd.f32 %v1862_v58, %v1832_v0  ;;  %v1795_v6 = vadd.f32 %v2125_v62, %v1794_v15 }
 0x2f6   : > { %v1864_v7 = vadd.f32 %v1863_v35, %v1833_v10 }
 0x308   : > { %v2128_v48 = vpop.f32.mrb[6].mxu1 }
 0x309   : > { %v1726_v1 = vpop.f32.mrb[7].mxu1  ;;  %v1835_v2 = vmul.f32 %v2128_v48, %v2128_v48 }
 0x30a   : > { %v1796_v59 = vadd.f32 %v1795_v6, %v1726_v1  ;;  %v1834_v56 = vmul.f32 %v1726_v1, %v1726_v1 }
 0x30c   : > { %v1865_v30 = vadd.f32 %v1864_v7, %v1834_v56  ;;  %v1797_v22 = vadd.f32 %v2128_v48, %v1796_v59 }
 0x30e   : > { %v1866_v60 = vadd.f32 %v1865_v30, %v1835_v2 }
 0x320   : > { %v2131_v63 = vpop.f32.mrb[8].mxu1 }
 0x321   : > { %v1736_v21 = vpop.f32.mrb[9].mxu1  ;;  %v1837_v18 = vmul.f32 %v2131_v63, %v2131_v63 }
 0x322   : > { %v1798_v8 = vadd.f32 %v1797_v22, %v1736_v21  ;;  %v1836_v57 = vmul.f32 %v1736_v21, %v1736_v21 }
 0x324   : > { %v1867_v27 = vadd.f32 %v1866_v60, %v1836_v57  ;;  %v1799_v28 = vadd.f32 %v2131_v63, %v1798_v8 }
 0x326   : > { %v1868_v23 = vadd.f32 %v1867_v27, %v1837_v18 }
 0x338   : > { %v2134_v39 = vpop.f32.mrb[10].mxu1 }
 0x339   : > { %v1746_v40 = vpop.f32.mrb[11].mxu1  ;;  %v1839_v9 = vmul.f32 %v2134_v39, %v2134_v39 }
 0x33a   : > { %v1800_v19 = vadd.f32 %v1799_v28, %v1746_v40  ;;  %v1838_v11 = vmul.f32 %v1746_v40, %v1746_v40 }
 0x33c   : > { %v1869_v20 = vadd.f32 %v1868_v23, %v1838_v11  ;;  %v1801_v47 = vadd.f32 %v2134_v39, %v1800_v19 }
 0x33e   : > { %v1870_v38 = vadd.f32 %v1869_v20, %v1839_v9 }
 0x350   : > { %v2137_v36 = vpop.f32.mrb[12].mxu1 }
 0x351   : > { %v1756_v53 = vpop.f32.mrb[13].mxu1  ;;  %v1841_v13 = vmul.f32 %v2137_v36, %v2137_v36 }
 0x352   : > { %v1802_v43 = vadd.f32 %v1801_v47, %v1756_v53  ;;  %v1840_v32 = vmul.f32 %v1756_v53, %v1756_v53 }
 0x354   : > { %v1871_v44 = vadd.f32 %v1870_v38, %v1840_v32  ;;  %v1803_v14 = vadd.f32 %v2137_v36, %v1802_v43 }
 0x356   : > { %v1872_v37 = vadd.f32 %v1871_v44, %v1841_v13 }
 0x35d   : > { %v2140_v17 = vpop.f32.mrb[14].mxu1 }
 0x35e   : > { %v1766_v16 = vpop.f32.mrb[15].mxu1  ;;  %v1843_v25 = vmul.f32 %v2140_v17, %v2140_v17 }
 0x35f   : > { %v1804_v12 = vadd.f32 %v1803_v14, %v1766_v16  ;;  %v1842_v24 = vmul.f32 %v1766_v16, %v1766_v16 }
 0x361   : > { %v1805_v34 = vadd.f32 %v2140_v17, %v1804_v12  ;;  %v1873_v29 = vadd.f32 %v1872_v37, %v1842_v24 }
 0x363   : > { %v1806_v46 = vrot.slane %v1805_v34, 4  ;;  %v1874_v33 = vadd.f32 %v1873_v29, %v1843_v25 }
 0x365   : > { %v1807_v49 = vadd.f32 %v1806_v46, %v1805_v34  ;;  %v1875_v45 = vrot.slane %v1874_v33, 4 }
 0x367   : > { %v1808_v52 = vrot.slane %v1807_v49, 2  ;;  %v1876_v31 = vadd.f32 %v1875_v45, %v1874_v33 }
 0x369   : > { %v1809_v26 = vadd.f32 %v1808_v52, %v1807_v49  ;;  %v1877_v42 = vrot.slane %v1876_v31, 2 }
 0x36b   : > { %v1810_v61 = vrot.slane %v1809_v26, 1  ;;  %v1878_v55 = vadd.f32 %v1877_v42, %v1876_v31 }
 0x36d   : > { %v1879_v4 = vrot.slane %v1878_v55, 1  ;;  %v1811_v54 = vadd.f32 %v1810_v61, %v1809_v26 }
 0x36f   : > { %v1880_v3 = vadd.f32 %v1879_v4, %v1878_v55 }
 0x371   : > { %v1882_v51 = vsel %vm1881_vm11, %v1811_v54, %v1880_v3 }
 0x372   : > { %1883 = vst [vmem:[%s178_s8] sm:$0x3] %v1882_v51 }
 0x373 PF: > { %s12_s11 = sadd.s32 1, %s2265_s11   ;;  %s4062_s9 = smov %s2261_s10 }
 0x374   : > { %p9_p5 = scmp.ge.s32.totalorder %s12_s11, 4   ;;  %s4063_s10 = smov %s4065_s12 }
 0x376   :  { %11 = sbr.rel (!%p9_p5) target bundleno = 2 (0x2), region = 61 }

// kernel: m_conv_forward.3
= control target key start
LH: loop header
LB: loop body
LE: loop exit
PB: predicated region body
PF: predicated region fallthrough
CT: control target
= control target key end

     0   :  { %s2454_s15 = smov 0   ;;  %s2456_s16 = smov 0   ;;  %s4305_s0 = inlined_call_operand.vmem [shape: f32[2,18,18,8], index: 0, kind: input, shape index: {}]   ;;  %s4306_s1 = inlined_call_operand.vmem [shape: f32[128,128], index: 1, kind: input, shape index: {}]   ;;  %s4307_s2 = inlined_call_operand.vmem [shape: f32[1,128], index: 2, kind: input, shape index: {}]   ;;  %s4308_s3 = inlined_call_operand.vmem [shape: f32[1,128], index: 3, kind: input, shape index: {}]   ;;  %s4309_s4 = inlined_call_operand.vmem [shape: f32[2,16,16,128], index: 4, kind: output, shape index: {}]  }
   0x1   :  { %s2458_s17 = smov 0  }
   0x2 LB: > { %s26_s18 = sadd.s32 1, %s2415_s16  ;;  %p2125_p0 = scmp.ge.s32.totalorder %s2419_s17, 1  ;;  %s2419_s17 = sphi %s2458_s17, %s14_s17   ;;  %s2415_s16 = sphi %s2456_s16, %s4557_s16   ;;  %s2411_s15 = sphi %s2454_s15, %s4556_s15  }
   0x3   : > { %p28_p1 = scmp.ge.s32.totalorder %s26_s18, 2  ;;  %p201_p2 = scmp.lt.s32.totalorder %s2419_s17, 3 }
   0x5   : > { %s4559_s18 = smov (%p28_p1, %s26_s18), 0  ;;  %p202_p3 = pnand %p2125_p0, %p201_p2 }
   0x7   : > { %205 = sbr.rel (%p202_p3) target bundleno = 869 (0x365), region = 36 }
   0xe   : > { %p240_p4 = scmp.lt.s32.totalorder %s2411_s15, 1  ;;  %vm365_vm0 = vcmask 1046528   ;;  %s2421_s23 = smov 8   ;;  %vm542_vm1 = vcmask 1045504   ;;  %vm1321_vm2 = vcmask 64512   ;;  %vm1354_vm3 = vcmask 130048  }
   0xf   : > { %s2422_s24 = smov 16   ;;  %s2423_s25 = smov 24   ;;  %vm1387_vm4 = vcmask 195584   ;;  %vm1420_vm5 = vcmask 261120   ;;  %vm1453_vm6 = vcmask 326656   ;;  %vm1486_vm7 = vcmask 392192  }
  0x10   : > { %s4561_s15 = smov (!%p240_p4, %s2411_s15), 1  ;;  %s2424_s26 = smov 32   ;;  %vm1519_vm8 = vcmask 457728   ;;  %vm1552_vm9 = vcmask 523264   ;;  %vm1585_vm10 = vcmask 588800  }
  0x11   : > { %s2342_s19 = smul.u32 432, %s4561_s15  ;;  %s2425_s13 = smov 40  }
  0x12   : > { %s2426_s28 = smov 48   ;;  %s2427_s11 = smov 56  }
  0x13   : > { %s2478_s22 = scalar_lea.vmem %s4305_s0, %s2342_s19  ;;  %s2428_s21 = smov 64  }
  0x14   : > { %v2481_v0 = vld [vmem:[%s2478_s22 + $0x18] sm:$0xff]  ;;  %v2484_v1 = vld [vmem:[%s2478_s22 + $0x20] sm:$0xff]  ;;  %v2492_v5 = vld [vmem:[%s2478_s22 + $0x8] sm:$0xff] }
  0x15   : > { %v2487_v2 = vld [vmem:[%s2478_s22] sm:$0xff]  ;;  %v371_v3 = vrot.slane %v2481_v0, 1  ;;  %v372_v4 = vrot.slane %v2484_v1, 1  ;;  %v2496_v7 = vld [vmem:[%s2478_s22 + $0x28] sm:$0x3]  ;;  %v367_v8 = vrot.slane %v2492_v5, 1 }
  0x16   : > { %v366_v6 = vrot.slane %v2487_v2, 1  ;;  %v374_v9 = vrot.slane %v2496_v7, 1  ;;  %v2501_v10 = vld [vmem:[%s2478_s22 + $0x10] sm:$0x3]  ;;  %v2504_v11 = vld [vmem:[%s2478_s22 + $0x38] sm:$0xff]  ;;  %v2534_v24 = vld [vmem:[%s2478_s22 + $0x48] sm:$0xff] }
  0x17   : > { %v2507_v12 = vsel %vm365_vm0, %v371_v3, %v372_v4  ;;  %v369_v13 = vrot.slane %v2501_v10, 1  ;;  %v2511_v14 = vld [vmem:[%s2478_s22 + $0x40] sm:$0x3]  ;;  %v2514_v15 = vld [vmem:[%s2478_s22 + $0x30] sm:$0xff]  ;;  %v377_v18 = vrot.slane %v2504_v11, 1  ;;  %v381_v29 = vrot.slane %v2534_v24, 1 }
  0x18   : > { %450 = vrot.lane.b32.xlu1 %v2507_v12, %s2421_s23  ;;  %v368_v16 = vsel %vm365_vm0, %v366_v6, %v367_v8  ;;  %v2521_v17 = vsel %vm365_vm0, %v372_v4, %v374_v9  ;;  %v379_v19 = vrot.slane %v2511_v14, 1  ;;  %v376_v21 = vrot.slane %v2514_v15, 1  ;;  %v2528_v22 = vld [vmem:[%s2478_s22 + $0x50] sm:$0xff]  ;;  %v2531_v23 = vld [vmem:[%s2478_s22 + $0x58] sm:$0x3]  ;;  %v2549_v30 = vld [vmem:[%s2478_s22 + $0x68] sm:$0xff] }
  0x19   : > { %446 = vrot.lane.b32.xlu0 %v368_v16, %s2421_s23  ;;  %v370_v20 = vsel %vm365_vm0, %v367_v8, %v369_v13  ;;  %v382_v26 = vrot.slane %v2528_v22, 1  ;;  %v384_v27 = vrot.slane %v2531_v23, 1  ;;  %v2552_v31 = vld [vmem:[%s2478_s22 + $0x70] sm:$0x3]  ;;  %v2555_v32 = vld [vmem:[%s2478_s22 + $0x60] sm:$0xff]  ;;  %v387_v34 = vrot.slane %v2549_v30, 1 }
  0x1a   : > { %v2540_v25 = vsel %vm365_vm0, %v377_v18, %v379_v19  ;;  %v2545_v28 = vsel %vm365_vm0, %v376_v21, %v377_v18  ;;  %v389_v35 = vrot.slane %v2552_v31, 1  ;;  %v386_v37 = vrot.slane %v2555_v32, 1  ;;  %v2571_v38 = vld [vmem:[%s2478_s22 + $0x80] sm:$0xff]  ;;  %v2574_v39 = vld [vmem:[%s2478_s22 + $0x88] sm:$0x3]  ;;  %v2577_v40 = vld [vmem:[%s2478_s22 + $0x78] sm:$0xff] }
  0x1b   : > { %v2562_v33 = vsel %vm365_vm0, %v382_v26, %v384_v27  ;;  %v2567_v36 = vsel %vm365_vm0, %v381_v29, %v382_v26  ;;  %v392_v42 = vrot.slane %v2571_v38, 1  ;;  %v394_v43 = vrot.slane %v2574_v39, 1  ;;  %v2593_v46 = vld [vmem:[%s2478_s22 + $0x98] sm:$0xff]  ;;  %v2596_v47 = vld [vmem:[%s2478_s22 + $0xa0] sm:$0x3]  ;;  %v2599_v48 = vld [vmem:[%s2478_s22 + $0x90] sm:$0xff] }
  0x1c   : > { %452 = vrot.lane.b32.xlu1 %v2521_v17, %s2421_s23  ;;  %4410 = vst [vmem:[#allocation2_spill] sm:$0xff] %v2562_v33  ;;  %4411 = vst [vmem:[#allocation3_spill] sm:$0xff] %v2567_v36  ;;  %v2584_v41 = vsel %vm365_vm0, %v387_v34, %v389_v35  ;;  %v2589_v44 = vsel %vm365_vm0, %v386_v37, %v387_v34  ;;  %v391_v45 = vrot.slane %v2577_v40, 1  ;;  %v397_v50 = vrot.slane %v2593_v46, 1  ;;  %v2615_v54 = vld [vmem:[%s2478_s22 + $0xb0] sm:$0xff]  ;;  %v2621_v56 = vld [vmem:[%s2478_s22 + $0xa8] sm:$0xff] }
  0x1d   : > { %448 = vrot.lane.b32.xlu0 %v370_v20, %s2421_s23  ;;  %4412 = vst [vmem:[#allocation4_spill] sm:$0xff] %v2584_v41  ;;  %4413 = vst [vmem:[#allocation5_spill] sm:$0xff] %v2589_v44  ;;  %v2606_v49 = vsel %vm365_vm0, %v392_v42, %v394_v43  ;;  %v399_v51 = vrot.slane %v2596_v47, 1  ;;  %v396_v53 = vrot.slane %v2599_v48, 1  ;;  %v2618_v55 = vld [vmem:[%s2478_s22 + $0xb8] sm:$0x3] }
  0x1e   : > { %4414 = vst [vmem:[#allocation6_spill] sm:$0xff] %v2606_v49  ;;  %v2611_v52 = vsel %vm365_vm0, %v391_v45, %v392_v42  ;;  %v402_v58 = vrot.slane %v2615_v54, 1  ;;  %v404_v59 = vrot.slane %v2618_v55, 1  ;;  %v401_v61 = vrot.slane %v2621_v56, 1  ;;  %v2637_v62 = vld [vmem:[%s2478_s22 + $0xc8] sm:$0xff]  ;;  %v2643_v3 = vld [vmem:[%s2478_s22 + $0xc0] sm:$0xff] }
  0x1f   : > { %4415 = vst [vmem:[#allocation7_spill] sm:$0xff] %v2611_v52  ;;  %v2628_v57 = vsel %vm365_vm0, %v397_v50, %v399_v51  ;;  %v2633_v60 = vsel %vm365_vm0, %v396_v53, %v397_v50  ;;  %v2640_v63 = vld [vmem:[%s2478_s22 + $0xd0] sm:$0x3]  ;;  %v407_v6 = vrot.slane %v2637_v62, 1  ;;  %v406_v13 = vrot.slane %v2643_v3, 1  ;;  %v2659_v16 = vld [vmem:[%s2478_s22 + $0xe0] sm:$0xff] }
  0x20   : > { %456 = vrot.lane.b32.xlu1 %v2540_v25, %s2421_s23  ;;  %4416 = vst [vmem:[#allocation8_spill] sm:$0xff] %v2628_v57  ;;  %4417 = vst [vmem:[#allocation9_spill] sm:$0xff] %v2633_v60  ;;  %v2650_v4 = vsel %vm365_vm0, %v402_v58, %v404_v59  ;;  %v409_v8 = vrot.slane %v2640_v63, 1  ;;  %v2655_v9 = vsel %vm365_vm0, %v401_v61, %v402_v58  ;;  %v2662_v18 = vld [vmem:[%s2478_s22 + $0xe8] sm:$0x3]  ;;  %v2665_v19 = vld [vmem:[%s2478_s22 + $0xd8] sm:$0xff] }
  0x21   : > { %454 = vrot.lane.b32.xlu0 %v2545_v28, %s2421_s23  ;;  %4418 = vst [vmem:[#allocation10_spill] sm:$0xff] %v2650_v4  ;;  %4419 = vst [vmem:[#allocation11_spill] sm:$0xff] %v2655_v9  ;;  %v412_v21 = vrot.slane %v2659_v16, 1  ;;  %v414_v26 = vrot.slane %v2662_v18, 1  ;;  %v2677_v27 = vsel %vm365_vm0, %v406_v13, %v407_v6  ;;  %v411_v29 = vrot.slane %v2665_v19, 1  ;;  %v2681_v34 = vld [vmem:[%s2478_s22 + $0xf8] sm:$0xff] }
  0x22   : > { %v2672_v20 = vsel %vm365_vm0, %v407_v6, %v409_v8  ;;  %4421 = vst [vmem:[#allocation13_spill] sm:$0xff] %v2677_v27  ;;  %v2684_v35 = vld [vmem:[%s2478_s22 + $0x100] sm:$0x3]  ;;  %v2687_v37 = vld [vmem:[%s2478_s22 + $0xf0] sm:$0xff]  ;;  %v417_v43 = vrot.slane %v2681_v34, 1  ;;  %v2709_v59 = vld [vmem:[%s2478_s22 + $0x108] sm:$0xff] }
  0x23   : > { %4420 = vst [vmem:[#allocation12_spill] sm:$0xff] %v2672_v20  ;;  %v2694_v42 = vsel %vm365_vm0, %v412_v21, %v414_v26  ;;  %v419_v45 = vrot.slane %v2684_v35, 1  ;;  %v2699_v50 = vsel %vm365_vm0, %v411_v29, %v412_v21  ;;  %v416_v51 = vrot.slane %v2687_v37, 1  ;;  %v2703_v53 = vld [vmem:[%s2478_s22 + $0x110] sm:$0xff]  ;;  %v2706_v58 = vld [vmem:[%s2478_s22 + $0x118] sm:$0x3] }
  0x24   : > { %460 = vrot.lane.b32.xlu1 %v2562_v33, %s2421_s23  ;;  %4422 = vst [vmem:[#allocation14_spill] sm:$0xff] %v2694_v42  ;;  %v422_v6 = vrot.slane %v2703_v53, 1  ;;  %v424_v8 = vrot.slane %v2706_v58, 1  ;;  %v421_v21 = vrot.slane %v2709_v59, 1  ;;  %v2725_v26 = vld [vmem:[%s2478_s22 + $0x128] sm:$0xff]  ;;  %v2775_v33 = vld [vmem:[%s2478_s22 + $0x150] sm:$0xff] }
  0x25   : > { %458 = vrot.lane.b32.xlu0 %v2567_v36, %s2421_s23  ;;  %v2716_v61 = vsel %vm365_vm0, %v417_v43, %v419_v45  ;;  %v2721_v13 = vsel %vm365_vm0, %v416_v51, %v417_v43  ;;  %v2728_v29 = vld [vmem:[%s2478_s22 + $0x130] sm:$0x3]  ;;  %v427_v43 = vrot.slane %v2725_v26, 1 }
  0x26   : > { %4423 = vst [vmem:[#allocation15_spill] sm:$0xff] %v2716_v61  ;;  %4424 = vst [vmem:[#allocation16_spill] sm:$0xff] %v2721_v13  ;;  %v2738_v45 = vsel %vm365_vm0, %v422_v6, %v424_v8  ;;  %v429_v51 = vrot.slane %v2728_v29, 1 }
  0x27   : > { %4425 = vst [vmem:[#allocation17_spill] sm:$0xff] %v2738_v45 }
  0x28   : > { %464 = vrot.lane.b32.xlu1 %v2584_v41, %s2421_s23  ;;  %v2760_v8 = vsel %vm365_vm0, %v427_v43, %v429_v51  ;;  %v2769_v41 = vld [vmem:[%s2478_s22 + $0x158] sm:$0xff] }
  0x29   : > { %462 = vrot.lane.b32.xlu0 %v2589_v44, %s2421_s23  ;;  %4427 = vst [vmem:[#allocation19_spill] sm:$0xff] %v2760_v8  ;;  %v2772_v44 = vld [vmem:[%s2478_s22 + $0x160] sm:$0x3] }
  0x2c   : > { %468 = vrot.lane.b32.xlu1 %v2606_v49, %s2421_s23 }
  0x2d   : > { %466 = vrot.lane.b32.xlu0 %v2611_v52, %s2421_s23 }
  0x30   : > { %472 = vrot.lane.b32.xlu1 %v2628_v57, %s2421_s23  ;;  %v2750_v57 = vld [vmem:[%s2478_s22 + $0x148] sm:$0x3] }
  0x31   : > { %470 = vrot.lane.b32.xlu0 %v2633_v60, %s2421_s23  ;;  %v2753_v60 = vld [vmem:[%s2478_s22 + $0x138] sm:$0xff] }
  0x32   : > { %v431_v52 = vrot.slane %v2753_v60, 1 }
  0x34   : > { %476 = vrot.lane.b32.xlu1 %v2650_v4, %s2421_s23 }
  0x35   : > { %474 = vrot.lane.b32.xlu0 %v2655_v9, %s2421_s23  ;;  %v2747_v9 = vld [vmem:[%s2478_s22 + $0x140] sm:$0xff] }
  0x38   : > { %480 = vrot.lane.b32.xlu1 %v2672_v20, %s2421_s23  ;;  %v2731_v20 = vld [vmem:[%s2478_s22 + $0x120] sm:$0xff] }
  0x39   : > { %478 = vrot.lane.b32.xlu0 %v2677_v27, %s2421_s23  ;;  %v2743_v27 = vsel %vm365_vm0, %v421_v21, %v422_v6  ;;  %v426_v4 = vrot.slane %v2731_v20, 1  ;;  %v432_v6 = vrot.slane %v2747_v9, 1  ;;  %v434_v21 = vrot.slane %v2750_v57, 1 }
  0x3a   : > { %4426 = vst [vmem:[#allocation18_spill] sm:$0xff] %v2743_v27 }
  0x3b   : > { %v2765_v49 = vsel %vm365_vm0, %v426_v4, %v427_v43  ;;  %v2782_v51 = vsel %vm365_vm0, %v432_v6, %v434_v21  ;;  %v437_v4 = vrot.slane %v2769_v41, 1  ;;  %v439_v43 = vrot.slane %v2772_v44, 1 }
  0x3c   : > { %484 = vrot.lane.b32.xlu1 %v2694_v42, %s2421_s23  ;;  %4428 = vst [vmem:[#allocation20_spill] sm:$0xff] %v2765_v49  ;;  %4429 = vst [vmem:[#allocation21_spill] sm:$0xff] %v2782_v51 }
  0x3d   : > { %482 = vrot.lane.b32.xlu0 %v2699_v50, %s2421_s23  ;;  %v2804_v21 = vsel %vm365_vm0, %v437_v4, %v439_v43  ;;  %v544_v43 = vrot.slane %v2492_v5, 2  ;;  %v551_v5 = vrot.slane %v2496_v7, 2  ;;  %v553_v7 = vrot.slane %v2514_v15, 2 }
  0x3e   : > { %4433 = vst [vmem:[#allocation25_spill] sm:$0xff] %v2804_v21 }
  0x40   : > { %488 = vrot.lane.b32.xlu1 %v2716_v61, %s2421_s23  ;;  %v2791_v61 = vld [vmem:[%s2478_s22 + $0x170] sm:$0xff] }
  0x41   : > { %486 = vrot.lane.b32.xlu0 %v2721_v13, %s2421_s23  ;;  %4431 = vst [vmem:[#allocation23_spill] sm:$0xff] %v2791_v61  ;;  %v2794_v13 = vld [vmem:[%s2478_s22 + $0x178] sm:$0x3] }
  0x44   : > { %492 = vrot.lane.b32.xlu1 %v2738_v45, %s2421_s23  ;;  %v2787_v45 = vsel %vm365_vm0, %v431_v52, %v432_v6  ;;  %v442_v52 = vrot.slane %v2791_v61, 1  ;;  %v444_v6 = vrot.slane %v2794_v13, 1 }
  0x45   : > { %490 = vrot.lane.b32.xlu0 %v2743_v27, %s2421_s23  ;;  %4430 = vst [vmem:[#allocation22_spill] sm:$0xff] %v2787_v45  ;;  %v436_v27 = vrot.slane %v2775_v33, 1 }
  0x48   : > { %496 = vrot.lane.b32.xlu1 %v2760_v8, %s2421_s23  ;;  %v2797_v8 = vld [vmem:[%s2478_s22 + $0x168] sm:$0xff] }
  0x49   : > { %494 = vrot.lane.b32.xlu0 %v2765_v49, %s2421_s23  ;;  %4432 = vst [vmem:[#allocation24_spill] sm:$0xff] %v2797_v8  ;;  %v2809_v49 = vsel %vm365_vm0, %v436_v27, %v437_v4  ;;  %v441_v42 = vrot.slane %v2797_v8, 1  ;;  %v543_v27 = vrot.slane %v2487_v2, 2 }
  0x4a   : > { %4434 = vst [vmem:[#allocation26_spill] sm:$0xff] %v2809_v49 }
  0x4b   : > { %v2822_v36 = vsel %vm365_vm0, %v441_v42, %v442_v52  ;;  %v548_v42 = vrot.slane %v2481_v0, 2 }
  0x4c   : > { %500 = vrot.lane.b32.xlu1 %v2782_v51, %s2421_s23  ;;  %v2817_v51 = vsel %vm365_vm0, %v442_v52, %v444_v6  ;;  %4436 = vst [vmem:[#allocation28_spill] sm:$0xff] %v2822_v36  ;;  %v549_v6 = vrot.slane %v2484_v1, 2  ;;  %v554_v52 = vrot.slane %v2504_v11, 2 }
  0x4d   : > { %498 = vrot.lane.b32.xlu0 %v2787_v45, %s2421_s23  ;;  %4435 = vst [vmem:[#allocation27_spill] sm:$0xff] %v2817_v51  ;;  %v546_v45 = vrot.slane %v2501_v10, 2  ;;  %v545_v10 = vsel %vm542_vm1, %v543_v27, %v544_v43  ;;  %v559_v27 = vrot.slane %v2528_v22, 2 }
  0x4e   : > { %v2837_v2 = vsel %vm542_vm1, %v549_v6, %v551_v5 }
  0x4f   : > { %v547_v4 = vsel %vm542_vm1, %v544_v43, %v546_v45  ;;  %v556_v45 = vrot.slane %v2511_v14, 2  ;;  %v2855_v14 = vsel %vm542_vm1, %v553_v7, %v554_v52  ;;  %v569_v7 = vrot.slane %v2571_v38, 2 }
  0x50   : > { %504 = vrot.lane.b32.xlu1 %v2804_v21, %s2421_s23  ;;  %v581_v21 = vrot.slane %v2618_v55, 2 }
  0x51   : > { %502 = vrot.lane.b32.xlu0 %v2809_v49, %s2421_s23  ;;  %v2850_v43 = vsel %vm542_vm1, %v554_v52, %v556_v45  ;;  %v563_v52 = vrot.slane %v2555_v32, 2  ;;  %v586_v49 = vrot.slane %v2640_v63, 2 }
  0x52   : > { %4437 = vst [vmem:[#allocation29_spill] sm:$0xff] %v2850_v43 }
  0x54   : > { %508 = vrot.lane.b32.xlu1 %v2817_v51, %s2421_s23  ;;  %v2842_v51 = vsel %vm542_vm1, %v548_v42, %v549_v6  ;;  %v558_v6 = vrot.slane %v2534_v24, 2  ;;  %v566_v42 = vrot.slane %v2552_v31, 2 }
  0x55   : > { %506 = vrot.lane.b32.xlu0 %v2822_v36, %s2421_s23  ;;  %v576_v36 = vrot.slane %v2596_v47, 2 }
  0x58   : > { %625 = vrot.lane.b32.xlu1 %v547_v4, %s2422_s24  ;;  %v561_v4 = vrot.slane %v2531_v23, 2  ;;  %v2868_v23 = vsel %vm542_vm1, %v558_v6, %v559_v27 }
  0x59   : > { %623 = vrot.lane.b32.xlu0 %v545_v10, %s2422_s24  ;;  %v564_v10 = vrot.slane %v2549_v30, 2  ;;  %4439 = vst [vmem:[#allocation31_spill] sm:$0xff] %v2868_v23 }
  0x5a   : > { %v2863_v5 = vsel %vm542_vm1, %v559_v27, %v561_v4  ;;  %v571_v4 = vrot.slane %v2574_v39, 2  ;;  %v568_v27 = vrot.slane %v2577_v40, 2 }
  0x5b   : > { %4438 = vst [vmem:[#allocation30_spill] sm:$0xff] %v2863_v5  ;;  %v2876_v45 = vsel %vm542_vm1, %v564_v10, %v566_v42  ;;  %v2881_v31 = vsel %vm542_vm1, %v563_v52, %v564_v10  ;;  %v574_v42 = vrot.slane %v2593_v46, 2  ;;  %v573_v10 = vrot.slane %v2599_v48, 2 }
  0x5c   : > { %629 = vrot.lane.b32.xlu1 %v2837_v2, %s2422_s24  ;;  %4440 = vst [vmem:[#allocation32_spill] sm:$0xff] %v2876_v45  ;;  %4441 = vst [vmem:[#allocation33_spill] sm:$0xff] %v2881_v31  ;;  %v2889_v6 = vsel %vm542_vm1, %v569_v7, %v571_v4  ;;  %v2894_v39 = vsel %vm542_vm1, %v568_v27, %v569_v7  ;;  %v579_v4 = vrot.slane %v2615_v54, 2  ;;  %v578_v7 = vrot.slane %v2621_v56, 2 }
  0x5d   : > { %627 = vrot.lane.b32.xlu0 %v2842_v51, %s2422_s24  ;;  %4442 = vst [vmem:[#allocation34_spill] sm:$0xff] %v2889_v6  ;;  %4443 = vst [vmem:[#allocation35_spill] sm:$0xff] %v2894_v39  ;;  %v2902_v52 = vsel %vm542_vm1, %v574_v42, %v576_v36  ;;  %v2907_v47 = vsel %vm542_vm1, %v573_v10, %v574_v42  ;;  %v584_v36 = vrot.slane %v2637_v62, 2  ;;  %v583_v42 = vrot.slane %v2643_v3, 2 }
  0x5e   : > { %4444 = vst [vmem:[#allocation36_spill] sm:$0xff] %v2902_v52  ;;  %4445 = vst [vmem:[#allocation37_spill] sm:$0xff] %v2907_v47  ;;  %v2915_v27 = vsel %vm542_vm1, %v579_v4, %v581_v21  ;;  %v2920_v55 = vsel %vm542_vm1, %v578_v7, %v579_v4  ;;  %v589_v21 = vrot.slane %v2659_v16, 2  ;;  %v588_v4 = vrot.slane %v2665_v19, 2 }
  0x5f   : > { %4446 = vst [vmem:[#allocation38_spill] sm:$0xff] %v2915_v27  ;;  %4447 = vst [vmem:[#allocation39_spill] sm:$0xff] %v2920_v55  ;;  %v2928_v10 = vsel %vm542_vm1, %v584_v36, %v586_v49  ;;  %v2933_v63 = vsel %vm542_vm1, %v583_v42, %v584_v36  ;;  %v594_v49 = vrot.slane %v2681_v34, 2  ;;  %v593_v36 = vrot.slane %v2687_v37, 2 }
  0x60   : > { %633 = vrot.lane.b32.xlu1 %v2850_v43, %s2422_s24  ;;  %4448 = vst [vmem:[#allocation40_spill] sm:$0xff] %v2928_v10  ;;  %4449 = vst [vmem:[#allocation41_spill] sm:$0xff] %v2933_v63 }
  0x61   : > { %631 = vrot.lane.b32.xlu0 %v2855_v14, %s2422_s24 }
  0x64   : > { %637 = vrot.lane.b32.xlu1 %v2863_v5, %s2422_s24 }
  0x65   : > { %635 = vrot.lane.b32.xlu0 %v2868_v23, %s2422_s24 }
  0x68   : > { %641 = vrot.lane.b32.xlu1 %v2876_v45, %s2422_s24 }
  0x69   : > { %639 = vrot.lane.b32.xlu0 %v2881_v31, %s2422_s24 }
  0x6c   : > { %645 = vrot.lane.b32.xlu1 %v2889_v6, %s2422_s24 }
  0x6d   : > { %643 = vrot.lane.b32.xlu0 %v2894_v39, %s2422_s24 }
  0x70   : > { %649 = vrot.lane.b32.xlu1 %v2902_v52, %s2422_s24  ;;  %v591_v52 = vrot.slane %v2662_v18, 2  ;;  %v2946_v18 = vsel %vm542_vm1, %v588_v4, %v589_v21 }
  0x71   : > { %647 = vrot.lane.b32.xlu0 %v2907_v47, %s2422_s24  ;;  %v616_v47 = vrot.slane %v2772_v44, 2  ;;  %v619_v44 = vrot.slane %v2791_v61, 2 }
  0x72   : > { %v2941_v7 = vsel %vm542_vm1, %v589_v21, %v591_v52  ;;  %v599_v52 = vrot.slane %v2703_v53, 2  ;;  %v598_v21 = vrot.slane %v2709_v59, 2 }
  0x74   : > { %653 = vrot.lane.b32.xlu1 %v2915_v27, %s2422_s24  ;;  %v596_v27 = vrot.slane %v2684_v35, 2  ;;  %v2959_v35 = vsel %vm542_vm1, %v593_v36, %v594_v49 }
  0x75   : > { %651 = vrot.lane.b32.xlu0 %v2920_v55, %s2422_s24  ;;  %v611_v55 = vrot.slane %v2750_v57, 2 }
  0x76   : > { %v2954_v42 = vsel %vm542_vm1, %v594_v49, %v596_v27  ;;  %v604_v27 = vrot.slane %v2725_v26, 2  ;;  %v603_v49 = vrot.slane %v2731_v20, 2 }
  0x77   : > { %4450 = vst [vmem:[#allocation42_spill] sm:$0xff] %v2954_v42 }
  0x78   : > { %657 = vrot.lane.b32.xlu1 %v2928_v10, %s2422_s24  ;;  %v601_v10 = vrot.slane %v2706_v58, 2  ;;  %v2972_v58 = vsel %vm542_vm1, %v598_v21, %v599_v52 }
  0x79   : > { %655 = vrot.lane.b32.xlu0 %v2933_v63, %s2422_s24  ;;  %v606_v63 = vrot.slane %v2728_v29, 2  ;;  %4452 = vst [vmem:[#allocation44_spill] sm:$0xff] %v2972_v58  ;;  %v2985_v29 = vsel %vm542_vm1, %v603_v49, %v604_v27 }
  0x7a   : > { %v2967_v4 = vsel %vm542_vm1, %v599_v52, %v601_v10  ;;  %v609_v10 = vrot.slane %v2747_v9, 2  ;;  %4454 = vst [vmem:[#allocation46_spill] sm:$0xff] %v2985_v29  ;;  %v608_v52 = vrot.slane %v2753_v60, 2 }
  0x7b   : > { %4451 = vst [vmem:[#allocation43_spill] sm:$0xff] %v2967_v4  ;;  %v2980_v36 = vsel %vm542_vm1, %v604_v27, %v606_v63  ;;  %v614_v63 = vrot.slane %v2769_v41, 2  ;;  %v613_v27 = vrot.slane %v2775_v33, 2 }
  0x7c   : > { %661 = vrot.lane.b32.xlu1 %v2941_v7, %s2422_s24  ;;  %4453 = vst [vmem:[#allocation45_spill] sm:$0xff] %v2980_v36  ;;  %v2993_v21 = vsel %vm542_vm1, %v609_v10, %v611_v55  ;;  %v3000_v57 = vsel %vm542_vm1, %v608_v52, %v609_v10  ;;  %v618_v52 = vrot.slane %v2797_v8, 2 }
  0x7d   : > { %659 = vrot.lane.b32.xlu0 %v2946_v18, %s2422_s24  ;;  %4455 = vst [vmem:[#allocation47_spill] sm:$0xff] %v2993_v21  ;;  %4457 = vst [vmem:[#allocation49_spill] sm:$0xff] %v3000_v57  ;;  %v3010_v55 = vsel %vm542_vm1, %v614_v63, %v616_v47  ;;  %v3017_v10 = vsel %vm542_vm1, %v613_v27, %v614_v63 }
  0x7e   : > { %4459 = vst [vmem:[#allocation51_spill] sm:$0xff] %v3010_v55  ;;  %4461 = vst [vmem:[#allocation53_spill] sm:$0xff] %v3017_v10 }
  0x80   : > { %665 = vrot.lane.b32.xlu1 %v2954_v42, %s2422_s24 }
  0x81   : > { %663 = vrot.lane.b32.xlu0 %v2959_v35, %s2422_s24 }
  0x84   : > { %669 = vrot.lane.b32.xlu1 %v2967_v4, %s2422_s24 }
  0x85   : > { %667 = vrot.lane.b32.xlu0 %v2972_v58, %s2422_s24 }
  0x88   : > { %673 = vrot.lane.b32.xlu1 %v2980_v36, %s2422_s24 }
  0x89   : > { %671 = vrot.lane.b32.xlu0 %v2985_v29, %s2422_s24 }
  0x8a   : > { %v2997_v6 = vpop.permute.xlu1 %450 }
  0x8b   : > { %4456 = vst [vmem:[#allocation48_spill] sm:$0xff] %v2997_v6  ;;  %v3003_v49 = vpop.permute.xlu0 %446  ;;  %v621_v6 = vrot.slane %v2794_v13, 2  ;;  %v3032_v13 = vsel %vm542_vm1, %v618_v52, %v619_v44 }
  0x8c   : > { %4458 = vst [vmem:[#allocation50_spill] sm:$0xff] %v3003_v49  ;;  %677 = vrot.lane.b32.xlu1 %v2993_v21, %s2422_s24  ;;  %4464 = vst [vmem:[#allocation56_spill] sm:$0xff] %v3032_v13 }
  0x8d   : > { %675 = vrot.lane.b32.xlu0 %v3000_v57, %s2422_s24  ;;  %v3027_v47 = vsel %vm542_vm1, %v619_v44, %v621_v6 }
  0x8e   : > { %v3014_v39 = vpop.permute.xlu1 %452  ;;  %4463 = vst [vmem:[#allocation55_spill] sm:$0xff] %v3027_v47 }
  0x8f   : > { %4460 = vst [vmem:[#allocation52_spill] sm:$0xff] %v3014_v39  ;;  %v3020_v49 = vpop.permute.xlu0 %448 }
  0x90   : > { %4462 = vst [vmem:[#allocation54_spill] sm:$0xff] %v3020_v49  ;;  %681 = vrot.lane.b32.xlu1 %v3010_v55, %s2422_s24 }
  0x91   : > { %679 = vrot.lane.b32.xlu0 %v3017_v10, %s2422_s24 }
  0x92   : > { %v3029_v21 = vpop.permute.xlu1 %456 }
  0x93   : > { %v3034_v63 = vpop.permute.xlu0 %454 }
  0x94   : > { %685 = vrot.lane.b32.xlu1 %v3027_v47, %s2422_s24 }
  0x95   : > { %683 = vrot.lane.b32.xlu0 %v3032_v13, %s2422_s24  ;;  %s2165_s24 = sshll.u32 %s4561_s15, 8 }
  0x96   : > { %v3040_v27 = vpop.permute.xlu1 %460 }
  0x97   : > { %v3042_v55 = vpop.permute.xlu0 %458 }
  0x98   : > { %723 = vrot.lane.b32.xlu1 %v2484_v1, %s2423_s25 }
  0x99   : > { %721 = vrot.lane.b32.xlu0 %v2481_v0, %s2423_s25 }
  0x9a   : > { %v3048_v6 = vpop.permute.xlu1 %464 }
  0x9b   : > { %v3050_v44 = vpop.permute.xlu0 %462 }
  0x9c   : > { %727 = vrot.lane.b32.xlu1 %v2504_v11, %s2423_s25 }
  0x9d   : > { %725 = vrot.lane.b32.xlu0 %v2514_v15, %s2423_s25 }
  0x9e   : > { %v3056_v52 = vpop.permute.xlu1 %468 }
  0x9f   : > { %v3058_v47 = vpop.permute.xlu0 %466 }
  0xa0   : > { %731 = vrot.lane.b32.xlu1 %v2528_v22, %s2423_s25 }
  0xa1   : > { %729 = vrot.lane.b32.xlu0 %v2534_v24, %s2423_s25 }
  0xa2   : > { %v3064_v0 = vpop.permute.xlu1 %472 }
  0xa3   : > { %v3066_v1 = vpop.permute.xlu0 %470 }
  0xa4   : > { %735 = vrot.lane.b32.xlu1 %v2549_v30, %s2423_s25 }
  0xa5   : > { %733 = vrot.lane.b32.xlu0 %v2555_v32, %s2423_s25 }
  0xa6   : > { %v3072_v13 = vpop.permute.xlu1 %476 }
  0xa7   : > { %v3074_v39 = vpop.permute.xlu0 %474 }
  0xa8   : > { %739 = vrot.lane.b32.xlu1 %v2571_v38, %s2423_s25 }
  0xa9   : > { %737 = vrot.lane.b32.xlu0 %v2577_v40, %s2423_s25 }
  0xaa   : > { %v3080_v10 = vpop.permute.xlu1 %480 }
  0xab   : > { %4465 = vst [vmem:[#allocation57_spill] sm:$0xff] %v3080_v10  ;;  %v3082_v57 = vpop.permute.xlu0 %478 }
  0xac   : > { %4466 = vst [vmem:[#allocation58_spill] sm:$0xff] %v3082_v57  ;;  %743 = vrot.lane.b32.xlu1 %v2593_v46, %s2423_s25 }
  0xad   : > { %741 = vrot.lane.b32.xlu0 %v2599_v48, %s2423_s25 }
  0xae   : > { %v3088_v49 = vpop.permute.xlu1 %484 }
  0xaf   : > { %4467 = vst [vmem:[#allocation59_spill] sm:$0xff] %v3088_v49  ;;  %v3090_v45 = vpop.permute.xlu0 %482 }
  0xb0   : > { %4468 = vst [vmem:[#allocation60_spill] sm:$0xff] %v3090_v45  ;;  %747 = vrot.lane.b32.xlu1 %v2615_v54, %s2423_s25 }
  0xb1   : > { %745 = vrot.lane.b32.xlu0 %v2621_v56, %s2423_s25 }
  0xb2   : > { %v3096_v36 = vpop.permute.xlu1 %488 }
  0xb3   : > { %v3098_v10 = vpop.permute.xlu0 %486 }
  0xb4   : > { %751 = vrot.lane.b32.xlu1 %v2637_v62, %s2423_s25 }
  0xb5   : > { %749 = vrot.lane.b32.xlu0 %v2643_v3, %s2423_s25 }
  0xb6   : > { %v3104_v57 = vpop.permute.xlu1 %492 }
  0xb7   : > { %v3106_v49 = vpop.permute.xlu0 %490 }
  0xb8   : > { %755 = vrot.lane.b32.xlu1 %v2659_v16, %s2423_s25 }
  0xb9   : > { %753 = vrot.lane.b32.xlu0 %v2665_v19, %s2423_s25 }
  0xba   : > { %v3112_v45 = vpop.permute.xlu1 %496 }
  0xbb   : > { %v3114_v31 = vpop.permute.xlu0 %494 }
  0xbc   : > { %759 = vrot.lane.b32.xlu1 %v2681_v34, %s2423_s25 }
  0xbd   : > { %757 = vrot.lane.b32.xlu0 %v2687_v37, %s2423_s25 }
  0xbe   : > { %v3120_v62 = vpop.permute.xlu1 %500 }
  0xbf   : > { %v3122_v3 = vpop.permute.xlu0 %498 }
  0xc0   : > { %763 = vrot.lane.b32.xlu1 %v2703_v53, %s2423_s25 }
  0xc1   : > { %761 = vrot.lane.b32.xlu0 %v2709_v59, %s2423_s25 }
  0xc2   : > { %v3128_v16 = vpop.permute.xlu1 %504 }
  0xc3   : > { %v3130_v19 = vpop.permute.xlu0 %502 }
  0xc4   : > { %767 = vrot.lane.b32.xlu1 %v2725_v26, %s2423_s25 }
  0xc5   : > { %765 = vrot.lane.b32.xlu0 %v2731_v20, %s2423_s25 }
  0xc6   : > { %v3136_v29 = vpop.permute.xlu1 %508 }
  0xc7   : > { %4469 = vst [vmem:[#allocation61_spill] sm:$0xff] %v3136_v29  ;;  %v3138_v5 = vpop.permute.xlu0 %506 }
  0xc8   : > { %4470 = vst [vmem:[#allocation62_spill] sm:$0xff] %v3138_v5  ;;  %771 = vrot.lane.b32.xlu1 %v2747_v9, %s2423_s25  ;;  %v3167_v5 = vld [vmem:[%s2478_s22 + $0x180] sm:$0xff] }
  0xc9   : > { %769 = vrot.lane.b32.xlu0 %v2753_v60, %s2423_s25 }
  0xca   : > { %v3144_v4 = vpop.permute.xlu1 %625 }
  0xcb   : > { %4471 = vst [vmem:[#allocation63_spill] sm:$0xff] %v3144_v4  ;;  %v3146_v23 = vpop.permute.xlu0 %623  ;;  %v3161_v4 = vld [vmem:[%s2478_s22 + $0x188] sm:$0xff] }
  0xcc   : > { %4472 = vst [vmem:[#allocation64_spill] sm:$0xff] %v3146_v23  ;;  %775 = vrot.lane.b32.xlu1 %v2769_v41, %s2423_s25  ;;  %v1327_v23 = vsel %vm1321_vm2, %v2504_v11, %v3029_v21  ;;  %v1329_v21 = vsel %vm1321_vm2, %v2528_v22, %v3040_v27 }
  0xcd   : > { %773 = vrot.lane.b32.xlu0 %v2775_v33, %s2423_s25 }
  0xce   : > { %v3152_v58 = vpop.permute.xlu1 %629 }
  0xcf   : > { %4473 = vst [vmem:[#allocation65_spill] sm:$0xff] %v3152_v58  ;;  %v3154_v42 = vpop.permute.xlu0 %627  ;;  %v1326_v58 = vsel %vm1321_vm2, %v2514_v15, %v3034_v63  ;;  %v1331_v63 = vsel %vm1321_vm2, %v2549_v30, %v3048_v6  ;;  %v1333_v6 = vsel %vm1321_vm2, %v2571_v38, %v3056_v52 }
  0xd0   : > { %4474 = vst [vmem:[#allocation66_spill] sm:$0xff] %v3154_v42  ;;  %779 = vrot.lane.b32.xlu1 %v2791_v61, %s2423_s25 }
  0xd1   : > { %777 = vrot.lane.b32.xlu0 %v2797_v8, %s2423_s25 }
  0xd2   : > { %v634_v43 = vpop.permute.xlu1 %633 }
  0xd3   : > { %v3173_v42 = vsel %vm1354_vm3, %v1327_v23, %v634_v43  ;;  %v632_v61 = vpop.permute.xlu0 %631  ;;  %v1328_v43 = vsel %vm1321_vm2, %v2534_v24, %v3042_v55  ;;  %v1619_v55 = vld [vmem:[%s4306_s1 + $0x8] sm:$0xff] }
  0xd4   : > { %v3176_v8 = vsel %vm1354_vm3, %v1326_v58, %v632_v61  ;;  %783 = vrot.lane.b32.xlu1 %v3161_v4, %s2423_s25 }
  0xd5   : > { %781 = vrot.lane.b32.xlu0 %v3167_v5, %s2423_s25 }
  0xd6   : > { %v638_v29 = vpop.permute.xlu1 %637 }
  0xd7   : > { %v3189_v23 = vsel %vm1354_vm3, %v1329_v21, %v638_v29  ;;  %v636_v61 = vpop.permute.xlu0 %635  ;;  %v1618_v29 = vld [vmem:[%s4306_s1] sm:$0xff] }
  0xd8   : > { %v3192_v58 = vsel %vm1354_vm3, %v1328_v43, %v636_v61  ;;  %825 = vrot.lane.b32.xlu1 %v2521_v17, %s2424_s26  ;;  %v1330_v17 = vsel %vm1321_vm2, %v2555_v32, %v3050_v44  ;;  %v2294_v43 = vpack.c.bf16 %v1619_v55, %v1618_v29  ;;  %v1620_v44 = vld [vmem:[%s4306_s1 + $0x10] sm:$0xff]  ;;  %v1621_v61 = vld [vmem:[%s4306_s1 + $0x18] sm:$0xff]  ;;  %v4475_v55 = vld [vmem:[#allocation3_spill] sm:$0xff] }
  0xd9   : > { %823 = vrot.lane.b32.xlu0 %v2507_v12, %s2424_s26  ;;  %v2298_v38 = vpack.c.bf16 %v1621_v61, %v1620_v44  ;;  %v4476_v44 = vld [vmem:[#allocation14_spill] sm:$0xff]  ;;  %v1624_v61 = vld [vmem:[%s4306_s1 + $0x30] sm:$0xff] }
  0xda   : > { %v642_v27 = vpop.permute.xlu1 %641  ;;  %2295 = vmatprep.subr.bf16.mxu0 %v2294_v43  ;;  %2326 = vmatprep.subr.bf16.mxu1 %v2294_v43 }
  0xdb   : > { %v3211_v21 = vsel %vm1354_vm3, %v1331_v63, %v642_v27  ;;  %v640_v12 = vpop.permute.xlu0 %639  ;;  %2297 = vmatpush3.bf16.msra.mxu0 %v2294_v43  ;;  %v1332_v63 = vsel %vm1321_vm2, %v2577_v40, %v3058_v47  ;;  %2334 = vmatpush3.bf16.msra.mxu1 %v2294_v43  ;;  %v1335_v40 = vsel %vm1321_vm2, %v2593_v46, %v3064_v0 }
  0xdc   : > { %v3214_v30 = vsel %vm1354_vm3, %v1330_v17, %v640_v12  ;;  %829 = vrot.lane.b32.xlu1 %v2540_v25, %s2424_s26  ;;  %2299 = vmatprep.subr.bf16.mxu0 %v2298_v38  ;;  %v1622_v17 = vld [vmem:[%s4306_s1 + $0x20] sm:$0xff]  ;;  %v1623_v12 = vld [vmem:[%s4306_s1 + $0x28] sm:$0xff]  ;;  %v1334_v43 = vsel %vm1321_vm2, %v2599_v48, %v3066_v1  ;;  %v1337_v48 = vsel %vm1321_vm2, %v2615_v54, %v3072_v13 }
  0xdd   : > { %827 = vrot.lane.b32.xlu0 %v2545_v28, %s2424_s26  ;;  %2327 = vmatprep.subr.bf16.mxu1 %v2298_v38  ;;  %v2302_v46 = vpack.c.bf16 %v1623_v12, %v1622_v17  ;;  %v1628_v12 = vld [vmem:[%s4306_s1 + $0x50] sm:$0xff] }
  0xde   : > { %v646_v32 = vpop.permute.xlu1 %645 }
  0xdf   : > { %v3233_v27 = vsel %vm1354_vm3, %v1333_v6, %v646_v32  ;;  %v644_v29 = vpop.permute.xlu0 %643  ;;  %2301 = vmatpush3.bf16.msra.mxu0 %v2298_v38  ;;  %2335 = vmatpush3.bf16.msra.mxu1 %v2298_v38 }
  0xe0   : > { %v3236_v52 = vsel %vm1354_vm3, %v1332_v63, %v644_v29  ;;  %855 = vrot.lane.b32.xlu1 %v2699_v50, %s2424_s26  ;;  %2303 = vmatprep.subr.bf16.mxu0 %v2302_v46  ;;  %v1625_v63 = vld [vmem:[%s4306_s1 + $0x38] sm:$0xff] }
  0xe1   : > { %831 = vrot.lane.b32.xlu0 %v4475_v55, %s2424_s26  ;;  %2328 = vmatprep.subr.bf16.mxu1 %v2302_v46  ;;  %v2306_v54 = vpack.c.bf16 %v1625_v63, %v1624_v61  ;;  %v1631_v61 = vld [vmem:[%s4306_s1 + $0x68] sm:$0xff] }
  0xe2   : > { %v650_v47 = vpop.permute.xlu1 %649 }
  0xe3   : > { %v3255_v6 = vsel %vm1354_vm3, %v1335_v40, %v650_v47  ;;  %v648_v32 = vpop.permute.xlu0 %647  ;;  %2305 = vmatpush3.bf16.msra.mxu0 %v2302_v46  ;;  %2336 = vmatpush3.bf16.msra.mxu1 %v2302_v46 }
  0xe4   : > { %v3258_v0 = vsel %vm1354_vm3, %v1334_v43, %v648_v32  ;;  %924 = vrot.lane.b32.xlu1 %v2842_v51, %s2425_s13  ;;  %v1336_v51 = vsel %vm1321_vm2, %v2621_v56, %v3074_v39  ;;  %2307 = vmatprep.subr.bf16.mxu0 %v2306_v54  ;;  %v1626_v56 = vld [vmem:[%s4306_s1 + $0x40] sm:$0xff]  ;;  %v1627_v39 = vld [vmem:[%s4306_s1 + $0x48] sm:$0xff]  ;;  %v1629_v43 = vld [vmem:[%s4306_s1 + $0x58] sm:$0xff] }
  0xe5   : > { %857 = vrot.lane.b32.xlu0 %v4476_v44, %s2424_s26  ;;  %2329 = vmatprep.subr.bf16.mxu1 %v2306_v54  ;;  %v2310_v17 = vpack.c.bf16 %v1627_v39, %v1626_v56  ;;  %v2314_v46 = vpack.c.bf16 %v1629_v43, %v1628_v12  ;;  %v1633_v56 = vld [vmem:[%s4306_s1 + $0x78] sm:$0xff]  ;;  %v4477_v12 = vld [vmem:[#allocation16_spill] sm:$0xff] }
  0xe6   : > { %v654_v1 = vpop.permute.xlu1 %653 }
  0xe7   : > { %v3277_v29 = vsel %vm1354_vm3, %v1337_v48, %v654_v1  ;;  %v652_v38 = vpop.permute.xlu0 %651  ;;  %2309 = vmatpush3.bf16.msra.mxu0 %v2306_v54  ;;  %2337 = vmatpush3.bf16.msra.mxu1 %v2306_v54  ;;  %v1630_v1 = vld [vmem:[%s4306_s1 + $0x60] sm:$0xff]  ;;  %v1632_v54 = vld [vmem:[%s4306_s1 + $0x70] sm:$0xff] }
  0xe8   : > { %v3280_v13 = vsel %vm1354_vm3, %v1336_v51, %v652_v38  ;;  %926 = vrot.lane.b32.xlu1 %v2837_v2, %s2425_s13  ;;  %2311 = vmatprep.subr.bf16.mxu0 %v2310_v17 }
  0xe9   : > { %956 = vrot.lane.b32.xlu0 %v2946_v18, %s2425_s13  ;;  %2330 = vmatprep.subr.bf16.mxu1 %v2310_v17 }
  0xea   : > { %v3286_v40 = vpop.permute.xlu1 %657 }
  0xeb   : > { %v3294_v47 = vpop.permute.xlu0 %655  ;;  %2313 = vmatpush3.bf16.msra.mxu0 %v2310_v17  ;;  %2338 = vmatpush3.bf16.msra.mxu1 %v2310_v17 }
  0xec   : > { %1022 = vrot.lane.b32.xlu1 %v2514_v15, %s2426_s28  ;;  %2315 = vmatprep.subr.bf16.mxu0 %v2314_v46  ;;  %v1343_v15 = vsel %vm1321_vm2, %v2681_v34, %v3096_v36  ;;  %v2318_v36 = vpack.c.bf16 %v1631_v61, %v1630_v1  ;;  %v4478_v61 = vld [vmem:[#allocation15_spill] sm:$0xff] }
  0xed   : > { %958 = vrot.lane.b32.xlu0 %v2941_v7, %s2425_s13  ;;  %2331 = vmatprep.subr.bf16.mxu1 %v2314_v46 }
  0xee   : > { %v3300_v2 = vpop.permute.xlu1 %661 }
  0xef   : > { %v3308_v32 = vpop.permute.xlu0 %659  ;;  %2317 = vmatpush3.bf16.msra.mxu0 %v2314_v46  ;;  %2339 = vmatpush3.bf16.msra.mxu1 %v2314_v46  ;;  %v1346_v46 = vsel %vm1321_vm2, %v2731_v20, %v3114_v31  ;;  %v1348_v31 = vsel %vm1321_vm2, %v2753_v60, %v3122_v3  ;;  %v1350_v3 = vsel %vm1321_vm2, %v2775_v33, %v3130_v19  ;;  %v4482_v33 = vld [vmem:[#allocation24_spill] sm:$0xff] }
  0xf0   : > { %1024 = vrot.lane.b32.xlu1 %v2504_v11, %s2426_s28  ;;  %v1342_v11 = vsel %vm1321_vm2, %v2687_v37, %v3098_v10  ;;  %2319 = vmatprep.subr.bf16.mxu0 %v2318_v36 }
  0xf1   : > { %1054 = vrot.lane.b32.xlu0 %v2687_v37, %s2426_s28  ;;  %v1345_v37 = vsel %vm1321_vm2, %v2703_v53, %v3104_v57  ;;  %2332 = vmatprep.subr.bf16.mxu1 %v2318_v36  ;;  %v2322_v57 = vpack.c.bf16 %v1633_v56, %v1632_v54 }
  0xf2   : > { %v666_v48 = vpop.permute.xlu1 %665 }
  0xf3   : > { %v3327_v63 = vsel %vm1354_vm3, %v1343_v15, %v666_v48  ;;  %v664_v51 = vpop.permute.xlu0 %663  ;;  %2321 = vmatpush3.bf16.msra.mxu0 %v2318_v36  ;;  %2340 = vmatpush3.bf16.msra.mxu1 %v2318_v36 }
  0xf4   : > { %v3330_v38 = vsel %vm1354_vm3, %v1342_v11, %v664_v51  ;;  %1124 = vrot.lane.b32.xlu1 %v2545_v28, %s2427_s11  ;;  %v1344_v28 = vsel %vm1321_vm2, %v2709_v59, %v3106_v49  ;;  %2323 = vmatprep.subr.bf16.mxu0 %v2322_v57  ;;  %v1347_v49 = vsel %vm1321_vm2, %v2725_v26, %v3112_v45 }
  0xf5   : > { %1056 = vrot.lane.b32.xlu0 %v2681_v34, %s2426_s28  ;;  %2333 = vmatprep.subr.bf16.mxu1 %v2322_v57  ;;  %v1349_v45 = vsel %vm1321_vm2, %v2747_v9, %v3120_v62 }
  0xf6   : > { %v670_v10 = vpop.permute.xlu1 %669 }
  0xf7   : > { %v3349_v34 = vsel %vm1354_vm3, %v1345_v37, %v670_v10  ;;  %v668_v39 = vpop.permute.xlu0 %667  ;;  %2325 = vmatpush3.bf16.msra.mxu0 %v2322_v57  ;;  %2341 = vmatpush3.bf16.msra.mxu1 %v2322_v57  ;;  %v4481_v57 = vld [vmem:[#allocation62_spill] sm:$0xff] }
  0xf8   : > { %v3352_v17 = vsel %vm1354_vm3, %v1344_v28, %v668_v39  ;;  %859 = vrot.lane.b32.xlu1 %v4477_v12, %s2424_s26  ;;  %v4479_v28 = vld [vmem:[#allocation61_spill] sm:$0xff]  ;;  %v1352_v19 = vsel %vm1321_vm2, %v4482_v33, %v4481_v57  ;;  %v4490_v57 = vld [vmem:[#allocation44_spill] sm:$0xff] }
  0xf9   : > { %1156 = vrot.lane.b32.xlu0 %v4477_v12, %s2427_s11 }
  0xfa   : > { %v674_v43 = vpop.permute.xlu1 %673 }
  0xfb   : > { %v3365_v15 = vsel %vm1354_vm3, %v1347_v49, %v674_v43  ;;  %v672_v48 = vpop.permute.xlu0 %671 }
  0xfc   : > { %v3368_v1 = vsel %vm1354_vm3, %v1346_v46, %v672_v48  ;;  %1158 = vrot.lane.b32.xlu1 %v4478_v61, %s2427_s11 }
  0xfd   : > { %1126 = vrot.lane.b32.xlu0 %v2540_v25, %s2427_s11  ;;  %v1351_v25 = vsel %vm1321_vm2, %v2769_v41, %v3128_v16  ;;  %v4480_v41 = vld [vmem:[#allocation23_spill] sm:$0xff] }
  0xfe   : > { %v678_v11 = vpop.permute.xlu1 %677  ;;  %v1353_v16 = vsel %vm1321_vm2, %v4480_v41, %v4479_v28  ;;  %v4486_v28 = vld [vmem:[#allocation17_spill] sm:$0xff] }
  0xff   : > { %v3381_v51 = vsel %vm1354_vm3, %v1349_v45, %v678_v11  ;;  %v676_v36 = vpop.permute.xlu0 %675 }
 0x100   : > { %v3384_v37 = vsel %vm1354_vm3, %v1348_v31, %v676_v36  ;;  %1257 = vrot.lane.b32.xlu1 %v2959_v35, %s2428_s21 }
 0x101   : > { %1225 = vrot.lane.b32.xlu0 %v2855_v14, %s2428_s21 }
 0x102   : > { %v682_v62 = vpop.permute.xlu1 %681 }
 0x103   : > { %v3397_v10 = vsel %vm1354_vm3, %v1351_v25, %v682_v62  ;;  %v680_v54 = vpop.permute.xlu0 %679 }
 0x104   : > { %v3400_v56 = vsel %vm1354_vm3, %v1350_v3, %v680_v54  ;;  %928 = vrot.lane.b32.xlu1 %v2855_v14, %s2425_s13  ;;  %v4483_v14 = vld [vmem:[#allocation29_spill] sm:$0xff]  ;;  %v4485_v54 = vld [vmem:[#allocation18_spill] sm:$0xff] }
 0x105   : > { %861 = vrot.lane.b32.xlu0 %v4478_v61, %s2424_s26  ;;  %v4484_v61 = vld [vmem:[#allocation42_spill] sm:$0xff] }
 0x106   : > { %v686_v39 = vpop.permute.xlu1 %685 }
 0x107   : > { %v3413_v12 = vsel %vm1354_vm3, %v1353_v16, %v686_v39  ;;  %v684_v49 = vpop.permute.xlu0 %683 }
 0x108   : > { %v3416_v43 = vsel %vm1354_vm3, %v1352_v19, %v684_v49  ;;  %1227 = vrot.lane.b32.xlu1 %v4483_v14, %s2428_s21 }
 0x109   : > { %960 = vrot.lane.b32.xlu0 %v2959_v35, %s2425_s13 }
 0x10a   : > { %v3422_v46 = vpop.permute.xlu1 %723 }
 0x10b   : > { %v3424_v48 = vpop.permute.xlu0 %721 }
 0x10c   : > { %930 = vrot.lane.b32.xlu1 %v4483_v14, %s2425_s13 }
 0x10d   : > { %1259 = vrot.lane.b32.xlu0 %v4484_v61, %s2428_s21 }
 0x10e   : > { %v3430_v45 = vpop.permute.xlu1 %727 }
 0x10f   : > { %v3432_v11 = vpop.permute.xlu0 %725 }
 0x110   : > { %1026 = vrot.lane.b32.xlu1 %v2534_v24, %s2426_s28 }
 0x111   : > { %962 = vrot.lane.b32.xlu0 %v4484_v61, %s2425_s13  ;;  %v4494_v61 = vld [vmem:[#allocation43_spill] sm:$0xff] }
 0x112   : > { %v732_v35 = vpop.permute.xlu1 %731 }
 0x113   : > { %v3440_v31 = vsel %vm1387_vm4, %v3173_v42, %v732_v35  ;;  %v730_v36 = vpop.permute.xlu0 %729  ;;  %v4495_v35 = vld [vmem:[#allocation30_spill] sm:$0xff] }
 0x114   : > { %v3444_v25 = vsel %vm1387_vm4, %v3176_v8, %v730_v36  ;;  %1028 = vrot.lane.b32.xlu1 %v2528_v22, %s2426_s28 }
 0x115   : > { %1058 = vrot.lane.b32.xlu0 %v2709_v59, %s2426_s28 }
 0x116   : > { %v736_v24 = vpop.permute.xlu1 %735 }
 0x117   : > { %v3452_v62 = vsel %vm1387_vm4, %v3189_v23, %v736_v24  ;;  %v734_v3 = vpop.permute.xlu0 %733 }
 0x118   : > { %v3456_v42 = vsel %vm1387_vm4, %v3192_v58, %v734_v3  ;;  %1128 = vrot.lane.b32.xlu1 %v4475_v55, %s2427_s11 }
 0x119   : > { %1060 = vrot.lane.b32.xlu0 %v2703_v53, %s2426_s28 }
 0x11a   : > { %v740_v22 = vpop.permute.xlu1 %739 }
 0x11b   : > { %v3464_v59 = vsel %vm1387_vm4, %v3211_v21, %v740_v22  ;;  %v738_v8 = vpop.permute.xlu0 %737 }
 0x11c   : > { %v3468_v23 = vsel %vm1387_vm4, %v3214_v30, %v738_v8  ;;  %863 = vrot.lane.b32.xlu1 %v4485_v54, %s2424_s26  ;;  %v4487_v30 = vld [vmem:[#allocation2_spill] sm:$0xff] }
 0x11d   : > { %1160 = vrot.lane.b32.xlu0 %v4485_v54, %s2427_s11 }
 0x11e   : > { %v744_v58 = vpop.permute.xlu1 %743 }
 0x11f   : > { %v3476_v53 = vsel %vm1387_vm4, %v3233_v27, %v744_v58  ;;  %v742_v55 = vpop.permute.xlu0 %741 }
 0x120   : > { %v3480_v21 = vsel %vm1387_vm4, %v3236_v52, %v742_v55  ;;  %1162 = vrot.lane.b32.xlu1 %v4486_v28, %s2427_s11  ;;  %v4491_v52 = vld [vmem:[#allocation31_spill] sm:$0xff] }
 0x121   : > { %1130 = vrot.lane.b32.xlu0 %v4487_v30, %s2427_s11 }
 0x122   : > { %v748_v41 = vpop.permute.xlu1 %747 }
 0x123   : > { %v3488_v16 = vsel %vm1387_vm4, %v3255_v6, %v748_v41  ;;  %v746_v39 = vpop.permute.xlu0 %745 }
 0x124   : > { %4488 = vst [vmem:[#allocation3_spill] sm:$0xff] %v3488_v16  ;;  %v3492_v27 = vsel %vm1387_vm4, %v3258_v0, %v746_v39  ;;  %1261 = vrot.lane.b32.xlu1 %v4490_v57, %s2428_s21 }
 0x125   : > { %4489 = vst [vmem:[#allocation14_spill] sm:$0xff] %v3492_v27  ;;  %1229 = vrot.lane.b32.xlu0 %v4491_v52, %s2428_s21 }
 0x126   : > { %v752_v33 = vpop.permute.xlu1 %751 }
 0x127   : > { %v3500_v19 = vsel %vm1387_vm4, %v3277_v29, %v752_v33  ;;  %v750_v49 = vpop.permute.xlu0 %749 }
 0x128   : > { %4492 = vst [vmem:[#allocation16_spill] sm:$0xff] %v3500_v19  ;;  %v3504_v6 = vsel %vm1387_vm4, %v3280_v13, %v750_v49  ;;  %865 = vrot.lane.b32.xlu1 %v4486_v28, %s2424_s26  ;;  %v3649_v19 = vld [vmem:[%s2478_s22 + $0xc0] sm:$0xff] }
 0x129   : > { %4493 = vst [vmem:[#allocation15_spill] sm:$0xff] %v3504_v6  ;;  %833 = vrot.lane.b32.xlu0 %v4487_v30, %s2424_s26  ;;  %v4511_v6 = vld [vmem:[#allocation50_spill] sm:$0xff] }
 0x12a   : > { %v3510_v0 = vpop.permute.xlu1 %755 }
 0x12b   : > { %v3512_v14 = vpop.permute.xlu0 %753 }
 0x12c   : > { %964 = vrot.lane.b32.xlu1 %v4490_v57, %s2425_s13  ;;  %v4496_v57 = vld [vmem:[#allocation20_spill] sm:$0xff] }
 0x12d   : > { %932 = vrot.lane.b32.xlu0 %v4491_v52, %s2425_s13 }
 0x12e   : > { %v3518_v29 = vpop.permute.xlu1 %759 }
 0x12f   : > { %v3520_v13 = vpop.permute.xlu0 %757 }
 0x130   : > { %1263 = vrot.lane.b32.xlu1 %v4494_v61, %s2428_s21 }
 0x131   : > { %1231 = vrot.lane.b32.xlu0 %v4495_v35, %s2428_s21 }
 0x132   : > { %v764_v36 = vpop.permute.xlu1 %763 }
 0x133   : > { %v3528_v24 = vsel %vm1387_vm4, %v3327_v63, %v764_v36  ;;  %v762_v3 = vpop.permute.xlu0 %761 }
 0x134   : > { %v3532_v22 = vsel %vm1387_vm4, %v3330_v38, %v762_v3  ;;  %966 = vrot.lane.b32.xlu1 %v4494_v61, %s2425_s13  ;;  %v2375_v38 = vld [vmem:[%s2478_s22 + $0x60] sm:$0xff] }
 0x135   : > { %934 = vrot.lane.b32.xlu0 %v4495_v35, %s2425_s13  ;;  %v4502_v35 = vld [vmem:[#allocation19_spill] sm:$0xff] }
 0x136   : > { %v768_v8 = vpop.permute.xlu1 %767 }
 0x137   : > { %v3540_v54 = vsel %vm1387_vm4, %v3349_v34, %v768_v8  ;;  %v766_v58 = vpop.permute.xlu0 %765  ;;  %v4504_v8 = vld [vmem:[#allocation46_spill] sm:$0xff] }
 0x138   : > { %v3544_v63 = vsel %vm1387_vm4, %v3352_v17, %v766_v58  ;;  %1062 = vrot.lane.b32.xlu1 %v2731_v20, %s2426_s28  ;;  %v2376_v17 = vld [vmem:[%s2478_s22 + $0x68] sm:$0xff] }
 0x139   : > { %1030 = vrot.lane.b32.xlu0 %v2375_v38, %s2426_s28 }
 0x13a   : > { %v772_v55 = vpop.permute.xlu1 %771 }
 0x13b   : > { %v3552_v28 = vsel %vm1387_vm4, %v3365_v15, %v772_v55  ;;  %v770_v30 = vpop.permute.xlu0 %769 }
 0x13c   : > { %v3556_v34 = vsel %vm1387_vm4, %v3368_v1, %v770_v30  ;;  %1064 = vrot.lane.b32.xlu1 %v2725_v26, %s2426_s28  ;;  %v4497_v1 = vld [vmem:[#allocation5_spill] sm:$0xff] }
 0x13d   : > { %1032 = vrot.lane.b32.xlu0 %v2376_v17, %s2426_s28 }
 0x13e   : > { %v776_v20 = vpop.permute.xlu1 %775 }
 0x13f   : > { %v3564_v41 = vsel %vm1387_vm4, %v3381_v51, %v776_v20  ;;  %v774_v39 = vpop.permute.xlu0 %773  ;;  %v4506_v20 = vld [vmem:[#allocation45_spill] sm:$0xff] }
 0x140   : > { %v3568_v15 = vsel %vm1387_vm4, %v3384_v37, %v774_v39  ;;  %1164 = vrot.lane.b32.xlu1 %v4496_v57, %s2427_s11  ;;  %v4507_v39 = vld [vmem:[#allocation32_spill] sm:$0xff] }
 0x141   : > { %1132 = vrot.lane.b32.xlu0 %v4497_v1, %s2427_s11 }
 0x142   : > { %v780_v26 = vpop.permute.xlu1 %779 }
 0x143   : > { %v3576_v52 = vsel %vm1387_vm4, %v3397_v10, %v780_v26  ;;  %v778_v33 = vpop.permute.xlu0 %777 }
 0x144   : > { %4498 = vst [vmem:[#allocation61_spill] sm:$0xff] %v3576_v52  ;;  %v3580_v51 = vsel %vm1387_vm4, %v3400_v56, %v778_v33  ;;  %867 = vrot.lane.b32.xlu1 %v4496_v57, %s2424_s26  ;;  %v4503_v56 = vld [vmem:[#allocation4_spill] sm:$0xff] }
 0x145   : > { %4499 = vst [vmem:[#allocation23_spill] sm:$0xff] %v3580_v51  ;;  %835 = vrot.lane.b32.xlu0 %v4497_v1, %s2424_s26  ;;  %v4512_v52 = vld [vmem:[#allocation64_spill] sm:$0xff] }
 0x146   : > { %v784_v37 = vpop.permute.xlu1 %783 }
 0x147   : > { %v3588_v49 = vsel %vm1387_vm4, %v3413_v12, %v784_v37  ;;  %v782_v61 = vpop.permute.xlu0 %781  ;;  %v4505_v12 = vld [vmem:[#allocation33_spill] sm:$0xff] }
 0x148   : > { %4500 = vst [vmem:[#allocation62_spill] sm:$0xff] %v3588_v49  ;;  %v3592_v10 = vsel %vm1387_vm4, %v3416_v43, %v782_v61  ;;  %1166 = vrot.lane.b32.xlu1 %v4502_v35, %s2427_s11  ;;  %v2377_v37 = vld [vmem:[%s2478_s22 + $0x78] sm:$0xff]  ;;  %v4510_v49 = vld [vmem:[#allocation58_spill] sm:$0xff] }
 0x149   : > { %4501 = vst [vmem:[#allocation24_spill] sm:$0xff] %v3592_v10  ;;  %1134 = vrot.lane.b32.xlu0 %v4503_v56, %s2427_s11 }
 0x14a   : > { %v3598_v36 = vpop.permute.xlu1 %825 }
 0x14b   : > { %v824_v3 = vpop.permute.xlu0 %823 }
 0x14c   : > { %1265 = vrot.lane.b32.xlu1 %v4504_v8, %s2428_s21 }
 0x14d   : > { %1233 = vrot.lane.b32.xlu0 %v4505_v12, %s2428_s21 }
 0x14e   : > { %v3604_v58 = vpop.permute.xlu1 %829 }
 0x14f   : > { %v3606_v38 = vpop.permute.xlu0 %827 }
 0x150   : > { %869 = vrot.lane.b32.xlu1 %v4502_v35, %s2424_s26 }
 0x151   : > { %837 = vrot.lane.b32.xlu0 %v4503_v56, %s2424_s26  ;;  %v2378_v56 = vld [vmem:[%s2478_s22 + $0x80] sm:$0xff] }
 0x152   : > { %v856_v43 = vpop.permute.xlu1 %855 }
 0x153   : > { %v3612_v55 = vpop.permute.xlu0 %831 }
 0x154   : > { %968 = vrot.lane.b32.xlu1 %v4504_v8, %s2425_s13 }
 0x155   : > { %936 = vrot.lane.b32.xlu0 %v4505_v12, %s2425_s13 }
 0x156   : > { %v925_v30 = vpop.permute.xlu1 %924 }
 0x157   : > { %v3618_v17 = vpop.permute.xlu0 %857 }
 0x158   : > { %1267 = vrot.lane.b32.xlu1 %v4506_v20, %s2428_s21 }
 0x159   : > { %1235 = vrot.lane.b32.xlu0 %v4507_v39, %s2428_s21 }
 0x15a   : > { %v3624_v57 = vpop.permute.xlu1 %926 }
 0x15b   : > { %v957_v1 = vpop.permute.xlu0 %956 }
 0x15c   : > { %970 = vrot.lane.b32.xlu1 %v4506_v20, %s2425_s13  ;;  %v4508_v20 = vld [vmem:[#allocation22_spill] sm:$0xff] }
 0x15d   : > { %938 = vrot.lane.b32.xlu0 %v4507_v39, %s2425_s13 }
 0x15e   : > { %v1023_v26 = vpop.permute.xlu1 %1022 }
 0x15f   : > { %v3630_v33 = vpop.permute.xlu0 %958 }
 0x160   : > { %1066 = vrot.lane.b32.xlu1 %v2753_v60, %s2426_s28  ;;  %v4509_v60 = vld [vmem:[#allocation7_spill] sm:$0xff] }
 0x161   : > { %1034 = vrot.lane.b32.xlu0 %v2377_v37, %s2426_s28 }
 0x162   : > { %v1025_v61 = vpop.permute.xlu1 %1024 }
 0x163   : > { %v1055_v35 = vpop.permute.xlu0 %1054 }
 0x164   : > { %1068 = vrot.lane.b32.xlu1 %v2747_v9, %s2426_s28  ;;  %v1338_v9 = vsel %vm1321_vm2, %v3649_v19, %v4510_v49 }
 0x165   : > { %1036 = vrot.lane.b32.xlu0 %v2378_v56, %s2426_s28  ;;  %v2380_v56 = vld [vmem:[%s2478_s22] sm:$0xff]  ;;  %v1371_v16 = vsel %vm1354_vm3, %v1338_v9, %v3294_v47 }
 0x166   : > { %v1125_v8 = vpop.permute.xlu1 %1124  ;;  %v1322_v10 = vsel %vm1321_vm2, %v2380_v56, %v4511_v6  ;;  %v1404_v49 = vsel %vm1387_vm4, %v1371_v16, %v3512_v14 }
 0x167   : > { %v3640_v12 = vpop.permute.xlu0 %1056  ;;  %v1355_v27 = vsel %vm1354_vm3, %v1322_v10, %v4512_v52  ;;  %v1437_v6 = vsel %vm1420_vm5, %v1404_v49, %v856_v43  ;;  %v4513_v52 = vld [vmem:[#allocation21_spill] sm:$0xff]  ;;  %v2381_v49 = vld [vmem:[%s2478_s22 + $0x8] sm:$0xff] }
 0x168   : > { %1168 = vrot.lane.b32.xlu1 %v4508_v20, %s2427_s11 }
 0x169   : > { %1136 = vrot.lane.b32.xlu0 %v4509_v60, %s2427_s11 }
 0x16a   : > { %v3646_v39 = vpop.permute.xlu1 %859 }
 0x16b   : > { %v1157_v37 = vpop.permute.xlu0 %1156 }
 0x16c   : > { %871 = vrot.lane.b32.xlu1 %v4508_v20, %s2424_s26  ;;  %v1388_v20 = vsel %vm1387_vm4, %v1355_v27, %v3424_v48  ;;  %v4514_v48 = vld [vmem:[#allocation6_spill] sm:$0xff] }
 0x16d   : > { %839 = vrot.lane.b32.xlu0 %v4509_v60, %s2424_s26  ;;  %v1421_v47 = vsel %vm1420_vm5, %v1388_v20, %v824_v3  ;;  %v1470_v60 = vsel %vm1453_vm6, %v1437_v6, %v957_v1  ;;  %v4515_v20 = vld [vmem:[#allocation54_spill] sm:$0xff] }
 0x16e   : > { %v1159_v51 = vpop.permute.xlu1 %1158  ;;  %v1454_v16 = vsel %vm1453_vm6, %v1421_v47, %v925_v30  ;;  %v1503_v14 = vsel %vm1486_vm7, %v1470_v60, %v1055_v35  ;;  %v1323_v30 = vsel %vm1321_vm2, %v2381_v49, %v4515_v20  ;;  %v4516_v35 = vld [vmem:[#allocation49_spill] sm:$0xff] }
 0x16f   : > { %v1127_v56 = vpop.permute.xlu0 %1126  ;;  %v1487_v27 = vsel %vm1486_vm7, %v1454_v16, %v1023_v26  ;;  %v1536_v10 = vsel %vm1519_vm8, %v1503_v14, %v1157_v37  ;;  %v4517_v26 = vld [vmem:[#allocation63_spill] sm:$0xff] }
 0x170   : > { %1170 = vrot.lane.b32.xlu1 %v4513_v52, %s2427_s11  ;;  %v1520_v43 = vsel %vm1519_vm8, %v1487_v27, %v1125_v8  ;;  %v1356_v37 = vsel %vm1354_vm3, %v1323_v30, %v4517_v26  ;;  %v4518_v8 = vld [vmem:[#allocation35_spill] sm:$0xff]  ;;  %v2383_v26 = vld [vmem:[%s2478_s22 + $0x150] sm:$0xff] }
 0x171   : > { %1138 = vrot.lane.b32.xlu0 %v4514_v48, %s2427_s11  ;;  %v1389_v47 = vsel %vm1387_vm4, %v1356_v37, %v3422_v46  ;;  %v4520_v30 = vld [vmem:[#allocation47_spill] sm:$0xff]  ;;  %v2384_v37 = vld [vmem:[%s2478_s22 + $0x90] sm:$0xff] }
 0x172   : > { %v1258_v3 = vpop.permute.xlu1 %1257  ;;  %v1422_v16 = vsel %vm1420_vm5, %v1389_v47, %v3598_v36 }
 0x173   : > { %v1226_v1 = vpop.permute.xlu0 %1225  ;;  %v1569_v9 = vsel %vm1552_vm9, %v1536_v10, %v1258_v3  ;;  %v1455_v27 = vsel %vm1453_vm6, %v1422_v16, %v3624_v57  ;;  %v3707_v10 = vld [vmem:[%s2478_s22 + $0xc8] sm:$0xff]  ;;  %v4519_v3 = vld [vmem:[#allocation57_spill] sm:$0xff] }
 0x174   : > { %1269 = vrot.lane.b32.xlu1 %v4516_v35, %s2428_s21  ;;  %v1553_v6 = vsel %vm1552_vm9, %v1520_v43, %v1226_v1  ;;  %2270 = vmatprep.mubr.msk.f32.mxu1 %vm1585_vm10, %v1569_v9  ;;  %v1339_v43 = vsel %vm1321_vm2, %v3707_v10, %v4519_v3  ;;  %v1488_v46 = vsel %vm1486_vm7, %v1455_v27, %v1025_v61  ;;  %v2385_v16 = vld [vmem:[%s2478_s22 + $0x158] sm:$0xff] }
 0x175   : > { %1237 = vrot.lane.b32.xlu0 %v4518_v8, %s2428_s21  ;;  %2246 = vmatprep.mubr.msk.f32.mxu0 %vm1585_vm10, %v1553_v6  ;;  %v1372_v36 = vsel %vm1354_vm3, %v1339_v43, %v3286_v40  ;;  %v1521_v1 = vsel %vm1519_vm8, %v1488_v46, %v1127_v56  ;;  %v2386_v27 = vld [vmem:[%s2478_s22 + $0x98] sm:$0xff] }
 0x176   : > { %v3696_v60 = vpop.permute.xlu1 %928  ;;  %v3760_v46 = vld [vmem:[%s2478_s22 + $0xd8] sm:$0xff] }
 0x177   : > { %v3700_v14 = vpop.permute.xlu0 %861 }
 0x178   : > { %873 = vrot.lane.b32.xlu1 %v4513_v52, %s2424_s26  ;;  %v1405_v52 = vsel %vm1387_vm4, %v1372_v36, %v3510_v0  ;;  %v4522_v36 = vld [vmem:[#allocation60_spill] sm:$0xff] }
 0x179   : > { %841 = vrot.lane.b32.xlu0 %v4514_v48, %s2424_s26  ;;  %v1438_v20 = vsel %vm1420_vm5, %v1405_v52, %v3618_v17  ;;  %v2388_v52 = vld [vmem:[%s2478_s22 + $0x18] sm:$0xff] }
 0x17a   : > { %v1228_v57 = vpop.permute.xlu1 %1227  ;;  %v1471_v40 = vsel %vm1453_vm6, %v1438_v20, %v3630_v33  ;;  %v4521_v33 = vld [vmem:[#allocation34_spill] sm:$0xff] }
 0x17b   : > { %v1554_v9 = vsel %vm1552_vm9, %v1521_v1, %v1228_v57  ;;  %v961_v49 = vpop.permute.xlu0 %960  ;;  %v1504_v0 = vsel %vm1486_vm7, %v1471_v40, %v3640_v12  ;;  %v1340_v1 = vsel %vm1321_vm2, %v3760_v46, %v4522_v36  ;;  %v4523_v57 = vld [vmem:[#allocation26_spill] sm:$0xff] }
 0x17c   : > { %972 = vrot.lane.b32.xlu1 %v4516_v35, %s2425_s13  ;;  %2247 = vmatmul.mubr.msk.f32.vlgmr.msra.gmra.mrb[0].mxu0 %vm1585_vm10, %v1554_v9  ;;  %v1537_v17 = vsel %vm1519_vm8, %v1504_v0, %v1159_v51  ;;  %v4524_v9 = vld [vmem:[#allocation48_spill] sm:$0xff]  ;;  %v1373_v40 = vsel %vm1354_vm3, %v1340_v1, %v3308_v32  ;;  %v4525_v0 = vld [vmem:[#allocation9_spill] sm:$0xff] }
 0x17d   : > { %940 = vrot.lane.b32.xlu0 %v4518_v8, %s2425_s13  ;;  %v1324_v20 = vsel %vm1321_vm2, %v2388_v52, %v4524_v9  ;;  %v4529_v52 = vld [vmem:[#allocation59_spill] sm:$0xff] }
 0x17e   : > { %v3732_v61 = vpop.permute.xlu1 %930 }
 0x17f   : > { %v1260_v56 = vpop.permute.xlu0 %1259 }
 0x180   : > { %v1570_v48 = vsel %vm1552_vm9, %v1537_v17, %v1260_v56  ;;  %1271 = vrot.lane.b32.xlu1 %v4520_v30, %s2428_s21  ;;  %v4526_v17 = vld [vmem:[#allocation66_spill] sm:$0xff] }
 0x181   : > { %1239 = vrot.lane.b32.xlu0 %v4521_v33, %s2428_s21  ;;  %2271 = vmatmul.mubr.msk.f32.vlgmr.msra.gmra.mrb[0].mxu1 %vm1585_vm10, %v1570_v48  ;;  %v1357_v56 = vsel %vm1354_vm3, %v1324_v20, %v4526_v17  ;;  %v1406_v48 = vsel %vm1387_vm4, %v1373_v40, %v3520_v13  ;;  %v4530_v20 = vld [vmem:[#allocation53_spill] sm:$0xff]  ;;  %v2390_v40 = vld [vmem:[%s2478_s22 + $0x20] sm:$0xff] }
 0x182   : > { %v1027_v35 = vpop.permute.xlu1 %1026 }
 0x183   : > { %v3741_v12 = vpop.permute.xlu0 %962 }
 0x184   : > { %974 = vrot.lane.b32.xlu1 %v4520_v30, %s2425_s13 }
 0x185   : > { %942 = vrot.lane.b32.xlu0 %v4521_v33, %s2425_s13  ;;  %v1390_v33 = vsel %vm1387_vm4, %v1357_v56, %v3432_v11 }
 0x186   : > { %v3747_v51 = vpop.permute.xlu1 %1028  ;;  %v1423_v32 = vsel %vm1420_vm5, %v1390_v33, %v3606_v38  ;;  %v4533_v33 = vld [vmem:[#allocation65_spill] sm:$0xff] }
 0x187   : > { %v1059_v6 = vpop.permute.xlu0 %1058 }
 0x188   : > { %1070 = vrot.lane.b32.xlu1 %v2383_v26, %s2426_s28  ;;  %v1439_v26 = vsel %vm1420_vm5, %v1406_v48, %v3646_v39  ;;  %v4532_v48 = vld [vmem:[#allocation37_spill] sm:$0xff] }
 0x189   : > { %1038 = vrot.lane.b32.xlu0 %v2384_v37, %s2426_s28 }
 0x18a   : > { %v1129_v8 = vpop.permute.xlu1 %1128 }
 0x18b   : > { %v1061_v47 = vpop.permute.xlu0 %1060 }
 0x18c   : > { %1072 = vrot.lane.b32.xlu1 %v2385_v16, %s2426_s28  ;;  %v1472_v16 = vsel %vm1453_vm6, %v1439_v26, %v961_v49 }
 0x18d   : > { %1040 = vrot.lane.b32.xlu0 %v2386_v27, %s2426_s28  ;;  %v1456_v27 = vsel %vm1453_vm6, %v1423_v32, %v3696_v60  ;;  %v1505_v13 = vsel %vm1486_vm7, %v1472_v16, %v1059_v6  ;;  %v4527_v60 = vld [vmem:[#allocation25_spill] sm:$0xff]  ;;  %v4528_v6 = vld [vmem:[#allocation8_spill] sm:$0xff] }
 0x18e   : > { %v3757_v3 = vpop.permute.xlu1 %863  ;;  %v1489_v11 = vsel %vm1486_vm7, %v1456_v27, %v1027_v35 }
 0x18f   : > { %v1161_v43 = vpop.permute.xlu0 %1160  ;;  %v1522_v49 = vsel %vm1519_vm8, %v1489_v11, %v1129_v8  ;;  %v3808_v8 = vld [vmem:[%s2478_s22 + $0xe0] sm:$0xff] }
 0x190   : > { %1172 = vrot.lane.b32.xlu1 %v4523_v57, %s2427_s11  ;;  %v1538_v39 = vsel %vm1519_vm8, %v1505_v13, %v1161_v43  ;;  %v1341_v9 = vsel %vm1321_vm2, %v3808_v8, %v4529_v52  ;;  %v2391_v52 = vld [vmem:[%s2478_s22 + $0x168] sm:$0xff] }
 0x191   : > { %1140 = vrot.lane.b32.xlu0 %v4525_v0, %s2427_s11  ;;  %v1374_v56 = vsel %vm1354_vm3, %v1341_v9, %v3300_v2  ;;  %v2392_v9 = vld [vmem:[%s2478_s22 + $0xa8] sm:$0xff] }
 0x192   : > { %v1163_v30 = vpop.permute.xlu1 %1162  ;;  %v1407_v32 = vsel %vm1387_vm4, %v1374_v56, %v3518_v29 }
 0x193   : > { %v1131_v37 = vpop.permute.xlu0 %1130  ;;  %v1440_v13 = vsel %vm1420_vm5, %v1407_v32, %v3700_v14 }
 0x194   : > { %875 = vrot.lane.b32.xlu1 %v4523_v57, %s2424_s26 }
 0x195   : > { %843 = vrot.lane.b32.xlu0 %v4525_v0, %s2424_s26  ;;  %v4531_v0 = vld [vmem:[#allocation52_spill] sm:$0xff] }
 0x196   : > { %v1262_v38 = vpop.permute.xlu1 %1261  ;;  %v1325_v17 = vsel %vm1321_vm2, %v2390_v40, %v4531_v0  ;;  %v2393_v0 = vld [vmem:[%s2478_s22 + $0x170] sm:$0xff] }
 0x197   : > { %v1571_v36 = vsel %vm1552_vm9, %v1538_v39, %v1262_v38  ;;  %v1230_v1 = vpop.permute.xlu0 %1229  ;;  %v1358_v26 = vsel %vm1354_vm3, %v1325_v17, %v4533_v33  ;;  %v1473_v39 = vsel %vm1453_vm6, %v1440_v13, %v3741_v12  ;;  %v2394_v17 = vld [vmem:[%s2478_s22 + $0xb0] sm:$0xff] }
 0x198   : > { %v1555_v57 = vsel %vm1552_vm9, %v1522_v49, %v1230_v1  ;;  %1174 = vrot.lane.b32.xlu1 %v4527_v60, %s2427_s11  ;;  %2273 = vmatprep.mubr.msk.f32.mxu1 %vm1585_vm10, %v1571_v36  ;;  %v1391_v27 = vsel %vm1387_vm4, %v1358_v26, %v3430_v45  ;;  %v1506_v38 = vsel %vm1486_vm7, %v1473_v39, %v1061_v47  ;;  %v4534_v47 = vld [vmem:[#allocation51_spill] sm:$0xff]  ;;  %v4536_v33 = vld [vmem:[#allocation28_spill] sm:$0xff] }
 0x199   : > { %1142 = vrot.lane.b32.xlu0 %v4528_v6, %s2427_s11  ;;  %2249 = vmatprep.mubr.msk.f32.mxu0 %vm1585_vm10, %v1555_v57  ;;  %v1424_v2 = vsel %vm1420_vm5, %v1391_v27, %v3604_v58  ;;  %v1539_v14 = vsel %vm1519_vm8, %v1506_v38, %v1163_v30  ;;  %v4535_v30 = vld [vmem:[#allocation36_spill] sm:$0xff]  ;;  %v4537_v26 = vld [vmem:[#allocation11_spill] sm:$0xff]  ;;  %v1441_v27 = vsel %vm1420_vm5, %v3532_v22, %v3757_v3 }
 0x19a   : > { %v3803_v35 = vpop.permute.xlu1 %865  ;;  %v1457_v29 = vsel %vm1453_vm6, %v1424_v2, %v3732_v61  ;;  %v1425_v2 = vsel %vm1420_vm5, %v3444_v25, %v3612_v55 }
 0x19b   : > { %v3805_v43 = vpop.permute.xlu0 %833  ;;  %v1490_v45 = vsel %vm1486_vm7, %v1457_v29, %v3747_v51 }
 0x19c   : > { %1273 = vrot.lane.b32.xlu1 %v4530_v20, %s2428_s21  ;;  %v1523_v49 = vsel %vm1519_vm8, %v1490_v45, %v1131_v37 }
 0x19d   : > { %1241 = vrot.lane.b32.xlu0 %v4532_v48, %s2428_s21 }
 0x19e   : > { %v965_v16 = vpop.permute.xlu1 %964 }
 0x19f   : > { %v933_v11 = vpop.permute.xlu0 %932  ;;  %v1474_v39 = vsel %vm1453_vm6, %v1441_v27, %v965_v16 }
 0x1a0   : > { %877 = vrot.lane.b32.xlu1 %v4527_v60, %s2424_s26  ;;  %v1458_v29 = vsel %vm1453_vm6, %v1425_v2, %v933_v11  ;;  %v4539_v11 = vld [vmem:[#allocation10_spill] sm:$0xff]  ;;  %v818_v2 = vrot.slane %v3167_v5, 1 }
 0x1a1   : > { %845 = vrot.lane.b32.xlu0 %v4528_v6, %s2424_s26 }
 0x1a2   : > { %v1264_v58 = vpop.permute.xlu1 %1263 }
 0x1a3   : > { %v1572_v12 = vsel %vm1552_vm9, %v1539_v14, %v1264_v58  ;;  %v1232_v36 = vpop.permute.xlu0 %1231  ;;  %v4538_v58 = vld [vmem:[#allocation27_spill] sm:$0xff] }
 0x1a4   : > { %v1556_v1 = vsel %vm1552_vm9, %v1523_v49, %v1232_v36  ;;  %976 = vrot.lane.b32.xlu1 %v4530_v20, %s2425_s13  ;;  %2274 = vmatmul.mubr.msk.f32.gmra.mrb[2].mxu1 %vm1585_vm10, %v1572_v12  ;;  %v4540_v36 = vld [vmem:[#allocation56_spill] sm:$0xff] }
 0x1a5   : > { %944 = vrot.lane.b32.xlu0 %v4532_v48, %s2425_s13  ;;  %2250 = vmatmul.mubr.msk.f32.gmra.mrb[2].mxu0 %vm1585_vm10, %v1556_v1  ;;  %v4541_v1 = vld [vmem:[#allocation39_spill] sm:$0xff] }
 0x1a6   : > { %v967_v61 = vpop.permute.xlu1 %966 }
 0x1a7   : > { %v935_v51 = vpop.permute.xlu0 %934 }
 0x1a8   : > { %1275 = vrot.lane.b32.xlu1 %v4534_v47, %s2428_s21 }
 0x1a9   : > { %1243 = vrot.lane.b32.xlu0 %v4535_v30, %s2428_s21 }
 0x1aa   : > { %v1063_v37 = vpop.permute.xlu1 %1062 }
 0x1ab   : > { %v1031_v57 = vpop.permute.xlu0 %1030  ;;  %v1507_v38 = vsel %vm1486_vm7, %v1474_v39, %v1063_v37 }
 0x1ac   : > { %978 = vrot.lane.b32.xlu1 %v4534_v47, %s2425_s13  ;;  %v1491_v45 = vsel %vm1486_vm7, %v1458_v29, %v1031_v57  ;;  %v1426_v57 = vsel %vm1420_vm5, %v3440_v31, %v3805_v43 }
 0x1ad   : > { %946 = vrot.lane.b32.xlu0 %v4535_v30, %s2425_s13  ;;  %v1442_v30 = vsel %vm1420_vm5, %v3528_v24, %v3803_v35 }
 0x1ae   : > { %v1065_v60 = vpop.permute.xlu1 %1064 }
 0x1af   : > { %v1033_v6 = vpop.permute.xlu0 %1032 }
 0x1b0   : > { %1074 = vrot.lane.b32.xlu1 %v2391_v52, %s2426_s28  ;;  %v1475_v52 = vsel %vm1453_vm6, %v1442_v30, %v967_v61 }
 0x1b1   : > { %1042 = vrot.lane.b32.xlu0 %v2392_v9, %s2426_s28  ;;  %v1459_v9 = vsel %vm1453_vm6, %v1426_v57, %v935_v51 }
 0x1b2   : > { %v1165_v20 = vpop.permute.xlu1 %1164 }
 0x1b3   : > { %v1133_v40 = vpop.permute.xlu0 %1132  ;;  %v1540_v22 = vsel %vm1519_vm8, %v1507_v38, %v1165_v20  ;;  %v1508_v20 = vsel %vm1486_vm7, %v1475_v52, %v1065_v60 }
 0x1b4   : > { %1076 = vrot.lane.b32.xlu1 %v2393_v0, %s2426_s28  ;;  %v1524_v14 = vsel %vm1519_vm8, %v1491_v45, %v1133_v40  ;;  %v1492_v40 = vsel %vm1486_vm7, %v1459_v9, %v1033_v6  ;;  %v4542_v6 = vld [vmem:[#allocation55_spill] sm:$0xff] }
 0x1b5   : > { %1044 = vrot.lane.b32.xlu0 %v2394_v17, %s2426_s28  ;;  %v4543_v17 = vld [vmem:[#allocation38_spill] sm:$0xff] }
 0x1b6   : > { %v3869_v56 = vpop.permute.xlu1 %867 }
 0x1b7   : > { %v3871_v48 = vpop.permute.xlu0 %835 }
 0x1b8   : > { %1176 = vrot.lane.b32.xlu1 %v4536_v33, %s2427_s11 }
 0x1b9   : > { %1144 = vrot.lane.b32.xlu0 %v4537_v26, %s2427_s11 }
 0x1ba   : > { %v1167_v32 = vpop.permute.xlu1 %1166 }
 0x1bb   : > { %v1135_v13 = vpop.permute.xlu0 %1134  ;;  %v1541_v24 = vsel %vm1519_vm8, %v1508_v20, %v1167_v32 }
 0x1bc   : > { %879 = vrot.lane.b32.xlu1 %v4536_v33, %s2424_s26  ;;  %v1525_v0 = vsel %vm1519_vm8, %v1492_v40, %v1135_v13  ;;  %v819_v13 = vrot.slane %v3161_v4, 1 }
 0x1bd   : > { %847 = vrot.lane.b32.xlu0 %v4537_v26, %s2424_s26 }
 0x1be   : > { %v1266_v3 = vpop.permute.xlu1 %1265  ;;  %v820_v38 = vsel %vm365_vm0, %v818_v2, %v819_v13 }
 0x1bf   : > { %v1573_v25 = vsel %vm1552_vm9, %v1540_v22, %v1266_v3  ;;  %v1234_v55 = vpop.permute.xlu0 %1233  ;;  %v313_v22 = vld [vmem:[%s2478_s22 + $0x190] sm:$0x3] }
 0x1c0   : > { %v1557_v16 = vsel %vm1552_vm9, %v1524_v14, %v1234_v55  ;;  %1178 = vrot.lane.b32.xlu1 %v4538_v58, %s2427_s11  ;;  %2276 = vmatprep.mubr.msk.f32.mxu1 %vm1585_vm10, %v1573_v25  ;;  %v2395_v25 = vld [vmem:[%s2478_s22 + $0x188] sm:$0xff] }
 0x1c1   : > { %1146 = vrot.lane.b32.xlu0 %v4539_v11, %s2427_s11  ;;  %2252 = vmatprep.mubr.msk.f32.mxu0 %vm1585_vm10, %v1557_v16  ;;  %v920_v55 = vrot.slane %v2395_v25, 2  ;;  %v1427_v16 = vsel %vm1420_vm5, %v3456_v42, %v3871_v48 }
 0x1c2   : > { %v3901_v49 = vpop.permute.xlu1 %869 }
 0x1c3   : > { %v3903_v12 = vpop.permute.xlu0 %837 }
 0x1c4   : > { %1277 = vrot.lane.b32.xlu1 %v4540_v36, %s2428_s21 }
 0x1c5   : > { %1245 = vrot.lane.b32.xlu0 %v4541_v1, %s2428_s21 }
 0x1c6   : > { %v969_v47 = vpop.permute.xlu1 %968 }
 0x1c7   : > { %v937_v37 = vpop.permute.xlu0 %936 }
 0x1c8   : > { %881 = vrot.lane.b32.xlu1 %v4538_v58, %s2424_s26 }
 0x1c9   : > { %849 = vrot.lane.b32.xlu0 %v4539_v11, %s2424_s26  ;;  %v2396_v11 = vld [vmem:[%s2478_s22 + $0x180] sm:$0xff] }
 0x1ca   : > { %v1268_v35 = vpop.permute.xlu1 %1267 }
 0x1cb   : > { %v1574_v31 = vsel %vm1552_vm9, %v1541_v24, %v1268_v35  ;;  %v1236_v43 = vpop.permute.xlu0 %1235  ;;  %v4546_v35 = vld [vmem:[#allocation41_spill] sm:$0xff] }
 0x1cc   : > { %v1558_v61 = vsel %vm1552_vm9, %v1525_v0, %v1236_v43  ;;  %980 = vrot.lane.b32.xlu1 %v4540_v36, %s2425_s13  ;;  %2277 = vmatmul.mubr.msk.f32.gmra.mrb[4].mxu1 %vm1585_vm10, %v1574_v31  ;;  %v919_v36 = vrot.slane %v2396_v11, 2  ;;  %v1444_v31 = vsel %vm1420_vm5, %v3540_v54, %v3901_v49 }
 0x1cd   : > { %948 = vrot.lane.b32.xlu0 %v4541_v1, %s2425_s13  ;;  %2253 = vmatmul.mubr.msk.f32.gmra.mrb[4].mxu0 %vm1585_vm10, %v1558_v61  ;;  %v1460_v1 = vsel %vm1453_vm6, %v1427_v16, %v937_v37  ;;  %v4545_v37 = vld [vmem:[#allocation12_spill] sm:$0xff]  ;;  %v1428_v61 = vsel %vm1420_vm5, %v3452_v62, %v3903_v12 }
 0x1ce   : > { %v971_v51 = vpop.permute.xlu1 %970  ;;  %v921_v20 = vsel %vm542_vm1, %v919_v36, %v920_v55 }
 0x1cf   : > { %v939_v60 = vpop.permute.xlu0 %938 }
 0x1d0   : > { %1279 = vrot.lane.b32.xlu1 %v4542_v6, %s2428_s21 }
 0x1d1   : > { %1247 = vrot.lane.b32.xlu0 %v4543_v17, %s2428_s21 }
 0x1d2   : > { %v1067_v33 = vpop.permute.xlu1 %1066 }
 0x1d3   : > { %v1035_v26 = vpop.permute.xlu0 %1034 }
 0x1d4   : > { %982 = vrot.lane.b32.xlu1 %v4542_v6, %s2425_s13  ;;  %v1477_v6 = vsel %vm1453_vm6, %v1444_v31, %v971_v51 }
 0x1d5   : > { %950 = vrot.lane.b32.xlu0 %v4543_v17, %s2425_s13  ;;  %v1461_v17 = vsel %vm1453_vm6, %v1428_v61, %v939_v60 }
 0x1d6   : > { %v1069_v32 = vpop.permute.xlu1 %1068 }
 0x1d7   : > { %v1037_v27 = vpop.permute.xlu0 %1036 }
 0x1d8   : > { %1078 = vrot.lane.b32.xlu1 %v3167_v5, %s2426_s28  ;;  %v4544_v5 = vld [vmem:[#allocation13_spill] sm:$0xff] }
 0x1d9   : > { %1046 = vrot.lane.b32.xlu0 %v3649_v19, %s2426_s28  ;;  %v821_v19 = vrot.slane %v313_v22, 1 }
 0x1da   : > { %v1169_v39 = vpop.permute.xlu1 %1168 }
 0x1db   : > { %v1137_v29 = vpop.permute.xlu0 %1136 }
 0x1dc   : > { %1080 = vrot.lane.b32.xlu1 %v3161_v4, %s2426_s28  ;;  %v1443_v4 = vsel %vm1420_vm5, %v3544_v63, %v3869_v56  ;;  %v822_v63 = vsel %vm365_vm0, %v819_v13, %v821_v19  ;;  %v1493_v56 = vsel %vm1486_vm7, %v1460_v1, %v1035_v26  ;;  %v922_v26 = vrot.slane %v313_v22, 2  ;;  %v314_v22 = vld [vmem:[%s2478_s22 + $0x198] sm:$0xff]  ;;  %v315_v19 = vld [vmem:[%s2478_s22 + $0x1a0] sm:$0xff] }
 0x1dd   : > { %1048 = vrot.lane.b32.xlu0 %v3707_v10, %s2426_s28  ;;  %v1476_v58 = vsel %vm1453_vm6, %v1443_v4, %v969_v47  ;;  %v1526_v48 = vsel %vm1519_vm8, %v1493_v56, %v1137_v29  ;;  %v1494_v13 = vsel %vm1486_vm7, %v1461_v17, %v1037_v27  ;;  %v1119_v4 = vrot.slane %v314_v22, 1 }
 0x1de   : > { %v3952_v45 = vpop.permute.xlu1 %871  ;;  %v1509_v30 = vsel %vm1486_vm7, %v1476_v58, %v1067_v33  ;;  %v1510_v33 = vsel %vm1486_vm7, %v1477_v6, %v1069_v32  ;;  %v923_v60 = vsel %vm542_vm1, %v920_v55, %v922_v26  ;;  %v316_v55 = vld [vmem:[%s2478_s22 + $0x1a8] sm:$0x3] }
 0x1df   : > { %v3955_v3 = vpop.permute.xlu0 %839  ;;  %v1542_v57 = vsel %vm1519_vm8, %v1509_v30, %v1169_v39  ;;  %v4547_v39 = vld [vmem:[#allocation40_spill] sm:$0xff]  ;;  %v1122_v11 = vrot.slane %v316_v55, 1  ;;  %v1220_v30 = vrot.slane %v314_v22, 2 }
 0x1e0   : > { %1180 = vrot.lane.b32.xlu1 %v820_v38, %s2427_s11 }
 0x1e1   : > { %1148 = vrot.lane.b32.xlu0 %v4544_v5, %s2427_s11 }
 0x1e2   : > { %v1171_v14 = vpop.permute.xlu1 %1170 }
 0x1e3   : > { %v1139_v10 = vpop.permute.xlu0 %1138  ;;  %v1543_v54 = vsel %vm1519_vm8, %v1510_v33, %v1171_v14 }
 0x1e4   : > { %883 = vrot.lane.b32.xlu1 %v820_v38, %s2424_s26  ;;  %v1527_v2 = vsel %vm1519_vm8, %v1494_v13, %v1139_v10  ;;  %v1120_v10 = vrot.slane %v315_v19, 1 }
 0x1e5   : > { %851 = vrot.lane.b32.xlu0 %v4544_v5, %s2424_s26 }
 0x1e6   : > { %v1270_v42 = vpop.permute.xlu1 %1269  ;;  %v1121_v58 = vsel %vm365_vm0, %v1119_v4, %v1120_v10 }
 0x1e7   : > { %v1575_v47 = vsel %vm1552_vm9, %v1542_v57, %v1270_v42  ;;  %v1238_v52 = vpop.permute.xlu0 %1237  ;;  %v1429_v42 = vsel %vm1420_vm5, %v3468_v23, %v3955_v3 }
 0x1e8   : > { %v1559_v9 = vsel %vm1552_vm9, %v1526_v48, %v1238_v52  ;;  %1182 = vrot.lane.b32.xlu1 %v822_v63, %s2427_s11  ;;  %2279 = vmatprep.mubr.msk.f32.mxu1 %vm1585_vm10, %v1575_v47 }
 0x1e9   : > { %1150 = vrot.lane.b32.xlu0 %v4545_v37, %s2427_s11  ;;  %2255 = vmatprep.mubr.msk.f32.mxu0 %vm1585_vm10, %v1559_v9  ;;  %v1223_v9 = vrot.slane %v316_v55, 2 }
 0x1ea   : > { %v3986_v40 = vpop.permute.xlu1 %873 }
 0x1eb   : > { %v3988_v24 = vpop.permute.xlu0 %841  ;;  %v1446_v61 = vsel %vm1420_vm5, %v3552_v28, %v3986_v40 }
 0x1ec   : > { %1281 = vrot.lane.b32.xlu1 %v921_v20, %s2428_s21 }
 0x1ed   : > { %1249 = vrot.lane.b32.xlu0 %v4546_v35, %s2428_s21 }
 0x1ee   : > { %v973_v0 = vpop.permute.xlu1 %972 }
 0x1ef   : > { %v941_v43 = vpop.permute.xlu0 %940 }
 0x1f0   : > { %885 = vrot.lane.b32.xlu1 %v822_v63, %s2424_s26  ;;  %v1221_v63 = vrot.slane %v315_v19, 2  ;;  %v1462_v47 = vsel %vm1453_vm6, %v1429_v42, %v941_v43 }
 0x1f1   : > { %853 = vrot.lane.b32.xlu0 %v4545_v37, %s2424_s26 }
 0x1f2   : > { %v1272_v49 = vpop.permute.xlu1 %1271  ;;  %v1222_v52 = vsel %vm542_vm1, %v1220_v30, %v1221_v63 }
 0x1f3   : > { %v1576_v62 = vsel %vm1552_vm9, %v1543_v54, %v1272_v49  ;;  %v1240_v12 = vpop.permute.xlu0 %1239 }
 0x1f4   : > { %v1560_v51 = vsel %vm1552_vm9, %v1527_v2, %v1240_v12  ;;  %984 = vrot.lane.b32.xlu1 %v921_v20, %s2425_s13  ;;  %2280 = vmatmul.mubr.msk.f32.gmra.mrb[6].mxu1 %vm1585_vm10, %v1576_v62 }
 0x1f5   : > { %952 = vrot.lane.b32.xlu0 %v4546_v35, %s2425_s13  ;;  %2256 = vmatmul.mubr.msk.f32.gmra.mrb[6].mxu0 %vm1585_vm10, %v1560_v51 }
 0x1f6   : > { %v975_v32 = vpop.permute.xlu1 %974 }
 0x1f7   : > { %v943_v27 = vpop.permute.xlu0 %942  ;;  %v1479_v17 = vsel %vm1453_vm6, %v1446_v61, %v975_v32 }
 0x1f8   : > { %1283 = vrot.lane.b32.xlu1 %v923_v60, %s2428_s21 }
 0x1f9   : > { %1251 = vrot.lane.b32.xlu0 %v4547_v39, %s2428_s21 }
 0x1fa   : > { %v1071_v29 = vpop.permute.xlu1 %1070 }
 0x1fb   : > { %v1039_v38 = vpop.permute.xlu0 %1038 }
 0x1fc   : > { %986 = vrot.lane.b32.xlu1 %v923_v60, %s2425_s13 }
 0x1fd   : > { %954 = vrot.lane.b32.xlu0 %v4547_v39, %s2425_s13 }
 0x1fe   : > { %v1073_v5 = vpop.permute.xlu1 %1072 }
 0x1ff   : > { %v1041_v14 = vpop.permute.xlu0 %1040  ;;  %v1512_v26 = vsel %vm1486_vm7, %v1479_v17, %v1073_v5 }
 0x200   : > { %1082 = vrot.lane.b32.xlu1 %v314_v22, %s2426_s28 }
 0x201   : > { %1050 = vrot.lane.b32.xlu0 %v3760_v46, %s2426_s28  ;;  %v1123_v46 = vsel %vm365_vm0, %v1120_v10, %v1122_v11 }
 0x202   : > { %v1173_v25 = vpop.permute.xlu1 %1172 }
 0x203   : > { %v1141_v16 = vpop.permute.xlu0 %1140 }
 0x204   : > { %1084 = vrot.lane.b32.xlu1 %v315_v19, %s2426_s28 }
 0x205   : > { %1052 = vrot.lane.b32.xlu0 %v3808_v8, %s2426_s28  ;;  %v1445_v8 = vsel %vm1420_vm5, %v3556_v34, %v3952_v45  ;;  %v1495_v34 = vsel %vm1486_vm7, %v1462_v47, %v1039_v38  ;;  %s4135_s28 = scalar_lea.vmem %s4309_s4, %s2165_s24 }
 0x206   : > { %v876_v36 = vpop.permute.xlu1 %875  ;;  %v1478_v48 = vsel %vm1453_vm6, %v1445_v8, %v973_v0  ;;  %v1528_v23 = vsel %vm1519_vm8, %v1495_v34, %v1141_v16 }
 0x207   : > { %v4032_v1 = vpop.permute.xlu0 %843  ;;  %v1447_v22 = vsel %vm1420_vm5, %v3568_v15, %v876_v36 }
 0x208   : > { %1184 = vrot.lane.b32.xlu1 %v1121_v58, %s2427_s11  ;;  %v1431_v19 = vsel %vm1420_vm5, %v3480_v21, %v4032_v1 }
 0x209   : > { %1152 = vrot.lane.b32.xlu0 %v2699_v50, %s2427_s11  ;;  %v1511_v50 = vsel %vm1486_vm7, %v1478_v48, %v1071_v29 }
 0x20a   : > { %v1175_v56 = vpop.permute.xlu1 %1174  ;;  %v1544_v45 = vsel %vm1519_vm8, %v1511_v50, %v1173_v25 }
 0x20b   : > { %v1143_v57 = vpop.permute.xlu0 %1142 }
 0x20c   : > { %1186 = vrot.lane.b32.xlu1 %v1123_v46, %s2427_s11 }
 0x20d   : > { %1154 = vrot.lane.b32.xlu0 %v4476_v44, %s2427_s11  ;;  %v1224_v44 = vsel %vm542_vm1, %v1221_v63, %v1223_v9 }
 0x20e   : > { %v1274_v37 = vpop.permute.xlu1 %1273 }
 0x20f   : > { %v1577_v3 = vsel %vm1552_vm9, %v1544_v45, %v1274_v37  ;;  %v1242_v20 = vpop.permute.xlu0 %1241 }
 0x210   : > { %v1561_v35 = vsel %vm1552_vm9, %v1528_v23, %v1242_v20  ;;  %1285 = vrot.lane.b32.xlu1 %v1222_v52, %s2428_s21  ;;  %2282 = vmatprep.mubr.msk.f32.mxu1 %vm1585_vm10, %v1577_v3  ;;  %v4121_v3 = vld [vmem:[%s4307_s2] ss:$0 sm:$0xff] }
 0x211   : > { %1253 = vrot.lane.b32.xlu0 %v2946_v18, %s2428_s21  ;;  %2258 = vmatprep.mubr.msk.f32.mxu0 %vm1585_vm10, %v1561_v35  ;;  %v1430_v18 = vsel %vm1420_vm5, %v3464_v59, %v3988_v24 }
 0x212   : > { %v878_v0 = vpop.permute.xlu1 %877  ;;  %v1463_v33 = vsel %vm1453_vm6, %v1430_v18, %v943_v27 }
 0x213   : > { %v846_v31 = vpop.permute.xlu0 %845  ;;  %v1496_v13 = vsel %vm1486_vm7, %v1463_v33, %v1041_v14  ;;  %v1448_v63 = vsel %vm1420_vm5, %v3564_v41, %v878_v0  ;;  %v4126_v0 = vld [vmem:[%s4308_s3] ss:$0 sm:$0xff] }
 0x214   : > { %1287 = vrot.lane.b32.xlu1 %v1224_v44, %s2428_s21  ;;  %v1529_v49 = vsel %vm1519_vm8, %v1496_v13, %v1143_v57 }
 0x215   : > { %1255 = vrot.lane.b32.xlu0 %v2941_v7, %s2428_s21  ;;  %v1545_v7 = vsel %vm1519_vm8, %v1512_v26, %v1175_v56  ;;  %v1432_v56 = vsel %vm1420_vm5, %v3476_v53, %v846_v31 }
 0x216   : > { %v977_v43 = vpop.permute.xlu1 %976 }
 0x217   : > { %v945_v6 = vpop.permute.xlu0 %944  ;;  %v1480_v14 = vsel %vm1453_vm6, %v1447_v22, %v977_v43 }
 0x218   : > { %v1464_v4 = vsel %vm1453_vm6, %v1431_v19, %v945_v6 }
 0x21a   : > { %v1276_v54 = vpop.permute.xlu1 %1275 }
 0x21b   : > { %v1578_v28 = vsel %vm1552_vm9, %v1545_v7, %v1276_v54  ;;  %v1244_v40 = vpop.permute.xlu0 %1243 }
 0x21c   : > { %v1562_v2 = vsel %vm1552_vm9, %v1529_v49, %v1244_v40  ;;  %2283 = vmatmul.mubr.msk.f32.gmra.mrb[8].mxu1 %vm1585_vm10, %v1578_v28 }
 0x21d   : > { %2259 = vmatmul.mubr.msk.f32.gmra.mrb[8].mxu0 %vm1585_vm10, %v1562_v2 }
 0x21e   : > { %v979_v59 = vpop.permute.xlu1 %978 }
 0x21f   : > { %v947_v24 = vpop.permute.xlu0 %946  ;;  %v1481_v8 = vsel %vm1453_vm6, %v1448_v63, %v979_v59 }
 0x220   : > { %v1465_v57 = vsel %vm1453_vm6, %v1432_v56, %v947_v24 }
 0x222   : > { %v1075_v62 = vpop.permute.xlu1 %1074 }
 0x223   : > { %v1043_v12 = vpop.permute.xlu0 %1042  ;;  %v1513_v10 = vsel %vm1486_vm7, %v1480_v14, %v1075_v62 }
 0x224   : > { %v1497_v25 = vsel %vm1486_vm7, %v1464_v4, %v1043_v12 }
 0x226   : > { %v1077_v51 = vpop.permute.xlu1 %1076 }
 0x227   : > { %v1045_v60 = vpop.permute.xlu0 %1044  ;;  %v1514_v42 = vsel %vm1486_vm7, %v1481_v8, %v1077_v51 }
 0x228   : > { %v1498_v48 = vsel %vm1486_vm7, %v1465_v57, %v1045_v60  ;;  %v4548_v60 = vld [vmem:[#allocation23_spill] sm:$0xff] }
 0x22a   : > { %v1177_v32 = vpop.permute.xlu1 %1176 }
 0x22b   : > { %v1145_v27 = vpop.permute.xlu0 %1144  ;;  %v1546_v55 = vsel %vm1519_vm8, %v1513_v10, %v1177_v32 }
 0x22c   : > { %v1530_v58 = vsel %vm1519_vm8, %v1497_v25, %v1145_v27 }
 0x22e   : > { %v4081_v39 = vpop.permute.xlu1 %879 }
 0x22f   : > { %v4083_v29 = vpop.permute.xlu0 %847  ;;  %v1449_v32 = vsel %vm1420_vm5, %v4548_v60, %v4081_v39 }
 0x232   : > { %v1179_v38 = vpop.permute.xlu1 %1178 }
 0x233   : > { %v1147_v5 = vpop.permute.xlu0 %1146  ;;  %v1547_v47 = vsel %vm1519_vm8, %v1514_v42, %v1179_v38  ;;  %v4549_v38 = vld [vmem:[#allocation14_spill] sm:$0xff] }
 0x234   : > { %v1531_v52 = vsel %vm1519_vm8, %v1498_v48, %v1147_v5  ;;  %v1433_v22 = vsel %vm1420_vm5, %v4549_v38, %v4083_v29 }
 0x236   : > { %v1278_v16 = vpop.permute.xlu1 %1277 }
 0x237   : > { %v1579_v15 = vsel %vm1552_vm9, %v1546_v55, %v1278_v16  ;;  %v1246_v11 = vpop.permute.xlu0 %1245 }
 0x238   : > { %v1563_v36 = vsel %vm1552_vm9, %v1530_v58, %v1246_v11  ;;  %2285 = vmatprep.mubr.msk.f32.mxu1 %vm1585_vm10, %v1579_v15 }
 0x239   : > { %2261 = vmatprep.mubr.msk.f32.mxu0 %vm1585_vm10, %v1563_v36  ;;  %v4550_v36 = vld [vmem:[#allocation61_spill] sm:$0xff] }
 0x23a   : > { %v4100_v21 = vpop.permute.xlu1 %881 }
 0x23b   : > { %v4102_v1 = vpop.permute.xlu0 %849 }
 0x23e   : > { %v981_v30 = vpop.permute.xlu1 %980 }
 0x23f   : > { %v949_v46 = vpop.permute.xlu0 %948  ;;  %v1482_v5 = vsel %vm1453_vm6, %v1449_v32, %v981_v30  ;;  %v1450_v30 = vsel %vm1420_vm5, %v4550_v36, %v4100_v21  ;;  %v4553_v32 = vld [vmem:[#allocation15_spill] sm:$0xff] }
 0x240   : > { %v1466_v19 = vsel %vm1453_vm6, %v1433_v22, %v949_v46  ;;  %v4551_v46 = vld [vmem:[#allocation3_spill] sm:$0xff] }
 0x241   : > { %v1434_v56 = vsel %vm1420_vm5, %v4551_v46, %v4102_v1 }
 0x242   : > { %v1280_v50 = vpop.permute.xlu1 %1279 }
 0x243   : > { %v1580_v41 = vsel %vm1552_vm9, %v1547_v47, %v1280_v50  ;;  %v1248_v9 = vpop.permute.xlu0 %1247 }
 0x244   : > { %v1564_v34 = vsel %vm1552_vm9, %v1531_v52, %v1248_v9  ;;  %2286 = vmatmul.mubr.msk.f32.gmra.mrb[10].mxu1 %vm1585_vm10, %v1580_v41 }
 0x245   : > { %2262 = vmatmul.mubr.msk.f32.gmra.mrb[10].mxu0 %vm1585_vm10, %v1564_v34 }
 0x246   : > { %v983_v53 = vpop.permute.xlu1 %982 }
 0x247   : > { %v951_v45 = vpop.permute.xlu0 %950  ;;  %v1483_v8 = vsel %vm1453_vm6, %v1450_v30, %v983_v53 }
 0x248   : > { %v1467_v57 = vsel %vm1453_vm6, %v1434_v56, %v951_v45 }
 0x24a   : > { %v1079_v37 = vpop.permute.xlu1 %1078 }
 0x24b   : > { %v1047_v23 = vpop.permute.xlu0 %1046  ;;  %v1515_v14 = vsel %vm1486_vm7, %v1482_v5, %v1079_v37 }
 0x24c   : > { %v1499_v4 = vsel %vm1486_vm7, %v1466_v19, %v1047_v23 }
 0x24e   : > { %v1081_v20 = vpop.permute.xlu1 %1080 }
 0x24f   : > { %v1049_v35 = vpop.permute.xlu0 %1048  ;;  %v2248_v44 = vpop.f32.mrb[0].mxu0  ;;  %v1516_v42 = vsel %vm1486_vm7, %v1483_v8, %v1081_v20 }
 0x250   : > { %v1867_v31 = vmul.f32 %v2248_v44, %v4121_v3  ;;  %v1700_v43 = vpop.f32.mrb[1].mxu0  ;;  %v1500_v48 = vsel %vm1486_vm7, %v1467_v57, %v1049_v35 }
 0x251   : > { %v1866_v61 = vmul.f32 %v4121_v3, %v1700_v43 }
 0x252   : > { %v1906_v6 = vadd.f32 %v4126_v0, %v1867_v31  ;;  %v1181_v18 = vpop.permute.xlu1 %1180 }
 0x253   : > { %v1905_v17 = vadd.f32 %v4126_v0, %v1866_v61  ;;  %v1149_v33 = vpop.permute.xlu0 %1148  ;;  %v1548_v10 = vsel %vm1519_vm8, %v1515_v14, %v1181_v18 }
 0x254   : > { %v1938_v26 = vmax.f32 %v1906_v6, 0.0  ;;  %v2272_v13 = vpop.f32.mrb[0].mxu1  ;;  %v1532_v39 = vsel %vm1519_vm8, %v1499_v4, %v1149_v33 }
 0x255   : > { %v1937_v7 = vmax.f32 %v1905_v17, 0.0  ;;  %v1883_v54 = vmul.f32 %v2272_v13, %v4121_v3  ;;  %v1780_v49 = vpop.f32.mrb[1].mxu1 }
 0x256   : > { %1970 = vst [vmem:[%s4135_s28 + $0x8] sm:$0xff] %v1938_v26  ;;  %v1882_v28 = vmul.f32 %v4121_v3, %v1780_v49  ;;  %v4141_v40 = vpop.permute.xlu1 %883 }
 0x257   : > { %1969 = vst [vmem:[%s4135_s28] sm:$0xff] %v1937_v7  ;;  %v1922_v2 = vadd.f32 %v4126_v0, %v1883_v54  ;;  %v4145_v59 = vpop.permute.xlu0 %851 }
 0x258   : > { %v1921_v24 = vadd.f32 %v4126_v0, %v1882_v28 }
 0x259   : > { %v1954_v62 = vmax.f32 %v1922_v2, 0.0 }
 0x25a   : > { %v1953_v12 = vmax.f32 %v1921_v24, 0.0  ;;  %v1183_v51 = vpop.permute.xlu1 %1182 }
 0x25b   : > { %1986 = vst [vmem:[%s4135_s28 + $0x88] sm:$0xff] %v1954_v62  ;;  %v1151_v27 = vpop.permute.xlu0 %1150  ;;  %v1549_v47 = vsel %vm1519_vm8, %v1516_v42, %v1183_v51 }
 0x25c   : > { %1985 = vst [vmem:[%s4135_s28 + $0x80] sm:$0xff] %v1953_v12  ;;  %v1533_v52 = vsel %vm1519_vm8, %v1500_v48, %v1151_v27  ;;  %v4552_v12 = vld [vmem:[#allocation24_spill] sm:$0xff]  ;;  %v1435_v27 = vsel %vm1420_vm5, %v4553_v32, %v4145_v59 }
 0x25d   : > { %v1451_v51 = vsel %vm1420_vm5, %v4552_v12, %v4141_v40  ;;  %v4554_v40 = vld [vmem:[#allocation62_spill] sm:$0xff] }
 0x25e   : > { %v1282_v25 = vpop.permute.xlu1 %1281 }
 0x25f   : > { %v1581_v55 = vsel %vm1552_vm9, %v1548_v10, %v1282_v25  ;;  %v1250_v16 = vpop.permute.xlu0 %1249 }
 0x260   : > { %v1565_v58 = vsel %vm1552_vm9, %v1532_v39, %v1250_v16  ;;  %2288 = vmatprep.mubr.msk.f32.mxu1 %vm1585_vm10, %v1581_v55  ;;  %v4555_v55 = vld [vmem:[#allocation16_spill] sm:$0xff] }
 0x261   : > { %2264 = vmatprep.mubr.msk.f32.mxu0 %vm1585_vm10, %v1565_v58 }
 0x262   : > { %v886_v29 = vpop.permute.xlu1 %885 }
 0x263   : > { %v854_v15 = vpop.permute.xlu0 %853  ;;  %v1452_v10 = vsel %vm1420_vm5, %v4554_v40, %v886_v29 }
 0x264   : > { %v1436_v16 = vsel %vm1420_vm5, %v4555_v55, %v854_v15 }
 0x266   : > { %v985_v11 = vpop.permute.xlu1 %984 }
 0x267   : > { %v953_v63 = vpop.permute.xlu0 %952  ;;  %v1484_v38 = vsel %vm1453_vm6, %v1451_v51, %v985_v11 }
 0x268   : > { %v1468_v22 = vsel %vm1453_vm6, %v1435_v27, %v953_v63 }
 0x26a   : > { %v1284_v50 = vpop.permute.xlu1 %1283 }
 0x26b   : > { %v1582_v21 = vsel %vm1552_vm9, %v1549_v47, %v1284_v50  ;;  %v1252_v41 = vpop.permute.xlu0 %1251 }
 0x26c   : > { %v1566_v9 = vsel %vm1552_vm9, %v1533_v52, %v1252_v41  ;;  %2289 = vmatmul.mubr.msk.f32.gmra.mrb[12].mxu1 %vm1585_vm10, %v1582_v21 }
 0x26d   : > { %2265 = vmatmul.mubr.msk.f32.gmra.mrb[12].mxu0 %vm1585_vm10, %v1566_v9 }
 0x26e   : > { %v987_v1 = vpop.permute.xlu1 %986 }
 0x26f   : > { %v955_v34 = vpop.permute.xlu0 %954  ;;  %v1485_v58 = vsel %vm1453_vm6, %v1452_v10, %v987_v1 }
 0x270   : > { %v1469_v36 = vsel %vm1453_vm6, %v1436_v16, %v955_v34 }
 0x272   : > { %v1083_v53 = vpop.permute.xlu1 %1082 }
 0x273   : > { %v1051_v45 = vpop.permute.xlu0 %1050  ;;  %v1517_v5 = vsel %vm1486_vm7, %v1484_v38, %v1083_v53 }
 0x274   : > { %v1501_v19 = vsel %vm1486_vm7, %v1468_v22, %v1051_v45 }
 0x276   : > { %v1085_v37 = vpop.permute.xlu1 %1084 }
 0x277   : > { %v1053_v23 = vpop.permute.xlu0 %1052  ;;  %v2275_v20 = vpop.f32.mrb[2].mxu1  ;;  %v1518_v30 = vsel %vm1486_vm7, %v1485_v58, %v1085_v37 }
 0x278   : > { %v2251_v35 = vpop.f32.mrb[2].mxu0  ;;  %v1885_v44 = vmul.f32 %v2275_v20, %v4121_v3  ;;  %v1790_v31 = vpop.f32.mrb[3].mxu1  ;;  %v1502_v29 = vsel %vm1486_vm7, %v1469_v36, %v1053_v23 }
 0x279   : > { %v1869_v43 = vmul.f32 %v2251_v35, %v4121_v3  ;;  %v1710_v61 = vpop.f32.mrb[3].mxu0  ;;  %v1884_v6 = vmul.f32 %v4121_v3, %v1790_v31 }
 0x27a   : > { %v1924_v18 = vadd.f32 %v4126_v0, %v1885_v44  ;;  %v1868_v17 = vmul.f32 %v4121_v3, %v1710_v61  ;;  %v1185_v33 = vpop.permute.xlu1 %1184 }
 0x27b   : > { %v1908_v26 = vadd.f32 %v4126_v0, %v1869_v43  ;;  %v1923_v13 = vadd.f32 %v4126_v0, %v1884_v6  ;;  %v1153_v7 = vpop.permute.xlu0 %1152  ;;  %v1550_v14 = vsel %vm1519_vm8, %v1517_v5, %v1185_v33 }
 0x27c   : > { %v1956_v54 = vmax.f32 %v1924_v18, 0.0  ;;  %v1907_v49 = vadd.f32 %v4126_v0, %v1868_v17  ;;  %v1534_v25 = vsel %vm1519_vm8, %v1501_v19, %v1153_v7 }
 0x27d   : > { %v1940_v28 = vmax.f32 %v1908_v26, 0.0  ;;  %v1955_v2 = vmax.f32 %v1923_v13, 0.0 }
 0x27e   : > { %1988 = vst [vmem:[%s4135_s28 + $0x98] sm:$0xff] %v1956_v54  ;;  %v1939_v24 = vmax.f32 %v1907_v49, 0.0  ;;  %v1187_v62 = vpop.permute.xlu1 %1186 }
 0x27f   : > { %1972 = vst [vmem:[%s4135_s28 + $0x18] sm:$0xff] %v1940_v28  ;;  %1987 = vst [vmem:[%s4135_s28 + $0x90] sm:$0xff] %v1955_v2  ;;  %v1155_v60 = vpop.permute.xlu0 %1154  ;;  %v1551_v63 = vsel %vm1519_vm8, %v1518_v30, %v1187_v62 }
 0x280   : > { %1971 = vst [vmem:[%s4135_s28 + $0x10] sm:$0xff] %v1939_v24  ;;  %v1535_v56 = vsel %vm1519_vm8, %v1502_v29, %v1155_v60 }
 0x282   : > { %v1286_v4 = vpop.permute.xlu1 %1285 }
 0x283   : > { %v1583_v39 = vsel %vm1552_vm9, %v1550_v14, %v1286_v4  ;;  %v1254_v59 = vpop.permute.xlu0 %1253 }
 0x284   : > { %v1567_v11 = vsel %vm1552_vm9, %v1534_v25, %v1254_v59  ;;  %2291 = vmatprep.mubr.msk.f32.mxu1 %vm1585_vm10, %v1583_v39 }
 0x285   : > { %2267 = vmatprep.mubr.msk.f32.mxu0 %vm1585_vm10, %v1567_v11 }
 0x286   : > { %v1288_v46 = vpop.permute.xlu1 %1287 }
 0x287   : > { %v1584_v15 = vsel %vm1552_vm9, %v1551_v63, %v1288_v46  ;;  %v1256_v8 = vpop.permute.xlu0 %1255 }
 0x288   : > { %v1568_v57 = vsel %vm1552_vm9, %v1535_v56, %v1256_v8  ;;  %2292 = vmatmul.mubr.msk.f32.gmra.mrb[14].mxu1 %vm1585_vm10, %v1584_v15 }
 0x289   : > { %2268 = vmatmul.mubr.msk.f32.gmra.mrb[14].mxu0 %vm1585_vm10, %v1568_v57 }
 0x29f   : > { %v2278_v42 = vpop.f32.mrb[4].mxu1 }
 0x2a0   : > { %v2254_v48 = vpop.f32.mrb[4].mxu0  ;;  %v1887_v47 = vmul.f32 %v2278_v42, %v4121_v3  ;;  %v1800_v50 = vpop.f32.mrb[5].mxu1 }
 0x2a1   : > { %v1871_v52 = vmul.f32 %v2254_v48, %v4121_v3  ;;  %v1720_v21 = vpop.f32.mrb[5].mxu0  ;;  %v1886_v41 = vmul.f32 %v4121_v3, %v1800_v50 }
 0x2a2   : > { %v1926_v9 = vadd.f32 %v4126_v0, %v1887_v47  ;;  %v1870_v1 = vmul.f32 %v4121_v3, %v1720_v21 }
 0x2a3   : > { %v1910_v34 = vadd.f32 %v4126_v0, %v1871_v52  ;;  %v1925_v53 = vadd.f32 %v4126_v0, %v1886_v41 }
 0x2a4   : > { %v1958_v45 = vmax.f32 %v1926_v9, 0.0  ;;  %v1909_v37 = vadd.f32 %v4126_v0, %v1870_v1 }
 0x2a5   : > { %v1942_v23 = vmax.f32 %v1910_v34, 0.0  ;;  %v1957_v20 = vmax.f32 %v1925_v53, 0.0 }
 0x2a6   : > { %1990 = vst [vmem:[%s4135_s28 + $0xa8] sm:$0xff] %v1958_v45  ;;  %v1941_v35 = vmax.f32 %v1909_v37, 0.0 }
 0x2a7   : > { %1974 = vst [vmem:[%s4135_s28 + $0x28] sm:$0xff] %v1942_v23  ;;  %1989 = vst [vmem:[%s4135_s28 + $0xa0] sm:$0xff] %v1957_v20 }
 0x2a8   : > { %1973 = vst [vmem:[%s4135_s28 + $0x20] sm:$0xff] %v1941_v35 }
 0x2c7   : > { %v2281_v44 = vpop.f32.mrb[6].mxu1 }
 0x2c8   : > { %v2257_v31 = vpop.f32.mrb[6].mxu0  ;;  %v1889_v43 = vmul.f32 %v2281_v44, %v4121_v3  ;;  %v1810_v61 = vpop.f32.mrb[7].mxu1 }
 0x2c9   : > { %v1873_v6 = vmul.f32 %v2257_v31, %v4121_v3  ;;  %v1730_v18 = vpop.f32.mrb[7].mxu0  ;;  %v1888_v17 = vmul.f32 %v4121_v3, %v1810_v61 }
 0x2ca   : > { %v1928_v33 = vadd.f32 %v4126_v0, %v1889_v43  ;;  %v1872_v26 = vmul.f32 %v4121_v3, %v1730_v18 }
 0x2cb   : > { %v1912_v13 = vadd.f32 %v4126_v0, %v1873_v6  ;;  %v1927_v7 = vadd.f32 %v4126_v0, %v1888_v17 }
 0x2cc   : > { %v1960_v54 = vmax.f32 %v1928_v33, 0.0  ;;  %v1911_v49 = vadd.f32 %v4126_v0, %v1872_v26 }
 0x2cd   : > { %v1944_v28 = vmax.f32 %v1912_v13, 0.0  ;;  %v1959_v2 = vmax.f32 %v1927_v7, 0.0 }
 0x2ce   : > { %1992 = vst [vmem:[%s4135_s28 + $0xb8] sm:$0xff] %v1960_v54  ;;  %v1943_v24 = vmax.f32 %v1911_v49, 0.0 }
 0x2cf   : > { %1976 = vst [vmem:[%s4135_s28 + $0x38] sm:$0xff] %v1944_v28  ;;  %1991 = vst [vmem:[%s4135_s28 + $0xb0] sm:$0xff] %v1959_v2 }
 0x2d0   : > { %1975 = vst [vmem:[%s4135_s28 + $0x30] sm:$0xff] %v1943_v24 }
 0x2ef   : > { %v2284_v62 = vpop.f32.mrb[8].mxu1 }
 0x2f0   : > { %v2260_v12 = vpop.f32.mrb[8].mxu0  ;;  %v1891_v51 = vmul.f32 %v2284_v62, %v4121_v3  ;;  %v1820_v60 = vpop.f32.mrb[9].mxu1 }
 0x2f1   : > { %v1875_v32 = vmul.f32 %v2260_v12, %v4121_v3  ;;  %v1740_v27 = vpop.f32.mrb[9].mxu0  ;;  %v1890_v38 = vmul.f32 %v4121_v3, %v1820_v60 }
 0x2f2   : > { %v1930_v22 = vadd.f32 %v4126_v0, %v1891_v51  ;;  %v1874_v5 = vmul.f32 %v4121_v3, %v1740_v27 }
 0x2f3   : > { %v1914_v19 = vadd.f32 %v4126_v0, %v1875_v32  ;;  %v1929_v14 = vadd.f32 %v4126_v0, %v1890_v38 }
 0x2f4   : > { %v1962_v4 = vmax.f32 %v1930_v22, 0.0  ;;  %v1913_v40 = vadd.f32 %v4126_v0, %v1874_v5 }
 0x2f5   : > { %v1946_v10 = vmax.f32 %v1914_v19, 0.0  ;;  %v1961_v25 = vmax.f32 %v1929_v14, 0.0 }
 0x2f6   : > { %1994 = vst [vmem:[%s4135_s28 + $0xc8] sm:$0xff] %v1962_v4  ;;  %v1945_v39 = vmax.f32 %v1913_v40, 0.0 }
 0x2f7   : > { %1978 = vst [vmem:[%s4135_s28 + $0x48] sm:$0xff] %v1946_v10  ;;  %1993 = vst [vmem:[%s4135_s28 + $0xc0] sm:$0xff] %v1961_v25 }
 0x2f8   : > { %1977 = vst [vmem:[%s4135_s28 + $0x40] sm:$0xff] %v1945_v39 }
 0x317   : > { %v2287_v59 = vpop.f32.mrb[10].mxu1 }
 0x318   : > { %v2263_v55 = vpop.f32.mrb[10].mxu0  ;;  %v1893_v16 = vmul.f32 %v2287_v59, %v4121_v3  ;;  %v1830_v58 = vpop.f32.mrb[11].mxu1 }
 0x319   : > { %v1877_v11 = vmul.f32 %v2263_v55, %v4121_v3  ;;  %v1750_v36 = vpop.f32.mrb[11].mxu0  ;;  %v1892_v30 = vmul.f32 %v4121_v3, %v1830_v58 }
 0x31a   : > { %v1932_v29 = vadd.f32 %v4126_v0, %v1893_v16  ;;  %v1876_v63 = vmul.f32 %v4121_v3, %v1750_v36 }
 0x31b   : > { %v1916_v46 = vadd.f32 %v4126_v0, %v1877_v11  ;;  %v1931_v56 = vadd.f32 %v4126_v0, %v1892_v30 }
 0x31c   : > { %v1964_v15 = vmax.f32 %v1932_v29, 0.0  ;;  %v1915_v8 = vadd.f32 %v4126_v0, %v1876_v63 }
 0x31d   : > { %v1948_v57 = vmax.f32 %v1916_v46, 0.0  ;;  %v1963_v42 = vmax.f32 %v1931_v56, 0.0 }
 0x31e   : > { %1996 = vst [vmem:[%s4135_s28 + $0xd8] sm:$0xff] %v1964_v15  ;;  %v1947_v48 = vmax.f32 %v1915_v8, 0.0 }
 0x31f   : > { %1980 = vst [vmem:[%s4135_s28 + $0x58] sm:$0xff] %v1948_v57  ;;  %1995 = vst [vmem:[%s4135_s28 + $0xd0] sm:$0xff] %v1963_v42 }
 0x320   : > { %1979 = vst [vmem:[%s4135_s28 + $0x50] sm:$0xff] %v1947_v48 }
 0x33f   : > { %v2290_v47 = vpop.f32.mrb[12].mxu1 }
 0x340   : > { %v2266_v50 = vpop.f32.mrb[12].mxu0  ;;  %v1895_v52 = vmul.f32 %v2290_v47, %v4121_v3  ;;  %v1840_v21 = vpop.f32.mrb[13].mxu1 }
 0x341   : > { %v1879_v41 = vmul.f32 %v2266_v50, %v4121_v3  ;;  %v1760_v9 = vpop.f32.mrb[13].mxu0  ;;  %v1894_v1 = vmul.f32 %v4121_v3, %v1840_v21 }
 0x342   : > { %v1934_v34 = vadd.f32 %v4126_v0, %v1895_v52  ;;  %v1878_v53 = vmul.f32 %v4121_v3, %v1760_v9 }
 0x343   : > { %v1918_v45 = vadd.f32 %v4126_v0, %v1879_v41  ;;  %v1933_v37 = vadd.f32 %v4126_v0, %v1894_v1 }
 0x344   : > { %v1966_v23 = vmax.f32 %v1934_v34, 0.0  ;;  %v1917_v20 = vadd.f32 %v4126_v0, %v1878_v53 }
 0x345   : > { %v1950_v35 = vmax.f32 %v1918_v45, 0.0  ;;  %v1965_v44 = vmax.f32 %v1933_v37, 0.0 }
 0x346   : > { %1998 = vst [vmem:[%s4135_s28 + $0xe8] sm:$0xff] %v1966_v23  ;;  %v1949_v31 = vmax.f32 %v1917_v20, 0.0 }
 0x347   : > { %1982 = vst [vmem:[%s4135_s28 + $0x68] sm:$0xff] %v1950_v35  ;;  %1997 = vst [vmem:[%s4135_s28 + $0xe0] sm:$0xff] %v1965_v44 }
 0x348   : > { %1981 = vst [vmem:[%s4135_s28 + $0x60] sm:$0xff] %v1949_v31 }
 0x35b   : > { %v2293_v43 = vpop.f32.mrb[14].mxu1 }
 0x35c   : > { %v2269_v61 = vpop.f32.mrb[14].mxu0  ;;  %v1897_v6 = vmul.f32 %v2293_v43, %v4121_v3  ;;  %v1850_v18 = vpop.f32.mrb[15].mxu1 }
 0x35d   : > { %v1881_v17 = vmul.f32 %v2269_v61, %v4121_v3  ;;  %v1770_v33 = vpop.f32.mrb[15].mxu0  ;;  %v1896_v26 = vmul.f32 %v4121_v3, %v1850_v18 }
 0x35e   : > { %v1936_v13 = vadd.f32 %v4126_v0, %v1897_v6  ;;  %v1880_v7 = vmul.f32 %v4121_v3, %v1770_v33 }
 0x35f   : > { %v1920_v54 = vadd.f32 %v4126_v0, %v1881_v17  ;;  %v1935_v49 = vadd.f32 %v4126_v0, %v1896_v26 }
 0x360   : > { %v1968_v28 = vmax.f32 %v1936_v13, 0.0  ;;  %v1919_v2 = vadd.f32 %v4126_v0, %v1880_v7 }
 0x361   : > { %v1952_v24 = vmax.f32 %v1920_v54, 0.0  ;;  %v1967_v62 = vmax.f32 %v1935_v49, 0.0 }
 0x362   : > { %2000 = vst [vmem:[%s4135_s28 + $0xf8] sm:$0xff] %v1968_v28  ;;  %v1951_v12 = vmax.f32 %v1919_v2, 0.0 }
 0x363   : > { %1984 = vst [vmem:[%s4135_s28 + $0x78] sm:$0xff] %v1952_v24  ;;  %1999 = vst [vmem:[%s4135_s28 + $0xf0] sm:$0xff] %v1967_v62 }
 0x364   : > { %1983 = vst [vmem:[%s4135_s28 + $0x70] sm:$0xff] %v1951_v12 }
 0x365 PF: > { %s14_s17 = sadd.s32 1, %s2419_s17   ;;  %s4556_s15 = smov %s2415_s16 }
 0x366   : > { %p11_p5 = scmp.ge.s32.totalorder %s14_s17, 4   ;;  %s4557_s16 = smov %s4559_s18 }
 0x368   :  { %13 = sbr.rel (!%p11_p5) target bundleno = 2 (0x2), region = 75 }

</bundles_post_ra>
